<compile_context>
chip_gen: v7x
topology: tpu7x:2x2x1
jax: 0.10.0
libtpu: 0.0.40
codegen_flags: <defaults>
</compile_context>

<pallas_src>
import math
import functools

import jax
import jax.numpy as jnp
from jax.experimental import pallas as pl
from jax.experimental.pallas import tpu as pltpu

# ----------------------------- config ---------------------------------------
D_MODEL = 128
VOCAB = 16

_TILE_M_TARGET = 512     # rows per grid step: amortizes ~0.35 us/step overhead;
                         # double-buffered out tiles = 2*512*128*4 B = 512 KiB
_VOCAB_MXU_MIN = 128     # below this the one-hot matmul is mostly MXU padding ->
                         # use the exact VPU compare/select gather instead


# ----------------------------- kernel ----------------------------------------
def _embeddings_kernel(tok_ref, table_ref, o_ref, *, scale, vocab):
    """Gather + sqrt(d_model) scale for one TILE_M-row tile.

    tok_ref:   (1, TILE_M) int32  lane-dense token ids for this tile
    table_ref: (V, D)      f32    full embedding table (VMEM-resident block)
    o_ref:     (TILE_M, D) f32    scaled embeddings
    """
    tile_m, d = o_ref.shape

    # Lane-oriented (1, TILE_M) -> sublane-oriented (TILE_M, 1) column:
    # sublane-broadcast to a full (128, TILE_M) tile, one int32 XLU transpose
    # per 128 tokens, then take lane 0.  XLU slot is idle in this kernel.
    tok_row = tok_ref[...]                                     # (1, TILE_M)
    tok_bcast = jnp.broadcast_to(tok_row, (128, tile_m))       # (128, TILE_M)
    tok_col = jnp.transpose(tok_bcast, (1, 0))[:, 0:1]         # (TILE_M, 1)

    if vocab < _VOCAB_MXU_MIN:
        # Small vocab: exact VPU compare+select, unrolled over table rows.
        # No (TILE_M, V) one-hot materialization, no MXU rounding.
        table = table_ref[...]                                 # (V, D)
        acc = jnp.zeros((tile_m, d), jnp.float32)
        for v in range(vocab):
            acc = jnp.where(tok_col == v, table[v:v + 1, :], acc)
        emb = acc
    else:
        # Larger vocab: one-hot gather on the MXU.  Precision.HIGHEST keeps the
        # f32 table operand exact (preferred_element_type only fixes the acc).
        onehot = (jax.lax.broadcasted_iota(jnp.int32, (tile_m, vocab), 1)
                  == tok_col).astype(jnp.float32)
        emb = jnp.dot(onehot, table_ref[...],
                      preferred_element_type=jnp.float32,
                      precision=jax.lax.Precision.HIGHEST)

    # Out-of-range / negative ids yield an all-zero embedding row (documented
    # behavior; nn.Embedding would error / return garbage instead).
    o_ref[...] = emb * scale


# ----------------------------- wrapper ----------------------------------------
def embeddings_forward(tokens, table):
    """Mirrors Embeddings.forward: lut(x) * sqrt(d_model).

    tokens: int array of shape (...,) e.g. (batch, seq)
    table:  (vocab, d_model) float32
    returns float32 of shape tokens.shape + (d_model,)
    """
    lead_shape = tokens.shape
    V, D = table.shape
    M = 1
    for s in lead_shape:
        M *= s

    # Row tile must be a multiple of 128 (lane-dense token block + 8-sublane
    # output block constraints).  Pad the flattened token stream with id 0;
    # padded rows are sliced off after the call.
    tile_m = min(_TILE_M_TARGET, max(128, pl.cdiv(M, 128) * 128))
    m_pad = pl.cdiv(M, tile_m) * tile_m

    tok = tokens.reshape(-1).astype(jnp.int32)
    tok = jnp.pad(tok, (0, m_pad - M)).reshape(1, m_pad)   # lane-dense: 4 B/token

    kernel = functools.partial(_embeddings_kernel, scale=math.sqrt(D), vocab=V)

    out2d = pl.pallas_call(
        kernel,
        out_shape=jax.ShapeDtypeStruct((m_pad, D), jnp.float32),
        grid=(m_pad // tile_m,),
        in_specs=[
            # Tokens: lane-dense (1, TILE_M) block per grid step.
            pl.BlockSpec((1, tile_m), lambda i: (0, i)),
            # Table: constant index_map -> fetched from HBM once, VMEM-resident
            # across all grid steps.
            pl.BlockSpec((V, D), lambda i: (0, 0)),
        ],
        out_specs=pl.BlockSpec((tile_m, D), lambda i: (i, 0)),
        compiler_params=pltpu.CompilerParams(
            # Row tiles are independent -> shard across both TCs on v7x.
            dimension_semantics=("parallel",)),
        cost_estimate=pl.CostEstimate(
            flops=m_pad * D,                     # fused sqrt(d_model) scale
            transcendentals=0,
            bytes_accessed=m_pad * 4 + V * D * 4 + m_pad * D * 4),
    )(tok, table)

    # TODO(synk): for production vocabs whose f32 table exceeds v7x's 64 MiB VMEM
    # (e.g. 32K x 512), keep the table in HBM (memory_space=pl.ANY) and DMA-gather
    # rows with scalar-prefetched token ids (PrefetchScalarGridSpec), or store it
    # in bf16.
    return out2d[:M].reshape(*lead_shape, D)


# ----------------------------- main -------------------------------------------
if __name__ == "__main__":
    B, L = 2, 8
    root = jax.random.PRNGKey(0)
    k_tab, k_tok = jax.random.split(root)

    table = jax.random.normal(k_tab, (VOCAB, D_MODEL), jnp.float32) * 0.1
    tokens = jax.random.randint(k_tok, (B, L), 0, VOCAB, dtype=jnp.int32)

    out = embeddings_forward(tokens, table)
    out = jax.block_until_ready(out)

    # pure-JAX reference: nn.Embedding lookup * sqrt(d_model)
    ref = table[tokens] * math.sqrt(D_MODEL)

    assert out.shape == (B, L, D_MODEL)
    assert bool(jnp.all(jnp.isfinite(out)))
    assert bool(jnp.allclose(out, ref, atol=1e-5, rtol=1e-5))
    print("KERNEL_OK")
</pallas_src>

<mosaic_0001>
module attributes {stable_mosaic.version = 11 : i64} {
  func.func @_embeddings_kernel(%arg0: i32, %arg1: memref<1x128xi32, #tpu.memory_space<vmem>>, %arg2: memref<16x128xf32, #tpu.memory_space<vmem>>, %arg3: memref<128x128xf32, #tpu.memory_space<vmem>>) attributes {dimension_semantics = [#tpu.dimension_semantics<parallel>], iteration_bounds = array<i64: 1>, scalar_prefetch = 0 : i64, scratch_operands = 0 : i64, tpu.core_type = #tpu.core_type<tc>, window_params = [{transform_indices = @transform_0, window_bounds = array<i64: 1, 128>}, {pipeline_mode = #tpu.pipeline_mode<synchronous>, transform_indices = @transform_1, window_bounds = array<i64: 16, 128>}, {transform_indices = @transform_2, window_bounds = array<i64: 128, 128>}]} {
    %c0 = arith.constant 0 : index
    %c0_0 = arith.constant 0 : index
    %0 = vector.load %arg1[%c0, %c0_0] : memref<1x128xi32, #tpu.memory_space<vmem>>, vector<1x128xi32>
    %1 = vector.shape_cast %0 : vector<1x128xi32> to vector<1x128xi32>
    %2 = vector.broadcast %1 : vector<1x128xi32> to vector<128x128xi32>
    %3 = tpu.transpose %2, [1, 0] : vector<128x128xi32> -> vector<128x128xi32>
    %4 = vector.extract_strided_slice %3 {offsets = [0, 0], sizes = [128, 1], strides = [1, 1]} : vector<128x128xi32> to vector<128x1xi32>
    %c0_1 = arith.constant 0 : index
    %c0_2 = arith.constant 0 : index
    %5 = vector.load %arg2[%c0_1, %c0_2] : memref<16x128xf32, #tpu.memory_space<vmem>>, vector<16x128xf32>
    %cst = arith.constant 0.000000e+00 : f32
    %6 = vector.broadcast %cst : f32 to vector<128x128xf32>
    %c0_i32 = arith.constant 0 : i32
    %7 = vector.broadcast %c0_i32 : i32 to vector<128x1xi32>
    %8 = arith.cmpi eq, %4, %7 : vector<128x1xi32>
    %9 = vector.extract_strided_slice %5 {offsets = [0, 0], sizes = [1, 128], strides = [1, 1]} : vector<16x128xf32> to vector<1x128xf32>
    %10 = vector.shape_cast %8 : vector<128x1xi1> to vector<128x1xi1>
    %11 = vector.broadcast %10 : vector<128x1xi1> to vector<128x128xi1>
    %12 = vector.shape_cast %9 : vector<1x128xf32> to vector<1x128xf32>
    %13 = vector.broadcast %12 : vector<1x128xf32> to vector<128x128xf32>
    %14 = arith.select %11, %13, %6 : vector<128x128xi1>, vector<128x128xf32>
    %c1_i32 = arith.constant 1 : i32
    %15 = vector.broadcast %c1_i32 : i32 to vector<128x1xi32>
    %16 = arith.cmpi eq, %4, %15 : vector<128x1xi32>
    %17 = vector.extract_strided_slice %5 {offsets = [1, 0], sizes = [1, 128], strides = [1, 1]} : vector<16x128xf32> to vector<1x128xf32>
    %18 = vector.shape_cast %16 : vector<128x1xi1> to vector<128x1xi1>
    %19 = vector.broadcast %18 : vector<128x1xi1> to vector<128x128xi1>
    %20 = vector.shape_cast %17 : vector<1x128xf32> to vector<1x128xf32>
    %21 = vector.broadcast %20 : vector<1x128xf32> to vector<128x128xf32>
    %22 = arith.select %19, %21, %14 : vector<128x128xi1>, vector<128x128xf32>
    %c2_i32 = arith.constant 2 : i32
    %23 = vector.broadcast %c2_i32 : i32 to vector<128x1xi32>
    %24 = arith.cmpi eq, %4, %23 : vector<128x1xi32>
    %25 = vector.extract_strided_slice %5 {offsets = [2, 0], sizes = [1, 128], strides = [1, 1]} : vector<16x128xf32> to vector<1x128xf32>
    %26 = vector.shape_cast %24 : vector<128x1xi1> to vector<128x1xi1>
    %27 = vector.broadcast %26 : vector<128x1xi1> to vector<128x128xi1>
    %28 = vector.shape_cast %25 : vector<1x128xf32> to vector<1x128xf32>
    %29 = vector.broadcast %28 : vector<1x128xf32> to vector<128x128xf32>
    %30 = arith.select %27, %29, %22 : vector<128x128xi1>, vector<128x128xf32>
    %c3_i32 = arith.constant 3 : i32
    %31 = vector.broadcast %c3_i32 : i32 to vector<128x1xi32>
    %32 = arith.cmpi eq, %4, %31 : vector<128x1xi32>
    %33 = vector.extract_strided_slice %5 {offsets = [3, 0], sizes = [1, 128], strides = [1, 1]} : vector<16x128xf32> to vector<1x128xf32>
    %34 = vector.shape_cast %32 : vector<128x1xi1> to vector<128x1xi1>
    %35 = vector.broadcast %34 : vector<128x1xi1> to vector<128x128xi1>
    %36 = vector.shape_cast %33 : vector<1x128xf32> to vector<1x128xf32>
    %37 = vector.broadcast %36 : vector<1x128xf32> to vector<128x128xf32>
    %38 = arith.select %35, %37, %30 : vector<128x128xi1>, vector<128x128xf32>
    %c4_i32 = arith.constant 4 : i32
    %39 = vector.broadcast %c4_i32 : i32 to vector<128x1xi32>
    %40 = arith.cmpi eq, %4, %39 : vector<128x1xi32>
    %41 = vector.extract_strided_slice %5 {offsets = [4, 0], sizes = [1, 128], strides = [1, 1]} : vector<16x128xf32> to vector<1x128xf32>
    %42 = vector.shape_cast %40 : vector<128x1xi1> to vector<128x1xi1>
    %43 = vector.broadcast %42 : vector<128x1xi1> to vector<128x128xi1>
    %44 = vector.shape_cast %41 : vector<1x128xf32> to vector<1x128xf32>
    %45 = vector.broadcast %44 : vector<1x128xf32> to vector<128x128xf32>
    %46 = arith.select %43, %45, %38 : vector<128x128xi1>, vector<128x128xf32>
    %c5_i32 = arith.constant 5 : i32
    %47 = vector.broadcast %c5_i32 : i32 to vector<128x1xi32>
    %48 = arith.cmpi eq, %4, %47 : vector<128x1xi32>
    %49 = vector.extract_strided_slice %5 {offsets = [5, 0], sizes = [1, 128], strides = [1, 1]} : vector<16x128xf32> to vector<1x128xf32>
    %50 = vector.shape_cast %48 : vector<128x1xi1> to vector<128x1xi1>
    %51 = vector.broadcast %50 : vector<128x1xi1> to vector<128x128xi1>
    %52 = vector.shape_cast %49 : vector<1x128xf32> to vector<1x128xf32>
    %53 = vector.broadcast %52 : vector<1x128xf32> to vector<128x128xf32>
    %54 = arith.select %51, %53, %46 : vector<128x128xi1>, vector<128x128xf32>
    %c6_i32 = arith.constant 6 : i32
    %55 = vector.broadcast %c6_i32 : i32 to vector<128x1xi32>
    %56 = arith.cmpi eq, %4, %55 : vector<128x1xi32>
    %57 = vector.extract_strided_slice %5 {offsets = [6, 0], sizes = [1, 128], strides = [1, 1]} : vector<16x128xf32> to vector<1x128xf32>
    %58 = vector.shape_cast %56 : vector<128x1xi1> to vector<128x1xi1>
    %59 = vector.broadcast %58 : vector<128x1xi1> to vector<128x128xi1>
    %60 = vector.shape_cast %57 : vector<1x128xf32> to vector<1x128xf32>
    %61 = vector.broadcast %60 : vector<1x128xf32> to vector<128x128xf32>
    %62 = arith.select %59, %61, %54 : vector<128x128xi1>, vector<128x128xf32>
    %c7_i32 = arith.constant 7 : i32
    %63 = vector.broadcast %c7_i32 : i32 to vector<128x1xi32>
    %64 = arith.cmpi eq, %4, %63 : vector<128x1xi32>
    %65 = vector.extract_strided_slice %5 {offsets = [7, 0], sizes = [1, 128], strides = [1, 1]} : vector<16x128xf32> to vector<1x128xf32>
    %66 = vector.shape_cast %64 : vector<128x1xi1> to vector<128x1xi1>
    %67 = vector.broadcast %66 : vector<128x1xi1> to vector<128x128xi1>
    %68 = vector.shape_cast %65 : vector<1x128xf32> to vector<1x128xf32>
    %69 = vector.broadcast %68 : vector<1x128xf32> to vector<128x128xf32>
    %70 = arith.select %67, %69, %62 : vector<128x128xi1>, vector<128x128xf32>
    %c8_i32 = arith.constant 8 : i32
    %71 = vector.broadcast %c8_i32 : i32 to vector<128x1xi32>
    %72 = arith.cmpi eq, %4, %71 : vector<128x1xi32>
    %73 = vector.extract_strided_slice %5 {offsets = [8, 0], sizes = [1, 128], strides = [1, 1]} : vector<16x128xf32> to vector<1x128xf32>
    %74 = vector.shape_cast %72 : vector<128x1xi1> to vector<128x1xi1>
    %75 = vector.broadcast %74 : vector<128x1xi1> to vector<128x128xi1>
    %76 = vector.shape_cast %73 : vector<1x128xf32> to vector<1x128xf32>
    %77 = vector.broadcast %76 : vector<1x128xf32> to vector<128x128xf32>
    %78 = arith.select %75, %77, %70 : vector<128x128xi1>, vector<128x128xf32>
    %c9_i32 = arith.constant 9 : i32
    %79 = vector.broadcast %c9_i32 : i32 to vector<128x1xi32>
    %80 = arith.cmpi eq, %4, %79 : vector<128x1xi32>
    %81 = vector.extract_strided_slice %5 {offsets = [9, 0], sizes = [1, 128], strides = [1, 1]} : vector<16x128xf32> to vector<1x128xf32>
    %82 = vector.shape_cast %80 : vector<128x1xi1> to vector<128x1xi1>
    %83 = vector.broadcast %82 : vector<128x1xi1> to vector<128x128xi1>
    %84 = vector.shape_cast %81 : vector<1x128xf32> to vector<1x128xf32>
    %85 = vector.broadcast %84 : vector<1x128xf32> to vector<128x128xf32>
    %86 = arith.select %83, %85, %78 : vector<128x128xi1>, vector<128x128xf32>
    %c10_i32 = arith.constant 10 : i32
    %87 = vector.broadcast %c10_i32 : i32 to vector<128x1xi32>
    %88 = arith.cmpi eq, %4, %87 : vector<128x1xi32>
    %89 = vector.extract_strided_slice %5 {offsets = [10, 0], sizes = [1, 128], strides = [1, 1]} : vector<16x128xf32> to vector<1x128xf32>
    %90 = vector.shape_cast %88 : vector<128x1xi1> to vector<128x1xi1>
    %91 = vector.broadcast %90 : vector<128x1xi1> to vector<128x128xi1>
    %92 = vector.shape_cast %89 : vector<1x128xf32> to vector<1x128xf32>
    %93 = vector.broadcast %92 : vector<1x128xf32> to vector<128x128xf32>
    %94 = arith.select %91, %93, %86 : vector<128x128xi1>, vector<128x128xf32>
    %c11_i32 = arith.constant 11 : i32
    %95 = vector.broadcast %c11_i32 : i32 to vector<128x1xi32>
    %96 = arith.cmpi eq, %4, %95 : vector<128x1xi32>
    %97 = vector.extract_strided_slice %5 {offsets = [11, 0], sizes = [1, 128], strides = [1, 1]} : vector<16x128xf32> to vector<1x128xf32>
    %98 = vector.shape_cast %96 : vector<128x1xi1> to vector<128x1xi1>
    %99 = vector.broadcast %98 : vector<128x1xi1> to vector<128x128xi1>
    %100 = vector.shape_cast %97 : vector<1x128xf32> to vector<1x128xf32>
    %101 = vector.broadcast %100 : vector<1x128xf32> to vector<128x128xf32>
    %102 = arith.select %99, %101, %94 : vector<128x128xi1>, vector<128x128xf32>
    %c12_i32 = arith.constant 12 : i32
    %103 = vector.broadcast %c12_i32 : i32 to vector<128x1xi32>
    %104 = arith.cmpi eq, %4, %103 : vector<128x1xi32>
    %105 = vector.extract_strided_slice %5 {offsets = [12, 0], sizes = [1, 128], strides = [1, 1]} : vector<16x128xf32> to vector<1x128xf32>
    %106 = vector.shape_cast %104 : vector<128x1xi1> to vector<128x1xi1>
    %107 = vector.broadcast %106 : vector<128x1xi1> to vector<128x128xi1>
    %108 = vector.shape_cast %105 : vector<1x128xf32> to vector<1x128xf32>
    %109 = vector.broadcast %108 : vector<1x128xf32> to vector<128x128xf32>
    %110 = arith.select %107, %109, %102 : vector<128x128xi1>, vector<128x128xf32>
    %c13_i32 = arith.constant 13 : i32
    %111 = vector.broadcast %c13_i32 : i32 to vector<128x1xi32>
    %112 = arith.cmpi eq, %4, %111 : vector<128x1xi32>
    %113 = vector.extract_strided_slice %5 {offsets = [13, 0], sizes = [1, 128], strides = [1, 1]} : vector<16x128xf32> to vector<1x128xf32>
    %114 = vector.shape_cast %112 : vector<128x1xi1> to vector<128x1xi1>
    %115 = vector.broadcast %114 : vector<128x1xi1> to vector<128x128xi1>
    %116 = vector.shape_cast %113 : vector<1x128xf32> to vector<1x128xf32>
    %117 = vector.broadcast %116 : vector<1x128xf32> to vector<128x128xf32>
    %118 = arith.select %115, %117, %110 : vector<128x128xi1>, vector<128x128xf32>
    %c14_i32 = arith.constant 14 : i32
    %119 = vector.broadcast %c14_i32 : i32 to vector<128x1xi32>
    %120 = arith.cmpi eq, %4, %119 : vector<128x1xi32>
    %121 = vector.extract_strided_slice %5 {offsets = [14, 0], sizes = [1, 128], strides = [1, 1]} : vector<16x128xf32> to vector<1x128xf32>
    %122 = vector.shape_cast %120 : vector<128x1xi1> to vector<128x1xi1>
    %123 = vector.broadcast %122 : vector<128x1xi1> to vector<128x128xi1>
    %124 = vector.shape_cast %121 : vector<1x128xf32> to vector<1x128xf32>
    %125 = vector.broadcast %124 : vector<1x128xf32> to vector<128x128xf32>
    %126 = arith.select %123, %125, %118 : vector<128x128xi1>, vector<128x128xf32>
    %c15_i32 = arith.constant 15 : i32
    %127 = vector.broadcast %c15_i32 : i32 to vector<128x1xi32>
    %128 = arith.cmpi eq, %4, %127 : vector<128x1xi32>
    %129 = vector.extract_strided_slice %5 {offsets = [15, 0], sizes = [1, 128], strides = [1, 1]} : vector<16x128xf32> to vector<1x128xf32>
    %130 = vector.shape_cast %128 : vector<128x1xi1> to vector<128x1xi1>
    %131 = vector.broadcast %130 : vector<128x1xi1> to vector<128x128xi1>
    %132 = vector.shape_cast %129 : vector<1x128xf32> to vector<1x128xf32>
    %133 = vector.broadcast %132 : vector<1x128xf32> to vector<128x128xf32>
    %134 = arith.select %131, %133, %126 : vector<128x128xi1>, vector<128x128xf32>
    %cst_3 = arith.constant 11.3137083 : f32
    %135 = vector.broadcast %cst_3 : f32 to vector<128x128xf32>
    %136 = arith.mulf %134, %135 : vector<128x128xf32>
    %c0_4 = arith.constant 0 : index
    %c0_5 = arith.constant 0 : index
    %137 = vector.load %arg3[%c0_4, %c0_5] : memref<128x128xf32, #tpu.memory_space<vmem>>, vector<128x128xf32>
    tpu.vector_store %arg3[%c0_4, %c0_5], %136 {strides = array<i32>} : memref<128x128xf32, #tpu.memory_space<vmem>>, vector<128x128xf32>,
    return
  }
  func.func @transform_0(%arg0: i32) -> (i32, i32) {
    %c0_i32 = arith.constant 0 : i32
    %c0_i32_0 = arith.constant 0 : i32
    return %c0_i32, %arg0 : i32, i32
  }
  func.func @transform_1(%arg0: i32) -> (i32, i32) {
    %c0_i32 = arith.constant 0 : i32
    %c0_i32_0 = arith.constant 0 : i32
    %c0_i32_1 = arith.constant 0 : i32
    return %c0_i32, %c0_i32_0 : i32, i32
  }
  func.func @transform_2(%arg0: i32) -> (i32, i32) {
    %c0_i32 = arith.constant 0 : i32
    %c0_i32_0 = arith.constant 0 : i32
    return %arg0, %c0_i32 : i32, i32
  }
}

</mosaic_0001>

<bundles_post_ra>
// kernel: tpu_custom_call.1
= control target key start
LH: loop header
LB: loop body
LE: loop exit
PB: predicated region body
PF: predicated region fallthrough
CT: control target
= control target key end

     0   :  { %7 = vsyncpa [#allocation3], 0  ;;  %s3950_s0 = inlined_call_operand.hbm [shape: s32[1,128], index: 0, kind: input, shape index: {}]   ;;  %s3951_s1 = inlined_call_operand.hbm [shape: f32[16,128], index: 1, kind: input, shape index: {}]   ;;  %s3952_s2 = inlined_call_operand.hbm [shape: f32[128,128], index: 2, kind: output, shape index: {}]  }
   0x1   :  { %8 = vsyncpa [#allocation6], 0 }
   0x2   :  { %9 = vsyncpa [#allocation4], 0  ;;  %s2065_s9 = smov [#allocation2]   ;;  %s2066_s11 = smov [#allocation5]  }
   0x3   :  { %s16_s10 = sshll.u32 %s2065_s9, 4  ;;  %s25_s12 = sshll.u32 %s2066_s11, 4  ;;  %s17_s10 = int_to_ptr.vmem [resolvable:$true] %s16_s10  ;;  %s2086_s12 = int_to_ptr.vmem [resolvable:$true] %s25_s12 }
   0x4   :  { %s1993_s15 = scalar_lea.hbm %s3950_s0, 16 }
   0x5   :  { %p1994_p0 = scmp.ne.s32.totalorder %s3950_s0, %s1993_s15  ;;  %p1997_p1 = scmp.lt.u32.totalorder %s1993_s15, %s3950_s0 }
   0x7   :  { %p1999_p2 = pnand %p1997_p1, %p1994_p0 }
   0x9   :  { %2002 = shalt.err (!%p1999_p2)
}
   0xa   :  { %s2003_s20 = scalar_lea.vmem %s17_s10, 16  ;;  %s2007_s21 = scalar_lea.vmem %s17_s10, 32 }
   0xb   :  { %p2004_p3 = scmp.ne.s32.totalorder %s17_s10, %s2003_s20  ;;  %p2008_p4 = scmp.lt.s32.totalorder %s17_s10, %s17_s10 }
   0xc   :  { %p2009_p5 = scmp.lt.s32.totalorder %s2007_s21, %s2003_s20 }
   0xe   :  { %p2010_p6 = por %p2009_p5, %p2008_p4 }
  0x10   :  { %p2011_p7 = pnand %p2010_p6, %p2004_p3 }
  0x12   :  { %2014 = shalt.err (!%p2011_p7)
}
  0x13   :  { %19 = dma.hbm_to_vmem [thread:$0]  %s3950_s0, 16, %s17_s10, [#allocation3]  }
  0x14   :  { %s2015_s26 = scalar_lea.hbm %s3951_s1, 256 }
  0x15   :  { %p2016_p8 = scmp.ne.s32.totalorder %s3951_s1, %s2015_s26  ;;  %p2019_p9 = scmp.lt.u32.totalorder %s2015_s26, %s3951_s1 }
  0x17   :  { %p2021_p10 = pnand %p2019_p9, %p2016_p8 }
  0x19   :  { %2024 = shalt.err (!%p2021_p10)
}
  0x1a   :  { %s2025_s3 = scalar_lea.vmem %s2086_s12, 256  ;;  %p2030_p12 = scmp.lt.s32.totalorder %s2086_s12, %s2086_s12 }
  0x1b   :  { %p2026_p11 = scmp.ne.s32.totalorder %s2086_s12, %s2025_s3  ;;  %p2031_p13 = scmp.lt.s32.totalorder %s2025_s3, %s2025_s3 }
  0x1d   :  { %p2032_p0 = por %p2031_p13, %p2030_p12 }
  0x1f   :  { %p2033_p1 = pnand %p2032_p0, %p2026_p11 }
  0x21   :  { %2036 = shalt.err (!%p2033_p1)
}
  0x22   :  { %s2067_s0 = smov 128   ;;  %s2068_s4 = smov 8  }
  0x23   :  { %31 = dma.hbm_to_vmem [thread:$0]  %s3951_s1, 256, %s2086_s12, [#allocation6], %s2067_s0, %s2067_s0, %s2068_s4  }
  0x24   :  { %2059 = dma.done.wait [#allocation3], 16  }
  0x25   :  { %2060 = vsyncadd [#allocation3], 4294967280 }
  0x26   :  { %2061 = dma.done.wait [#allocation6], 256  }
  0x27   :  { %2062 = vsyncadd [#allocation6], 4294967040  ;;  %v1983_v0 = vld [vmem:[#allocation2] ss:$0 sm:$0xff]  ;;  %v3985_v1 = vmov 0   ;;  %s2070_s1 = smov [#allocation7]  }
  0x28   :  { %43 = vxpose.xlu0.b32.start [1/16] %v1983_v0, 128  ;;  %1990 = vset.pattern.permute.xlu1 %v3985_v1  ;;  %s1970_s7 = sshll.u32 %s2070_s1, 4  ;;  %s1971_s7 = int_to_ptr.vmem [resolvable:$true] %s1970_s7 }
  0x29   :  { %s2037_s8 = scalar_lea.vmem %s1971_s7, 2048  ;;  %p2042_p3 = scmp.lt.s32.totalorder %s1971_s7, %s1971_s7 }
  0x2a   :  { %p2038_p2 = scmp.ne.s32.totalorder %s1971_s7, %s2037_s8  ;;  %p2043_p4 = scmp.lt.s32.totalorder %s2037_s8, %s2037_s8 }
  0x2c   :  { %44 = vxpose.xlu0.b32.cont [2/16] %v1983_v0, 128  ;;  %p2044_p5 = por %p2043_p4, %p2042_p3 }
  0x2e   :  { %p2045_p6 = pnand %p2044_p5, %p2038_p2 }
  0x30   :  { %45 = vxpose.xlu0.b32.cont [3/16] %v1983_v0, 128 }
  0x34   :  { %46 = vxpose.xlu0.b32.cont [4/16] %v1983_v0, 128 }
  0x38   :  { %47 = vxpose.xlu0.b32.cont [5/16] %v1983_v0, 128 }
  0x3c   :  { %48 = vxpose.xlu0.b32.cont [6/16] %v1983_v0, 128 }
  0x40   :  { %49 = vxpose.xlu0.b32.cont [7/16] %v1983_v0, 128 }
  0x44   :  { %50 = vxpose.xlu0.b32.cont [8/16] %v1983_v0, 128 }
  0x48   :  { %51 = vxpose.xlu0.b32.cont [9/16] %v1983_v0, 128 }
  0x4c   :  { %52 = vxpose.xlu0.b32.cont [10/16] %v1983_v0, 128 }
  0x50   :  { %53 = vxpose.xlu0.b32.cont [11/16] %v1983_v0, 128 }
  0x54   :  { %54 = vxpose.xlu0.b32.cont [12/16] %v1983_v0, 128 }
  0x58   :  { %55 = vxpose.xlu0.b32.cont [13/16] %v1983_v0, 128 }
  0x5c   :  { %56 = vxpose.xlu0.b32.cont [14/16] %v1983_v0, 128 }
  0x60   :  { %57 = vxpose.xlu0.b32.cont [15/16] %v1983_v0, 128 }
  0x64   :  { %58 = vxpose.xlu0.b32.end [16/16] %v1983_v0, 128 }
  0x8d   :  { %1991 = vset.pattern.permute.xlu0 %v3985_v1 }
  0xa8   :  { %v2122_v2 = vpop.trf.xlu0 }
  0xa9   :  { %vm193_vm0 = vcmp.eq.s32.totalorder %v2122_v2, 1  ;;  %vm77_vm1 = vcmp.eq.s32.totalorder %v2122_v2, 0  ;;  %vm309_vm2 = vcmp.eq.s32.totalorder %v2122_v2, 2  ;;  %vm425_vm4 = vcmp.eq.s32.totalorder %v2122_v2, 3 }
  0xaa   :  { %v209_v3 = vsel %vm193_vm0, 1, %v3985_v1  ;;  %v93_v4 = vsel %vm77_vm1, 1, %v3985_v1  ;;  %v325_v6 = vsel %vm309_vm2, 1, %v3985_v1  ;;  %v441_v8 = vsel %vm425_vm4, 1, %v3985_v1 }
  0xab   :  { %226 = vperm.xlu0 %1991, %v209_v3   ;;  %110 = vperm.xlu1 %1990, %v93_v4   ;;  %vm541_vm6 = vcmp.eq.s32.totalorder %v2122_v2, 4 }
  0xac   :  { %v2129_v5 = vpop.trf.xlu0  ;;  %v557_v11 = vsel %vm541_vm6, 1, %v3985_v1 }
  0xad   :  { %4007 = vst [vmem:[#allocation11_spill] sm:$0xff] %v2129_v5  ;;  %vm78_vm3 = vcmp.eq.s32.totalorder %v2129_v5, 0  ;;  %vm194_vm5 = vcmp.eq.s32.totalorder %v2129_v5, 1  ;;  %vm310_vm7 = vcmp.eq.s32.totalorder %v2129_v5, 2  ;;  %vm426_vm9 = vcmp.eq.s32.totalorder %v2129_v5, 3 }
  0xae   :  { %v94_v7 = vsel %vm78_vm3, 1, %v3985_v1  ;;  %v210_v9 = vsel %vm194_vm5, 1, %v3985_v1  ;;  %v326_v12 = vsel %vm310_vm7, 1, %v3985_v1  ;;  %v442_v15 = vsel %vm426_vm9, 1, %v3985_v1 }
  0xaf   :  { %342 = vperm.xlu0 %1991, %v325_v6   ;;  %113 = vperm.xlu1 %1990, %v94_v7   ;;  %vm542_vm11 = vcmp.eq.s32.totalorder %v2129_v5, 4 }
  0xb0   :  { %v2138_v10 = vpop.trf.xlu0  ;;  %v558_v17 = vsel %vm542_vm11, 1, %v3985_v1 }
  0xb1   :  { %vm311_vm8 = vcmp.eq.s32.totalorder %v2138_v10, 2  ;;  %vm427_vm10 = vcmp.eq.s32.totalorder %v2138_v10, 3  ;;  %vm543_vm12 = vcmp.eq.s32.totalorder %v2138_v10, 4  ;;  %vm79_vm13 = vcmp.eq.s32.totalorder %v2138_v10, 0 }
  0xb2   :  { %v327_v13 = vsel %vm311_vm8, 1, %v3985_v1  ;;  %v443_v16 = vsel %vm427_vm10, 1, %v3985_v1  ;;  %v559_v19 = vsel %vm543_vm12, 1, %v3985_v1  ;;  %v95_v20 = vsel %vm79_vm13, 1, %v3985_v1 }
  0xb3   :  { %458 = vperm.xlu0 %1991, %v441_v8   ;;  %229 = vperm.xlu1 %1990, %v210_v9   ;;  %vm195_vm15 = vcmp.eq.s32.totalorder %v2138_v10, 1 }
  0xb4   :  { %v2147_v14 = vpop.trf.xlu0  ;;  %v211_v23 = vsel %vm195_vm15, 1, %v3985_v1 }
  0xb5   :  { %4008 = vst [vmem:[#allocation12_spill] sm:$0xff] %v2147_v14  ;;  %vm80_vm0 = vcmp.eq.s32.totalorder %v2147_v14, 0  ;;  %vm196_vm3 = vcmp.eq.s32.totalorder %v2147_v14, 1  ;;  %vm312_vm5 = vcmp.eq.s32.totalorder %v2147_v14, 2  ;;  %vm428_vm7 = vcmp.eq.s32.totalorder %v2147_v14, 3 }
  0xb6   :  { %v96_v24 = vsel %vm80_vm0, 1, %v3985_v1  ;;  %v212_v28 = vsel %vm196_vm3, 1, %v3985_v1  ;;  %v328_v31 = vsel %vm312_vm5, 1, %v3985_v1  ;;  %v444_v34 = vsel %vm428_vm7, 1, %v3985_v1 }
  0xb7   :  { %574 = vperm.xlu0 %1991, %v557_v11   ;;  %345 = vperm.xlu1 %1990, %v326_v12   ;;  %vm544_vm9 = vcmp.eq.s32.totalorder %v2147_v14, 4 }
  0xb8   :  { %v2156_v18 = vpop.trf.xlu0  ;;  %v560_v37 = vsel %vm544_vm9, 1, %v3985_v1 }
  0xb9   :  { %vm313_vm14 = vcmp.eq.s32.totalorder %v2156_v18, 2  ;;  %vm429_vm1 = vcmp.eq.s32.totalorder %v2156_v18, 3  ;;  %vm545_vm2 = vcmp.eq.s32.totalorder %v2156_v18, 4  ;;  %vm81_vm10 = vcmp.eq.s32.totalorder %v2156_v18, 0 }
  0xba   :  { %v329_v21 = vsel %vm313_vm14, 1, %v3985_v1  ;;  %v445_v25 = vsel %vm429_vm1, 1, %v3985_v1  ;;  %v561_v27 = vsel %vm545_vm2, 1, %v3985_v1  ;;  %v97_v38 = vsel %vm81_vm10, 1, %v3985_v1 }
  0xbb   :  { %461 = vperm.xlu1 %1990, %v442_v15   ;;  %348 = vperm.xlu0 %1991, %v327_v13   ;;  %vm197_vm13 = vcmp.eq.s32.totalorder %v2156_v18, 1 }
  0xbc   :  { %v2163_v22 = vpop.trf.xlu0  ;;  %v213_v42 = vsel %vm197_vm13, 1, %v3985_v1 }
  0xbd   :  { %4009 = vst [vmem:[#allocation13_spill] sm:$0xff] %v2163_v22  ;;  %vm82_vm14 = vcmp.eq.s32.totalorder %v2163_v22, 0  ;;  %vm198_vm1 = vcmp.eq.s32.totalorder %v2163_v22, 1  ;;  %vm314_vm3 = vcmp.eq.s32.totalorder %v2163_v22, 2  ;;  %vm430_vm5 = vcmp.eq.s32.totalorder %v2163_v22, 3 }
  0xbe   :  { %v98_v43 = vsel %vm82_vm14, 1, %v3985_v1  ;;  %v214_v47 = vsel %vm198_vm1, 1, %v3985_v1  ;;  %v330_v50 = vsel %vm314_vm3, 1, %v3985_v1  ;;  %v446_v53 = vsel %vm430_vm5, 1, %v3985_v1 }
  0xbf   :  { %577 = vperm.xlu1 %1990, %v558_v17   ;;  %464 = vperm.xlu0 %1991, %v443_v16   ;;  %vm546_vm7 = vcmp.eq.s32.totalorder %v2163_v22, 4 }
  0xc0   :  { %v2171_v26 = vpop.trf.xlu0  ;;  %v562_v55 = vsel %vm546_vm7, 1, %v3985_v1  ;;  %vm657_vm7 = vcmp.eq.s32.totalorder %v2122_v2, 5 }
  0xc1   :  { %vm315_vm4 = vcmp.eq.s32.totalorder %v2171_v26, 2  ;;  %vm431_vm6 = vcmp.eq.s32.totalorder %v2171_v26, 3  ;;  %vm547_vm8 = vcmp.eq.s32.totalorder %v2171_v26, 4  ;;  %v673_v12 = vsel %vm657_vm7, 1, %v3985_v1 }
  0xc2   :  { %v331_v30 = vsel %vm315_vm4, 1, %v3985_v1  ;;  %v447_v32 = vsel %vm431_vm6, 1, %v3985_v1  ;;  %v563_v35 = vsel %vm547_vm8, 1, %v3985_v1  ;;  %vm83_vm8 = vcmp.eq.s32.totalorder %v2171_v26, 0 }
  0xc3   :  { %580 = vperm.xlu0 %1991, %v559_v19   ;;  %116 = vperm.xlu1 %1990, %v95_v20   ;;  %v99_v57 = vsel %vm83_vm8, 1, %v3985_v1  ;;  %vm773_vm7 = vcmp.eq.s32.totalorder %v2122_v2, 6 }
  0xc4   :  { %v2177_v29 = vpop.trf.xlu0 }
  0xc5   :  { %4010 = vst [vmem:[#allocation14_spill] sm:$0xff] %v2177_v29  ;;  %vm316_vm1 = vcmp.eq.s32.totalorder %v2177_v29, 2  ;;  %vm432_vm3 = vcmp.eq.s32.totalorder %v2177_v29, 3  ;;  %vm548_vm5 = vcmp.eq.s32.totalorder %v2177_v29, 4 }
  0xc6   :  { %v332_v4 = vsel %vm316_vm1, 1, %v3985_v1  ;;  %v448_v7 = vsel %vm432_vm3, 1, %v3985_v1  ;;  %v564_v9 = vsel %vm548_vm5, 1, %v3985_v1 }
  0xc7   :  { %232 = vperm.xlu1 %1990, %v211_v23   ;;  %354 = vperm.xlu0 %1991, %v329_v21  }
  0xc8   :  { %v2185_v33 = vpop.trf.xlu0 }
  0xc9   :  { %vm317_vm11 = vcmp.eq.s32.totalorder %v2185_v33, 2  ;;  %vm433_vm12 = vcmp.eq.s32.totalorder %v2185_v33, 3  ;;  %vm549_vm15 = vcmp.eq.s32.totalorder %v2185_v33, 4  ;;  %vm201_vm8 = vcmp.eq.s32.totalorder %v2185_v33, 1 }
  0xca   :  { %v333_v39 = vsel %vm317_vm11, 1, %v3985_v1  ;;  %v449_v41 = vsel %vm433_vm12, 1, %v3985_v1  ;;  %v565_v44 = vsel %vm549_vm15, 1, %v3985_v1  ;;  %vm199_vm11 = vcmp.eq.s32.totalorder %v2171_v26, 1 }
  0xcb   :  { %119 = vperm.xlu1 %1990, %v96_v24   ;;  %470 = vperm.xlu0 %1991, %v445_v25   ;;  %vm84_vm12 = vcmp.eq.s32.totalorder %v2177_v29, 0  ;;  %v215_v60 = vsel %vm199_vm11, 1, %v3985_v1  ;;  %vm200_vm15 = vcmp.eq.s32.totalorder %v2177_v29, 1  ;;  %v217_v13 = vsel %vm201_vm8, 1, %v3985_v1 }
  0xcc   :  { %v2191_v36 = vpop.trf.xlu0  ;;  %v100_v61 = vsel %vm84_vm12, 1, %v3985_v1  ;;  %v216_v0 = vsel %vm200_vm15, 1, %v3985_v1  ;;  %vm661_vm11 = vcmp.eq.s32.totalorder %v2156_v18, 5  ;;  %vm665_vm15 = vcmp.eq.s32.totalorder %v2185_v33, 5 }
  0xcd   :  { %4011 = vst [vmem:[#allocation15_spill] sm:$0xff] %v2191_v36  ;;  %v677_v17 = vsel %vm661_vm11, 1, %v3985_v1  ;;  %vm202_vm12 = vcmp.eq.s32.totalorder %v2191_v36, 1  ;;  %v681_v24 = vsel %vm665_vm15, 1, %v3985_v1  ;;  %vm434_vm1 = vcmp.eq.s32.totalorder %v2191_v36, 3 }
  0xce   :  { %v218_v19 = vsel %vm202_vm12, 1, %v3985_v1  ;;  %vm550_vm3 = vcmp.eq.s32.totalorder %v2191_v36, 4  ;;  %vm777_vm11 = vcmp.eq.s32.totalorder %v2156_v18, 6  ;;  %vm781_vm15 = vcmp.eq.s32.totalorder %v2185_v33, 6 }
  0xcf   :  { %235 = vperm.xlu1 %1990, %v212_v28   ;;  %586 = vperm.xlu0 %1991, %v561_v27  }
  0xd0   :  { %v2199_v40 = vpop.trf.xlu0 }
  0xd1   :  { %vm319_vm0 = vcmp.eq.s32.totalorder %v2199_v40, 2  ;;  %vm435_vm2 = vcmp.eq.s32.totalorder %v2199_v40, 3 }
  0xd2   :  { %v335_v46 = vsel %vm319_vm0, 1, %v3985_v1  ;;  %v451_v49 = vsel %vm435_vm2, 1, %v3985_v1  ;;  %vm551_vm0 = vcmp.eq.s32.totalorder %v2199_v40, 4 }
  0xd3   :  { %351 = vperm.xlu1 %1990, %v328_v31   ;;  %360 = vperm.xlu0 %1991, %v331_v30   ;;  %v567_v3 = vsel %vm551_vm0, 1, %v3985_v1  ;;  %vm667_vm0 = vcmp.eq.s32.totalorder %v2199_v40, 5  ;;  %v450_v30 = vsel %vm434_vm1, 1, %v3985_v1  ;;  %vm783_vm1 = vcmp.eq.s32.totalorder %v2199_v40, 6 }
  0xd4   :  { %v2208_v45 = vpop.trf.xlu0  ;;  %v683_v25 = vsel %vm667_vm0, 1, %v3985_v1 }
  0xd5   :  { %vm88_vm8 = vcmp.eq.s32.totalorder %v2208_v45, 0  ;;  %vm320_vm12 = vcmp.eq.s32.totalorder %v2208_v45, 2 }
  0xd7   :  { %467 = vperm.xlu1 %1990, %v444_v34   ;;  %476 = vperm.xlu0 %1991, %v447_v32  }
  0xd8   :  { %v2215_v48 = vpop.trf.xlu0 }
  0xd9   :  { %vm205_vm4 = vcmp.eq.s32.totalorder %v2215_v48, 1  ;;  %vm321_vm6 = vcmp.eq.s32.totalorder %v2215_v48, 2  ;;  %vm437_vm9 = vcmp.eq.s32.totalorder %v2215_v48, 3  ;;  %vm553_vm2 = vcmp.eq.s32.totalorder %v2215_v48, 4 }
  0xda   :  { %v221_v51 = vsel %vm205_vm4, 1, %v3985_v1  ;;  %v337_v54 = vsel %vm321_vm6, 1, %v3985_v1  ;;  %v453_v58 = vsel %vm437_vm9, 1, %v3985_v1  ;;  %v569_v6 = vsel %vm553_vm2, 1, %v3985_v1 }
  0xdb   :  { %583 = vperm.xlu1 %1990, %v560_v37   ;;  %592 = vperm.xlu0 %1991, %v563_v35   ;;  %vm85_vm6 = vcmp.eq.s32.totalorder %v2185_v33, 0  ;;  %vm659_vm9 = vcmp.eq.s32.totalorder %v2138_v10, 5  ;;  %vm669_vm2 = vcmp.eq.s32.totalorder %v2215_v48, 5  ;;  %v566_v35 = vsel %vm550_vm3, 1, %v3985_v1 }
  0xdc   :  { %v2223_v52 = vpop.trf.xlu0  ;;  %v101_v11 = vsel %vm85_vm6, 1, %v3985_v1  ;;  %v675_v15 = vsel %vm659_vm9, 1, %v3985_v1  ;;  %v685_v31 = vsel %vm669_vm2, 1, %v3985_v1  ;;  %vm203_vm6 = vcmp.eq.s32.totalorder %v2199_v40, 1 }
  0xdd   :  { %vm775_vm9 = vcmp.eq.s32.totalorder %v2138_v10, 6  ;;  %vm89_vm0 = vcmp.eq.s32.totalorder %v2215_v48, 0  ;;  %vm90_vm2 = vcmp.eq.s32.totalorder %v2223_v52, 0  ;;  %vm785_vm3 = vcmp.eq.s32.totalorder %v2215_v48, 6 }
  0xdf   :  { %122 = vperm.xlu1 %1990, %v97_v38   ;;  %366 = vperm.xlu0 %1991, %v333_v39  }
  0xe0   :  { %v2232_v56 = vpop.trf.xlu0 }
  0xe1   :  { %vm207_vm10 = vcmp.eq.s32.totalorder %v2232_v56, 1  ;;  %vm323_vm13 = vcmp.eq.s32.totalorder %v2232_v56, 2  ;;  %vm439_vm14 = vcmp.eq.s32.totalorder %v2232_v56, 3  ;;  %vm555_vm4 = vcmp.eq.s32.totalorder %v2232_v56, 4 }
  0xe2   :  { %v223_v59 = vsel %vm207_vm10, 1, %v3985_v1  ;;  %v339_v62 = vsel %vm323_vm13, 1, %v3985_v1  ;;  %v455_v63 = vsel %vm439_vm14, 1, %v3985_v1  ;;  %v571_v8 = vsel %vm555_vm4, 1, %v3985_v1 }
  0xe3   :  { %238 = vperm.xlu1 %1990, %v213_v42   ;;  %482 = vperm.xlu0 %1991, %v449_v41   ;;  %vm86_vm10 = vcmp.eq.s32.totalorder %v2191_v36, 0  ;;  %vm663_vm13 = vcmp.eq.s32.totalorder %v2171_v26, 5  ;;  %vm318_vm14 = vcmp.eq.s32.totalorder %v2191_v36, 2  ;;  %vm87_vm4 = vcmp.eq.s32.totalorder %v2199_v40, 0 }
  0xe4   :  { %v102_v16 = vsel %vm86_vm10, 1, %v3985_v1  ;;  %v679_v20 = vsel %vm663_vm13, 1, %v3985_v1  ;;  %v2278_v21 = vpop.trf.xlu0  ;;  %v334_v23 = vsel %vm318_vm14, 1, %v3985_v1  ;;  %vm671_vm5 = vcmp.eq.s32.totalorder %v2232_v56, 5 }
  0xe5   :  { %4012 = vst [vmem:[#allocation16_spill] sm:$0xff] %v2278_v21  ;;  %v103_v37 = vsel %vm87_vm4, 1, %v3985_v1  ;;  %v687_v38 = vsel %vm671_vm5, 1, %v3985_v1  ;;  %vm204_vm10 = vcmp.eq.s32.totalorder %v2208_v45, 1  ;;  %vm779_vm13 = vcmp.eq.s32.totalorder %v2171_v26, 6 }
  0xe6   :  { %vm436_vm14 = vcmp.eq.s32.totalorder %v2208_v45, 3  ;;  %vm787_vm4 = vcmp.eq.s32.totalorder %v2232_v56, 6  ;;  %vm206_vm5 = vcmp.eq.s32.totalorder %v2223_v52, 1 }
  0xe7   :  { %125 = vperm.xlu1 %1990, %v98_v43   ;;  %598 = vperm.xlu0 %1991, %v565_v44   ;;  %v219_v44 = vsel %vm203_vm6, 1, %v3985_v1  ;;  %vm322_vm6 = vcmp.eq.s32.totalorder %v2223_v52, 2 }
  0xeb   :  { %241 = vperm.xlu1 %1990, %v214_v47   ;;  %372 = vperm.xlu0 %1991, %v335_v46   ;;  %v789_v46 = vsel %vm773_vm7, 1, %v3985_v1  ;;  %v104_v47 = vsel %vm88_vm8, 1, %v3985_v1  ;;  %vm889_vm7 = vcmp.eq.s32.totalorder %v2122_v2, 7  ;;  %vm438_vm8 = vcmp.eq.s32.totalorder %v2223_v52, 3 }
  0xef   :  { %357 = vperm.xlu1 %1990, %v330_v50   ;;  %488 = vperm.xlu0 %1991, %v451_v49  }
  0xf3   :  { %473 = vperm.xlu1 %1990, %v446_v53   ;;  %262 = vperm.xlu0 %1991, %v221_v51   ;;  %v791_v51 = vsel %vm775_vm9, 1, %v3985_v1  ;;  %vm891_vm9 = vcmp.eq.s32.totalorder %v2138_v10, 7 }
  0xf7   :  { %589 = vperm.xlu1 %1990, %v562_v55   ;;  %378 = vperm.xlu0 %1991, %v337_v54   ;;  %v220_v55 = vsel %vm204_vm10, 1, %v3985_v1  ;;  %vm91_vm10 = vcmp.eq.s32.totalorder %v2232_v56, 0 }
  0xfb   :  { %128 = vperm.xlu1 %1990, %v99_v57   ;;  %494 = vperm.xlu0 %1991, %v453_v58   ;;  %v793_v57 = vsel %vm777_vm11, 1, %v3985_v1  ;;  %vm893_vm11 = vcmp.eq.s32.totalorder %v2156_v18, 7 }
  0xff   :  { %244 = vperm.xlu1 %1990, %v215_v60   ;;  %268 = vperm.xlu0 %1991, %v223_v59   ;;  %v336_v60 = vsel %vm320_vm12, 1, %v3985_v1  ;;  %vm92_vm12 = vcmp.eq.s32.totalorder %v2278_v21, 0 }
 0x103   :  { %131 = vperm.xlu1 %1990, %v100_v61   ;;  %384 = vperm.xlu0 %1991, %v339_v62   ;;  %v795_v61 = vsel %vm779_vm13, 1, %v3985_v1  ;;  %vm895_vm13 = vcmp.eq.s32.totalorder %v2171_v26, 7 }
 0x107   :  { %247 = vperm.xlu1 %1990, %v216_v0   ;;  %500 = vperm.xlu0 %1991, %v455_v63   ;;  %v452_v0 = vsel %vm436_vm14, 1, %v3985_v1  ;;  %vm897_vm14 = vcmp.eq.s32.totalorder %v2185_v33, 7 }
 0x10b   :  { %363 = vperm.xlu1 %1990, %v332_v4   ;;  %604 = vperm.xlu0 %1991, %v567_v3   ;;  %v797_v3 = vsel %vm781_vm15, 1, %v3985_v1  ;;  %v105_v4 = vsel %vm89_vm0, 1, %v3985_v1  ;;  %vm208_vm15 = vcmp.eq.s32.totalorder %v2278_v21, 1  ;;  %vm324_vm0 = vcmp.eq.s32.totalorder %v2278_v21, 2 }
 0x10f   :  { %479 = vperm.xlu1 %1990, %v448_v7   ;;  %610 = vperm.xlu0 %1991, %v569_v6  }
 0x113   :  { %595 = vperm.xlu1 %1990, %v564_v9   ;;  %616 = vperm.xlu0 %1991, %v571_v8   ;;  %v799_v8 = vsel %vm783_vm1, 1, %v3985_v1  ;;  %v106_v9 = vsel %vm90_vm2, 1, %v3985_v1  ;;  %vm899_vm1 = vcmp.eq.s32.totalorder %v2199_v40, 7  ;;  %vm440_vm2 = vcmp.eq.s32.totalorder %v2278_v21, 3 }
 0x117   :  { %134 = vperm.xlu1 %1990, %v101_v11   ;;  %690 = vperm.xlu0 %1991, %v673_v12  }
 0x11b   :  { %250 = vperm.xlu1 %1990, %v217_v13   ;;  %696 = vperm.xlu0 %1991, %v675_v15   ;;  %v801_v13 = vsel %vm785_vm3, 1, %v3985_v1  ;;  %v803_v15 = vsel %vm787_vm4, 1, %v3985_v1  ;;  %vm901_vm3 = vcmp.eq.s32.totalorder %v2215_v48, 7  ;;  %vm552_vm4 = vcmp.eq.s32.totalorder %v2208_v45, 4 }
 0x11f   :  { %137 = vperm.xlu1 %1990, %v102_v16   ;;  %702 = vperm.xlu0 %1991, %v677_v17  }
 0x123   :  { %253 = vperm.xlu1 %1990, %v218_v19   ;;  %708 = vperm.xlu0 %1991, %v679_v20   ;;  %v222_v19 = vsel %vm206_vm5, 1, %v3985_v1  ;;  %vm903_vm5 = vcmp.eq.s32.totalorder %v2232_v56, 7 }
 0x127   :  { %369 = vperm.xlu1 %1990, %v334_v23   ;;  %714 = vperm.xlu0 %1991, %v681_v24   ;;  %v338_v24 = vsel %vm322_vm6, 1, %v3985_v1  ;;  %vm554_vm6 = vcmp.eq.s32.totalorder %v2223_v52, 4 }
 0x12a   :  { %v2286_v27 = vpop.permute.xlu1 %110  ;;  %v2288_v28 = vpop.permute.xlu0 %226 }
 0x12b   :  { %485 = vperm.xlu1 %1990, %v450_v30   ;;  %720 = vperm.xlu0 %1991, %v683_v25   ;;  %v905_v25 = vsel %vm889_vm7, 1, %v3985_v1  ;;  %vm1005_vm7 = vcmp.eq.s32.totalorder %v2122_v2, 8 }
 0x12e   :  { %v2295_v32 = vpop.permute.xlu1 %113  ;;  %v2297_v34 = vpop.permute.xlu0 %342 }
 0x12f   :  { %4013 = vst [vmem:[#allocation17_spill] sm:$0xff] %v2295_v32  ;;  %601 = vperm.xlu1 %1990, %v566_v35   ;;  %726 = vperm.xlu0 %1991, %v685_v31   ;;  %v454_v35 = vsel %vm438_vm8, 1, %v3985_v1  ;;  %vm556_vm8 = vcmp.eq.s32.totalorder %v2278_v21, 4 }
 0x132   :  { %v2302_v39 = vpop.permute.xlu1 %229  ;;  %v2304_v41 = vpop.permute.xlu0 %458 }
 0x133   :  { %4014 = vst [vmem:[#allocation18_spill] sm:$0xff] %v2302_v39  ;;  %140 = vperm.xlu1 %1990, %v103_v37   ;;  %732 = vperm.xlu0 %1991, %v687_v38   ;;  %v907_v37 = vsel %vm891_vm9, 1, %v3985_v1  ;;  %v107_v38 = vsel %vm91_vm10, 1, %v3985_v1  ;;  %vm1007_vm9 = vcmp.eq.s32.totalorder %v2138_v10, 8  ;;  %vm658_vm10 = vcmp.eq.s32.totalorder %v2129_v5, 5 }
 0x136   :  { %v2309_v42 = vpop.permute.xlu1 %345  ;;  %v2311_v43 = vpop.permute.xlu0 %574 }
 0x137   :  { %4015 = vst [vmem:[#allocation19_spill] sm:$0xff] %v2309_v42  ;;  %256 = vperm.xlu1 %1990, %v219_v44   ;;  %806 = vperm.xlu0 %1991, %v789_v46  }
 0x13a   :  { %v2317_v49 = vpop.permute.xlu1 %461  ;;  %v2319_v50 = vpop.permute.xlu0 %348 }
 0x13b   :  { %4016 = vst [vmem:[#allocation20_spill] sm:$0xff] %v2317_v49  ;;  %143 = vperm.xlu1 %1990, %v104_v47   ;;  %812 = vperm.xlu0 %1991, %v791_v51   ;;  %v909_v47 = vsel %vm893_vm11, 1, %v3985_v1  ;;  %v108_v51 = vsel %vm92_vm12, 1, %v3985_v1  ;;  %vm1009_vm11 = vcmp.eq.s32.totalorder %v2156_v18, 8  ;;  %vm660_vm12 = vcmp.eq.s32.totalorder %v2147_v14, 5 }
 0x13e   :  { %v2324_v53 = vpop.permute.xlu1 %577  ;;  %v2326_v54 = vpop.permute.xlu0 %464 }
 0x13f   :  { %4017 = vst [vmem:[#allocation21_spill] sm:$0xff] %v2324_v53  ;;  %259 = vperm.xlu1 %1990, %v220_v55   ;;  %818 = vperm.xlu0 %1991, %v793_v57  }
 0x142   :  { %v2332_v58 = vpop.permute.xlu1 %116  ;;  %v2334_v59 = vpop.permute.xlu0 %580 }
 0x143   :  { %375 = vperm.xlu1 %1990, %v336_v60   ;;  %824 = vperm.xlu0 %1991, %v795_v61   ;;  %v911_v60 = vsel %vm895_vm13, 1, %v3985_v1  ;;  %vm1011_vm13 = vcmp.eq.s32.totalorder %v2171_v26, 8 }
 0x146   :  { %v2341_v62 = vpop.permute.xlu1 %232  ;;  %v2343_v63 = vpop.permute.xlu0 %354 }
 0x147   :  { %491 = vperm.xlu1 %1990, %v452_v0   ;;  %830 = vperm.xlu0 %1991, %v797_v3   ;;  %v913_v3 = vsel %vm897_vm14, 1, %v3985_v1  ;;  %vm662_vm14 = vcmp.eq.s32.totalorder %v2163_v22, 5 }
 0x14a   :  { %v2350_v6 = vpop.permute.xlu1 %119  ;;  %v2352_v7 = vpop.permute.xlu0 %470 }
 0x14b   :  { %4018 = vst [vmem:[#allocation22_spill] sm:$0xff] %v2350_v6  ;;  %146 = vperm.xlu1 %1990, %v105_v4   ;;  %836 = vperm.xlu0 %1991, %v799_v8   ;;  %v224_v4 = vsel %vm208_vm15, 1, %v3985_v1  ;;  %vm1013_vm15 = vcmp.eq.s32.totalorder %v2185_v33, 8 }
 0x14e   :  { %v2358_v11 = vpop.permute.xlu1 %235  ;;  %v2360_v12 = vpop.permute.xlu0 %586 }
 0x14f   :  { %4019 = vst [vmem:[#allocation23_spill] sm:$0xff] %v2358_v11  ;;  %149 = vperm.xlu1 %1990, %v106_v9   ;;  %842 = vperm.xlu0 %1991, %v801_v13   ;;  %v340_v13 = vsel %vm324_vm0, 1, %v3985_v1  ;;  %vm664_vm0 = vcmp.eq.s32.totalorder %v2177_v29, 5 }
 0x152   :  { %v2365_v16 = vpop.permute.xlu1 %351  ;;  %v2367_v17 = vpop.permute.xlu0 %360 }
 0x153   :  { %4020 = vst [vmem:[#allocation24_spill] sm:$0xff] %v2365_v16  ;;  %265 = vperm.xlu1 %1990, %v222_v19   ;;  %848 = vperm.xlu0 %1991, %v803_v15   ;;  %v915_v15 = vsel %vm899_vm1, 1, %v3985_v1  ;;  %vm1015_vm1 = vcmp.eq.s32.totalorder %v2199_v40, 8 }
 0x156   :  { %v2372_v20 = vpop.permute.xlu1 %467  ;;  %v2374_v23 = vpop.permute.xlu0 %476 }
 0x157   :  { %4021 = vst [vmem:[#allocation25_spill] sm:$0xff] %v2372_v20  ;;  %381 = vperm.xlu1 %1990, %v338_v24   ;;  %922 = vperm.xlu0 %1991, %v905_v25   ;;  %v456_v25 = vsel %vm440_vm2, 1, %v3985_v1  ;;  %vm666_vm2 = vcmp.eq.s32.totalorder %v2191_v36, 5 }
 0x158   :  { %v682_v20 = vsel %vm666_vm2, 1, %v3985_v1  ;;  %vm782_vm2 = vcmp.eq.s32.totalorder %v2191_v36, 6 }
 0x15a   :  { %v2381_v30 = vpop.permute.xlu1 %583  ;;  %v2383_v31 = vpop.permute.xlu0 %592 }
 0x15b   :  { %4022 = vst [vmem:[#allocation26_spill] sm:$0xff] %v2381_v30  ;;  %497 = vperm.xlu1 %1990, %v454_v35   ;;  %928 = vperm.xlu0 %1991, %v907_v37   ;;  %v917_v35 = vsel %vm901_vm3, 1, %v3985_v1  ;;  %v678_v30 = vsel %vm662_vm14, 1, %v3985_v1  ;;  %vm1017_vm3 = vcmp.eq.s32.totalorder %v2215_v48, 8  ;;  %vm778_vm14 = vcmp.eq.s32.totalorder %v2163_v22, 6 }
 0x15c   :  { %v794_v39 = vsel %vm778_vm14, 1, %v3985_v1  ;;  %vm894_vm14 = vcmp.eq.s32.totalorder %v2163_v22, 7 }
 0x15e   :  { %v2390_v44 = vpop.permute.xlu1 %122  ;;  %v2392_v46 = vpop.permute.xlu0 %366 }
 0x15f   :  { %934 = vperm.xlu0 %1991, %v909_v47   ;;  %152 = vperm.xlu1 %1990, %v107_v38   ;;  %v568_v47 = vsel %vm552_vm4, 1, %v3985_v1  ;;  %vm668_vm4 = vcmp.eq.s32.totalorder %v2208_v45, 5 }
 0x162   :  { %v2397_v55 = vpop.permute.xlu1 %238  ;;  %v2399_v57 = vpop.permute.xlu0 %482 }
 0x163   :  { %940 = vperm.xlu0 %1991, %v911_v60   ;;  %155 = vperm.xlu1 %1990, %v108_v51   ;;  %v919_v51 = vsel %vm903_vm5, 1, %v3985_v1  ;;  %vm1019_vm5 = vcmp.eq.s32.totalorder %v2232_v56, 8 }
 0x166   :  { %v2404_v61 = vpop.permute.xlu1 %125  ;;  %v2406_v0 = vpop.permute.xlu0 %598 }
 0x167   :  { %4023 = vst [vmem:[#allocation27_spill] sm:$0xff] %v2404_v61  ;;  %4024 = vst [vmem:[#allocation28_spill] sm:$0xff] %v2406_v0  ;;  %946 = vperm.xlu0 %1991, %v913_v3   ;;  %271 = vperm.xlu1 %1990, %v224_v4   ;;  %v570_v4 = vsel %vm554_vm6, 1, %v3985_v1  ;;  %v684_v61 = vsel %vm668_vm4, 1, %v3985_v1  ;;  %vm670_vm6 = vcmp.eq.s32.totalorder %v2223_v52, 5  ;;  %vm784_vm4 = vcmp.eq.s32.totalorder %v2208_v45, 6 }
 0x168   :  { %v686_v16 = vsel %vm670_vm6, 1, %v3985_v1  ;;  %vm786_vm6 = vcmp.eq.s32.totalorder %v2223_v52, 6 }
 0x16a   :  { %v2412_v8 = vpop.permute.xlu1 %241  ;;  %v2414_v9 = vpop.permute.xlu0 %372 }
 0x16b   :  { %4025 = vst [vmem:[#allocation29_spill] sm:$0xff] %v2412_v8  ;;  %4026 = vst [vmem:[#allocation30_spill] sm:$0xff] %v2414_v9  ;;  %387 = vperm.xlu1 %1990, %v340_v13   ;;  %952 = vperm.xlu0 %1991, %v915_v15   ;;  %v1021_v13 = vsel %vm1005_vm7, 1, %v3985_v1  ;;  %v680_v8 = vsel %vm664_vm0, 1, %v3985_v1  ;;  %vm1121_vm7 = vcmp.eq.s32.totalorder %v2122_v2, 9  ;;  %vm780_vm0 = vcmp.eq.s32.totalorder %v2177_v29, 6 }
 0x16c   :  { %v796_v32 = vsel %vm780_vm0, 1, %v3985_v1  ;;  %vm896_vm0 = vcmp.eq.s32.totalorder %v2177_v29, 7 }
 0x16e   :  { %v2420_v19 = vpop.permute.xlu1 %357  ;;  %v2422_v24 = vpop.permute.xlu0 %488 }
 0x16f   :  { %4027 = vst [vmem:[#allocation31_spill] sm:$0xff] %v2420_v19  ;;  %4028 = vst [vmem:[#allocation32_spill] sm:$0xff] %v2422_v24  ;;  %503 = vperm.xlu1 %1990, %v456_v25   ;;  %958 = vperm.xlu0 %1991, %v917_v35   ;;  %v572_v35 = vsel %vm556_vm8, 1, %v3985_v1  ;;  %v1027_v19 = vsel %vm1011_vm13, 1, %v3985_v1  ;;  %vm672_vm8 = vcmp.eq.s32.totalorder %v2278_v21, 5  ;;  %vm1127_vm13 = vcmp.eq.s32.totalorder %v2171_v26, 9 }
 0x170   :  { %v688_v11 = vsel %vm672_vm8, 1, %v3985_v1  ;;  %vm788_vm8 = vcmp.eq.s32.totalorder %v2278_v21, 6 }
 0x172   :  { %v2428_v37 = vpop.permute.xlu1 %473  ;;  %v2430_v38 = vpop.permute.xlu0 %262 }
 0x173   :  { %4029 = vst [vmem:[#allocation33_spill] sm:$0xff] %v2428_v37  ;;  %4030 = vst [vmem:[#allocation34_spill] sm:$0xff] %v2430_v38  ;;  %607 = vperm.xlu1 %1990, %v568_v47   ;;  %964 = vperm.xlu0 %1991, %v919_v51   ;;  %v1023_v47 = vsel %vm1007_vm9, 1, %v3985_v1  ;;  %v676_v37 = vsel %vm660_vm12, 1, %v3985_v1  ;;  %vm1123_vm9 = vcmp.eq.s32.totalorder %v2138_v10, 9  ;;  %vm776_vm12 = vcmp.eq.s32.totalorder %v2147_v14, 6 }
 0x174   :  { %v1139_v6 = vsel %vm1123_vm9, 1, %v3985_v1  ;;  %v792_v42 = vsel %vm776_vm12, 1, %v3985_v1  ;;  %vm1239_vm9 = vcmp.eq.s32.totalorder %v2138_v10, 10  ;;  %vm892_vm12 = vcmp.eq.s32.totalorder %v2147_v14, 7 }
 0x176   :  { %v2436_v60 = vpop.permute.xlu1 %589  ;;  %v2438_v3 = vpop.permute.xlu0 %378 }
 0x177   :  { %4031 = vst [vmem:[#allocation35_spill] sm:$0xff] %v2436_v60  ;;  %4032 = vst [vmem:[#allocation36_spill] sm:$0xff] %v2438_v3  ;;  %613 = vperm.xlu1 %1990, %v570_v4   ;;  %1038 = vperm.xlu0 %1991, %v1021_v13   ;;  %v674_v13 = vsel %vm658_vm10, 1, %v3985_v1  ;;  %v1025_v60 = vsel %vm1009_vm11, 1, %v3985_v1  ;;  %vm774_vm10 = vcmp.eq.s32.totalorder %v2129_v5, 6  ;;  %vm1125_vm11 = vcmp.eq.s32.totalorder %v2156_v18, 9 }
 0x178   :  { %v790_v53 = vsel %vm774_vm10, 1, %v3985_v1  ;;  %v1141_v49 = vsel %vm1125_vm11, 1, %v3985_v1  ;;  %vm890_vm10 = vcmp.eq.s32.totalorder %v2129_v5, 7  ;;  %vm1241_vm11 = vcmp.eq.s32.totalorder %v2156_v18, 10 }
 0x179   :  { %v908_v3 = vsel %vm892_vm12, 1, %v3985_v1  ;;  %vm1008_vm12 = vcmp.eq.s32.totalorder %v2147_v14, 8 }
 0x17a   :  { %v2444_v15 = vpop.permute.xlu1 %128  ;;  %v2446_v25 = vpop.permute.xlu0 %494 }
 0x17b   :  { %4033 = vst [vmem:[#allocation37_spill] sm:$0xff] %v2446_v25  ;;  %619 = vperm.xlu1 %1990, %v572_v35   ;;  %1044 = vperm.xlu0 %1991, %v1023_v47   ;;  %v906_v25 = vsel %vm890_vm10, 1, %v3985_v1  ;;  %vm1006_vm10 = vcmp.eq.s32.totalorder %v2129_v5, 8 }
 0x17e   :  { %v2452_v51 = vpop.permute.xlu1 %244  ;;  %v2454_v4 = vpop.permute.xlu0 %268 }
 0x17f   :  { %693 = vperm.xlu1 %1990, %v674_v13   ;;  %1050 = vperm.xlu0 %1991, %v1025_v60  }
 0x182   :  { %v2460_v35 = vpop.permute.xlu1 %131  ;;  %v2462_v47 = vpop.permute.xlu0 %384 }
 0x183   :  { %4034 = vst [vmem:[#allocation38_spill] sm:$0xff] %v2460_v35  ;;  %699 = vperm.xlu1 %1990, %v676_v37   ;;  %1056 = vperm.xlu0 %1991, %v1027_v19   ;;  %v1029_v35 = vsel %vm1013_vm15, 1, %v3985_v1  ;;  %vm1129_vm15 = vcmp.eq.s32.totalorder %v2185_v33, 9 }
 0x186   :  { %v2468_v13 = vpop.permute.xlu1 %247  ;;  %v2470_v60 = vpop.permute.xlu0 %500 }
 0x187   :  { %4035 = vst [vmem:[#allocation39_spill] sm:$0xff] %v2468_v13  ;;  %705 = vperm.xlu1 %1990, %v678_v30   ;;  %1062 = vperm.xlu0 %1991, %v1029_v35   ;;  %v1031_v13 = vsel %vm1015_vm1, 1, %v3985_v1  ;;  %vm1131_vm1 = vcmp.eq.s32.totalorder %v2199_v40, 9 }
 0x18a   :  { %v2476_v37 = vpop.permute.xlu1 %363  ;;  %v2478_v19 = vpop.permute.xlu0 %604 }
 0x18b   :  { %4036 = vst [vmem:[#allocation40_spill] sm:$0xff] %v2476_v37  ;;  %4037 = vst [vmem:[#allocation41_spill] sm:$0xff] %v2478_v19  ;;  %711 = vperm.xlu1 %1990, %v680_v8   ;;  %1068 = vperm.xlu0 %1991, %v1031_v13   ;;  %v1033_v37 = vsel %vm1017_vm3, 1, %v3985_v1  ;;  %vm1133_vm3 = vcmp.eq.s32.totalorder %v2215_v48, 9  ;;  %v1255_v19 = vsel %vm1239_vm9, 1, %v3985_v1  ;;  %vm1355_vm9 = vcmp.eq.s32.totalorder %v2138_v10, 11 }
 0x18e   :  { %v2484_v30 = vpop.permute.xlu1 %479  ;;  %v2486_v35 = vpop.permute.xlu0 %610 }
 0x18f   :  { %4038 = vst [vmem:[#allocation42_spill] sm:$0xff] %v2484_v30  ;;  %4039 = vst [vmem:[#allocation43_spill] sm:$0xff] %v2486_v35  ;;  %717 = vperm.xlu1 %1990, %v682_v20   ;;  %1074 = vperm.xlu0 %1991, %v1033_v37   ;;  %v1035_v30 = vsel %vm1019_vm5, 1, %v3985_v1  ;;  %v798_v35 = vsel %vm782_vm2, 1, %v3985_v1  ;;  %vm1135_vm5 = vcmp.eq.s32.totalorder %v2232_v56, 9  ;;  %vm898_vm2 = vcmp.eq.s32.totalorder %v2191_v36, 7 }
 0x192   :  { %v2492_v8 = vpop.permute.xlu1 %595  ;;  %v2494_v13 = vpop.permute.xlu0 %616 }
 0x193   :  { %4040 = vst [vmem:[#allocation44_spill] sm:$0xff] %v2492_v8  ;;  %723 = vperm.xlu1 %1990, %v684_v61   ;;  %1080 = vperm.xlu0 %1991, %v1035_v30   ;;  %v1137_v8 = vsel %vm1121_vm7, 1, %v3985_v1  ;;  %vm1237_vm7 = vcmp.eq.s32.totalorder %v2122_v2, 10 }
 0x196   :  { %v2500_v20 = vpop.permute.xlu1 %134  ;;  %v2502_v37 = vpop.permute.xlu0 %690 }
 0x197   :  { %4041 = vst [vmem:[#allocation45_spill] sm:$0xff] %v2502_v37  ;;  %729 = vperm.xlu1 %1990, %v686_v16   ;;  %1154 = vperm.xlu0 %1991, %v1137_v8  }
 0x19a   :  { %v2508_v61 = vpop.permute.xlu1 %250  ;;  %v2510_v30 = vpop.permute.xlu0 %696 }
 0x19b   :  { %4042 = vst [vmem:[#allocation46_spill] sm:$0xff] %v2510_v30  ;;  %735 = vperm.xlu1 %1990, %v688_v11   ;;  %1160 = vperm.xlu0 %1991, %v1139_v6  }
 0x19e   :  { %v2516_v16 = vpop.permute.xlu1 %137  ;;  %v2518_v8 = vpop.permute.xlu0 %702 }
 0x19f   :  { %4043 = vst [vmem:[#allocation47_spill] sm:$0xff] %v2516_v16  ;;  %4044 = vst [vmem:[#allocation48_spill] sm:$0xff] %v2518_v8  ;;  %809 = vperm.xlu1 %1990, %v790_v53   ;;  %1166 = vperm.xlu0 %1991, %v1141_v49   ;;  %v1143_v16 = vsel %vm1127_vm13, 1, %v3985_v1  ;;  %vm1243_vm13 = vcmp.eq.s32.totalorder %v2171_v26, 10 }
 0x1a2   :  { %v2524_v11 = vpop.permute.xlu1 %253  ;;  %v2526_v6 = vpop.permute.xlu0 %708 }
 0x1a3   :  { %4045 = vst [vmem:[#allocation49_spill] sm:$0xff] %v2524_v11  ;;  %4046 = vst [vmem:[#allocation50_spill] sm:$0xff] %v2526_v6  ;;  %815 = vperm.xlu1 %1990, %v792_v42   ;;  %1172 = vperm.xlu0 %1991, %v1143_v16   ;;  %v1145_v11 = vsel %vm1129_vm15, 1, %v3985_v1  ;;  %v804_v6 = vsel %vm788_vm8, 1, %v3985_v1  ;;  %vm1245_vm15 = vcmp.eq.s32.totalorder %v2185_v33, 10  ;;  %vm904_vm8 = vcmp.eq.s32.totalorder %v2278_v21, 7 }
 0x1a4   :  { %v920_v24 = vsel %vm904_vm8, 1, %v3985_v1  ;;  %vm1020_vm8 = vcmp.eq.s32.totalorder %v2278_v21, 8 }
 0x1a6   :  { %v2532_v53 = vpop.permute.xlu1 %369  ;;  %v2534_v49 = vpop.permute.xlu0 %714 }
 0x1a7   :  { %4047 = vst [vmem:[#allocation51_spill] sm:$0xff] %v2532_v53  ;;  %4048 = vst [vmem:[#allocation52_spill] sm:$0xff] %v2534_v49  ;;  %821 = vperm.xlu1 %1990, %v794_v39   ;;  %1178 = vperm.xlu0 %1991, %v1145_v11   ;;  %v1147_v53 = vsel %vm1131_vm1, 1, %v3985_v1  ;;  %v1253_v49 = vsel %vm1237_vm7, 1, %v3985_v1  ;;  %vm1247_vm1 = vcmp.eq.s32.totalorder %v2199_v40, 10  ;;  %vm1353_vm7 = vcmp.eq.s32.totalorder %v2122_v2, 11 }
 0x1aa   :  { %v2540_v42 = vpop.permute.xlu1 %485  ;;  %v2542_v16 = vpop.permute.xlu0 %720 }
 0x1ab   :  { %4049 = vst [vmem:[#allocation53_spill] sm:$0xff] %v2540_v42  ;;  %4050 = vst [vmem:[#allocation54_spill] sm:$0xff] %v2542_v16  ;;  %827 = vperm.xlu1 %1990, %v796_v32   ;;  %1184 = vperm.xlu0 %1991, %v1147_v53   ;;  %v1149_v42 = vsel %vm1133_vm3, 1, %v3985_v1  ;;  %v800_v16 = vsel %vm784_vm4, 1, %v3985_v1  ;;  %vm1249_vm3 = vcmp.eq.s32.totalorder %v2215_v48, 10  ;;  %vm900_vm4 = vcmp.eq.s32.totalorder %v2208_v45, 7 }
 0x1ae   :  { %v2548_v39 = vpop.permute.xlu1 %601  ;;  %v2550_v11 = vpop.permute.xlu0 %726 }
 0x1af   :  { %4051 = vst [vmem:[#allocation55_spill] sm:$0xff] %v2548_v39  ;;  %4052 = vst [vmem:[#allocation56_spill] sm:$0xff] %v2550_v11  ;;  %833 = vperm.xlu1 %1990, %v798_v35   ;;  %1190 = vperm.xlu0 %1991, %v1149_v42   ;;  %v1151_v39 = vsel %vm1135_vm5, 1, %v3985_v1  ;;  %v802_v11 = vsel %vm786_vm6, 1, %v3985_v1  ;;  %vm1251_vm5 = vcmp.eq.s32.totalorder %v2232_v56, 10  ;;  %vm902_vm6 = vcmp.eq.s32.totalorder %v2223_v52, 7 }
 0x1b2   :  { %v2556_v32 = vpop.permute.xlu1 %140  ;;  %v2558_v53 = vpop.permute.xlu0 %732 }
 0x1b3   :  { %4053 = vst [vmem:[#allocation57_spill] sm:$0xff] %v2556_v32  ;;  %4054 = vst [vmem:[#allocation58_spill] sm:$0xff] %v2558_v53  ;;  %839 = vperm.xlu1 %1990, %v800_v16   ;;  %1196 = vperm.xlu0 %1991, %v1151_v39  }
 0x1b6   :  { %v2564_v35 = vpop.permute.xlu1 %256  ;;  %v2566_v42 = vpop.permute.xlu0 %806 }
 0x1b7   :  { %4055 = vst [vmem:[#allocation59_spill] sm:$0xff] %v2564_v35  ;;  %4056 = vst [vmem:[#allocation60_spill] sm:$0xff] %v2566_v42  ;;  %845 = vperm.xlu1 %1990, %v802_v11   ;;  %1270 = vperm.xlu0 %1991, %v1253_v49  }
 0x1ba   :  { %v2572_v16 = vpop.permute.xlu1 %143  ;;  %v2574_v39 = vpop.permute.xlu0 %812 }
 0x1bb   :  { %4057 = vst [vmem:[#allocation61_spill] sm:$0xff] %v2572_v16  ;;  %4058 = vst [vmem:[#allocation62_spill] sm:$0xff] %v2574_v39  ;;  %851 = vperm.xlu1 %1990, %v804_v6   ;;  %1276 = vperm.xlu0 %1991, %v1255_v19   ;;  %v1257_v16 = vsel %vm1241_vm11, 1, %v3985_v1  ;;  %vm1357_vm11 = vcmp.eq.s32.totalorder %v2156_v18, 11  ;;  %v1022_v39 = vsel %vm1006_vm10, 1, %v3985_v1  ;;  %vm1122_vm10 = vcmp.eq.s32.totalorder %v2129_v5, 9 }
 0x1be   :  { %v2580_v11 = vpop.permute.xlu1 %259  ;;  %v2582_v49 = vpop.permute.xlu0 %818 }
 0x1bf   :  { %4059 = vst [vmem:[#allocation63_spill] sm:$0xff] %v2580_v11  ;;  %4060 = vst [vmem:[#allocation64_spill] sm:$0xff] %v2582_v49  ;;  %925 = vperm.xlu1 %1990, %v906_v25   ;;  %1282 = vperm.xlu0 %1991, %v1257_v16   ;;  %v1259_v11 = vsel %vm1243_vm13, 1, %v3985_v1  ;;  %v910_v49 = vsel %vm894_vm14, 1, %v3985_v1  ;;  %vm1359_vm13 = vcmp.eq.s32.totalorder %v2171_v26, 11  ;;  %vm1010_vm14 = vcmp.eq.s32.totalorder %v2163_v22, 8 }
 0x1c0   :  { %v1375_v38 = vsel %vm1359_vm13, 1, %v3985_v1  ;;  %vm1475_vm13 = vcmp.eq.s32.totalorder %v2171_v26, 12 }
 0x1c2   :  { %v2588_v6 = vpop.permute.xlu1 %375  ;;  %v2590_v19 = vpop.permute.xlu0 %824 }
 0x1c3   :  { %4061 = vst [vmem:[#allocation65_spill] sm:$0xff] %v2588_v6  ;;  %4062 = vst [vmem:[#allocation66_spill] sm:$0xff] %v2590_v19  ;;  %931 = vperm.xlu1 %1990, %v908_v3   ;;  %1288 = vperm.xlu0 %1991, %v1259_v11   ;;  %v1261_v6 = vsel %vm1245_vm15, 1, %v3985_v1  ;;  %v912_v19 = vsel %vm896_vm0, 1, %v3985_v1  ;;  %vm1361_vm15 = vcmp.eq.s32.totalorder %v2185_v33, 11  ;;  %vm1012_vm0 = vcmp.eq.s32.totalorder %v2177_v29, 8 }
 0x1c6   :  { %v2596_v25 = vpop.permute.xlu1 %491  ;;  %v2598_v16 = vpop.permute.xlu0 %830 }
 0x1c7   :  { %4063 = vst [vmem:[#allocation67_spill] sm:$0xff] %v2596_v25  ;;  %4064 = vst [vmem:[#allocation68_spill] sm:$0xff] %v2598_v16  ;;  %937 = vperm.xlu1 %1990, %v910_v49   ;;  %1294 = vperm.xlu0 %1991, %v1261_v6   ;;  %v1263_v25 = vsel %vm1247_vm1, 1, %v3985_v1  ;;  %v914_v16 = vsel %vm898_vm2, 1, %v3985_v1  ;;  %vm1363_vm1 = vcmp.eq.s32.totalorder %v2199_v40, 11  ;;  %vm1014_vm2 = vcmp.eq.s32.totalorder %v2191_v36, 8 }
 0x1ca   :  { %v2604_v3 = vpop.permute.xlu1 %146  ;;  %v2606_v11 = vpop.permute.xlu0 %836 }
 0x1cb   :  { %4065 = vst [vmem:[#allocation69_spill] sm:$0xff] %v2604_v3  ;;  %4066 = vst [vmem:[#allocation70_spill] sm:$0xff] %v2606_v11  ;;  %943 = vperm.xlu1 %1990, %v912_v19   ;;  %1300 = vperm.xlu0 %1991, %v1263_v25   ;;  %v1265_v3 = vsel %vm1249_vm3, 1, %v3985_v1  ;;  %v916_v11 = vsel %vm900_vm4, 1, %v3985_v1  ;;  %vm1365_vm3 = vcmp.eq.s32.totalorder %v2215_v48, 11  ;;  %vm1016_vm4 = vcmp.eq.s32.totalorder %v2208_v45, 8 }
 0x1ce   :  { %v2612_v49 = vpop.permute.xlu1 %149  ;;  %v2614_v6 = vpop.permute.xlu0 %842 }
 0x1cf   :  { %4067 = vst [vmem:[#allocation71_spill] sm:$0xff] %v2612_v49  ;;  %4068 = vst [vmem:[#allocation72_spill] sm:$0xff] %v2614_v6  ;;  %949 = vperm.xlu1 %1990, %v914_v16   ;;  %1306 = vperm.xlu0 %1991, %v1265_v3   ;;  %v1267_v49 = vsel %vm1251_vm5, 1, %v3985_v1  ;;  %v918_v6 = vsel %vm902_vm6, 1, %v3985_v1  ;;  %vm1367_vm5 = vcmp.eq.s32.totalorder %v2232_v56, 11  ;;  %vm1018_vm6 = vcmp.eq.s32.totalorder %v2223_v52, 8 }
 0x1d2   :  { %v2620_v19 = vpop.permute.xlu1 %265  ;;  %v2622_v25 = vpop.permute.xlu0 %848 }
 0x1d3   :  { %4069 = vst [vmem:[#allocation73_spill] sm:$0xff] %v2620_v19  ;;  %4070 = vst [vmem:[#allocation74_spill] sm:$0xff] %v2622_v25  ;;  %955 = vperm.xlu1 %1990, %v916_v11   ;;  %1312 = vperm.xlu0 %1991, %v1267_v49   ;;  %v1369_v19 = vsel %vm1353_vm7, 1, %v3985_v1  ;;  %vm1469_vm7 = vcmp.eq.s32.totalorder %v2122_v2, 12 }
 0x1d6   :  { %v2628_v16 = vpop.permute.xlu1 %381  ;;  %v2630_v3 = vpop.permute.xlu0 %922 }
 0x1d7   :  { %4071 = vst [vmem:[#allocation75_spill] sm:$0xff] %v2628_v16  ;;  %4072 = vst [vmem:[#allocation76_spill] sm:$0xff] %v2630_v3  ;;  %961 = vperm.xlu1 %1990, %v918_v6   ;;  %1386 = vperm.xlu0 %1991, %v1369_v19   ;;  %v1371_v16 = vsel %vm1355_vm9, 1, %v3985_v1  ;;  %vm1471_vm9 = vcmp.eq.s32.totalorder %v2138_v10, 12  ;;  %v1036_v3 = vsel %vm1020_vm8, 1, %v3985_v1  ;;  %vm1136_vm8 = vcmp.eq.s32.totalorder %v2278_v21, 9 }
 0x1d8   :  { %v1152_v35 = vsel %vm1136_vm8, 1, %v3985_v1  ;;  %vm1248_vm8 = vcmp.eq.s32.totalorder %v2208_v45, 10 }
 0x1da   :  { %v2636_v11 = vpop.permute.xlu1 %497  ;;  %v2638_v49 = vpop.permute.xlu0 %928 }
 0x1db   :  { %4073 = vst [vmem:[#allocation77_spill] sm:$0xff] %v2636_v11  ;;  %4074 = vst [vmem:[#allocation78_spill] sm:$0xff] %v2638_v49  ;;  %967 = vperm.xlu1 %1990, %v920_v24   ;;  %1392 = vperm.xlu0 %1991, %v1371_v16   ;;  %v1373_v11 = vsel %vm1357_vm11, 1, %v3985_v1  ;;  %v1024_v49 = vsel %vm1008_vm12, 1, %v3985_v1  ;;  %vm1473_vm11 = vcmp.eq.s32.totalorder %v2156_v18, 12  ;;  %vm1124_vm12 = vcmp.eq.s32.totalorder %v2147_v14, 9 }
 0x1de   :  { %v2644_v6 = vpop.permute.xlu1 %152  ;;  %v2646_v19 = vpop.permute.xlu0 %934 }
 0x1df   :  { %4075 = vst [vmem:[#allocation79_spill] sm:$0xff] %v2646_v19  ;;  %1041 = vperm.xlu1 %1990, %v1022_v39   ;;  %1398 = vperm.xlu0 %1991, %v1373_v11   ;;  %v1026_v19 = vsel %vm1010_vm14, 1, %v3985_v1  ;;  %vm1126_vm14 = vcmp.eq.s32.totalorder %v2163_v22, 9 }
 0x1e2   :  { %v2652_v24 = vpop.permute.xlu1 %155  ;;  %v2654_v16 = vpop.permute.xlu0 %940 }
 0x1e3   :  { %4076 = vst [vmem:[#allocation80_spill] sm:$0xff] %v2652_v24  ;;  %4077 = vst [vmem:[#allocation81_spill] sm:$0xff] %v2654_v16  ;;  %1047 = vperm.xlu1 %1990, %v1024_v49   ;;  %1404 = vperm.xlu0 %1991, %v1375_v38   ;;  %v1377_v24 = vsel %vm1361_vm15, 1, %v3985_v1  ;;  %v1028_v16 = vsel %vm1012_vm0, 1, %v3985_v1  ;;  %vm1477_vm15 = vcmp.eq.s32.totalorder %v2185_v33, 12  ;;  %vm1128_vm0 = vcmp.eq.s32.totalorder %v2177_v29, 9 }
 0x1e6   :  { %v2660_v39 = vpop.permute.xlu1 %271  ;;  %v2662_v11 = vpop.permute.xlu0 %946 }
 0x1e7   :  { %4078 = vst [vmem:[#allocation82_spill] sm:$0xff] %v2660_v39  ;;  %4079 = vst [vmem:[#allocation83_spill] sm:$0xff] %v2662_v11  ;;  %1053 = vperm.xlu1 %1990, %v1026_v19   ;;  %1410 = vperm.xlu0 %1991, %v1377_v24   ;;  %v1379_v39 = vsel %vm1363_vm1, 1, %v3985_v1  ;;  %v1030_v11 = vsel %vm1014_vm2, 1, %v3985_v1  ;;  %vm1479_vm1 = vcmp.eq.s32.totalorder %v2199_v40, 12  ;;  %vm1130_vm2 = vcmp.eq.s32.totalorder %v2191_v36, 9 }
 0x1ea   :  { %v2668_v49 = vpop.permute.xlu1 %387  ;;  %v2670_v38 = vpop.permute.xlu0 %952 }
 0x1eb   :  { %4080 = vst [vmem:[#allocation84_spill] sm:$0xff] %v2668_v49  ;;  %4081 = vst [vmem:[#allocation85_spill] sm:$0xff] %v2670_v38  ;;  %1059 = vperm.xlu1 %1990, %v1028_v16   ;;  %1416 = vperm.xlu0 %1991, %v1379_v39   ;;  %v1381_v49 = vsel %vm1365_vm3, 1, %v3985_v1  ;;  %v1032_v38 = vsel %vm1016_vm4, 1, %v3985_v1  ;;  %vm1481_vm3 = vcmp.eq.s32.totalorder %v2215_v48, 12  ;;  %vm1132_vm4 = vcmp.eq.s32.totalorder %v2208_v45, 9 }
 0x1ee   :  { %v2676_v19 = vpop.permute.xlu1 %503  ;;  %v2678_v24 = vpop.permute.xlu0 %958 }
 0x1ef   :  { %4082 = vst [vmem:[#allocation86_spill] sm:$0xff] %v2676_v19  ;;  %4083 = vst [vmem:[#allocation87_spill] sm:$0xff] %v2678_v24  ;;  %1065 = vperm.xlu1 %1990, %v1030_v11   ;;  %1422 = vperm.xlu0 %1991, %v1381_v49   ;;  %v1383_v19 = vsel %vm1367_vm5, 1, %v3985_v1  ;;  %v1034_v24 = vsel %vm1018_vm6, 1, %v3985_v1  ;;  %vm1483_vm5 = vcmp.eq.s32.totalorder %v2232_v56, 12  ;;  %vm1134_vm6 = vcmp.eq.s32.totalorder %v2223_v52, 9 }
 0x1f2   :  { %v2684_v16 = vpop.permute.xlu1 %607  ;;  %v2686_v39 = vpop.permute.xlu0 %964 }
 0x1f3   :  { %4084 = vst [vmem:[#allocation88_spill] sm:$0xff] %v2684_v16  ;;  %4085 = vst [vmem:[#allocation89_spill] sm:$0xff] %v2686_v39  ;;  %1071 = vperm.xlu1 %1990, %v1032_v38   ;;  %1428 = vperm.xlu0 %1991, %v1383_v19   ;;  %v1485_v16 = vsel %vm1469_vm7, 1, %v3985_v1  ;;  %vm1585_vm7 = vcmp.eq.s32.totalorder %v2122_v2, 13 }
 0x1f6   :  { %v2692_v11 = vpop.permute.xlu1 %613  ;;  %v2694_v49 = vpop.permute.xlu0 %1038 }
 0x1f7   :  { %4086 = vst [vmem:[#allocation90_spill] sm:$0xff] %v2692_v11  ;;  %4087 = vst [vmem:[#allocation91_spill] sm:$0xff] %v2694_v49  ;;  %1077 = vperm.xlu1 %1990, %v1034_v24   ;;  %1502 = vperm.xlu0 %1991, %v1485_v16   ;;  %v1487_v11 = vsel %vm1471_vm9, 1, %v3985_v1  ;;  %v1138_v49 = vsel %vm1122_vm10, 1, %v3985_v1  ;;  %vm1587_vm9 = vcmp.eq.s32.totalorder %v2138_v10, 13  ;;  %vm1238_vm10 = vcmp.eq.s32.totalorder %v2129_v5, 10 }
 0x1fa   :  { %v2700_v38 = vpop.permute.xlu1 %619  ;;  %v2702_v19 = vpop.permute.xlu0 %1044 }
 0x1fb   :  { %4088 = vst [vmem:[#allocation92_spill] sm:$0xff] %v2700_v38  ;;  %4089 = vst [vmem:[#allocation93_spill] sm:$0xff] %v2702_v19  ;;  %1083 = vperm.xlu1 %1990, %v1036_v3   ;;  %1508 = vperm.xlu0 %1991, %v1487_v11   ;;  %v1489_v38 = vsel %vm1473_vm11, 1, %v3985_v1  ;;  %v1140_v19 = vsel %vm1124_vm12, 1, %v3985_v1  ;;  %vm1589_vm11 = vcmp.eq.s32.totalorder %v2156_v18, 13  ;;  %vm1240_vm12 = vcmp.eq.s32.totalorder %v2147_v14, 10 }
 0x1fc   :  { %v1256_v9 = vsel %vm1240_vm12, 1, %v3985_v1  ;;  %vm1358_vm12 = vcmp.eq.s32.totalorder %v2163_v22, 11 }
 0x1fe   :  { %v2708_v24 = vpop.permute.xlu1 %693  ;;  %v2710_v16 = vpop.permute.xlu0 %1050 }
 0x1ff   :  { %4090 = vst [vmem:[#allocation94_spill] sm:$0xff] %v2708_v24  ;;  %4091 = vst [vmem:[#allocation95_spill] sm:$0xff] %v2710_v16  ;;  %1157 = vperm.xlu1 %1990, %v1138_v49   ;;  %1514 = vperm.xlu0 %1991, %v1489_v38   ;;  %v1491_v24 = vsel %vm1475_vm13, 1, %v3985_v1  ;;  %v1142_v16 = vsel %vm1126_vm14, 1, %v3985_v1  ;;  %vm1591_vm13 = vcmp.eq.s32.totalorder %v2171_v26, 13  ;;  %vm1242_vm14 = vcmp.eq.s32.totalorder %v2163_v22, 10 }
 0x202   :  { %v2716_v3 = vpop.permute.xlu1 %699  ;;  %v2718_v11 = vpop.permute.xlu0 %1056 }
 0x203   :  { %4092 = vst [vmem:[#allocation96_spill] sm:$0xff] %v2716_v3  ;;  %4093 = vst [vmem:[#allocation97_spill] sm:$0xff] %v2718_v11  ;;  %1163 = vperm.xlu1 %1990, %v1140_v19   ;;  %1520 = vperm.xlu0 %1991, %v1491_v24   ;;  %v1493_v3 = vsel %vm1477_vm15, 1, %v3985_v1  ;;  %v1144_v11 = vsel %vm1128_vm0, 1, %v3985_v1  ;;  %vm1593_vm15 = vcmp.eq.s32.totalorder %v2185_v33, 13  ;;  %vm1244_vm0 = vcmp.eq.s32.totalorder %v2177_v29, 10 }
 0x206   :  { %v2724_v49 = vpop.permute.xlu1 %705  ;;  %v2726_v38 = vpop.permute.xlu0 %1062 }
 0x207   :  { %4094 = vst [vmem:[#allocation98_spill] sm:$0xff] %v2724_v49  ;;  %4095 = vst [vmem:[#allocation99_spill] sm:$0xff] %v2726_v38  ;;  %1169 = vperm.xlu1 %1990, %v1142_v16   ;;  %1526 = vperm.xlu0 %1991, %v1493_v3   ;;  %v1495_v49 = vsel %vm1479_vm1, 1, %v3985_v1  ;;  %v1146_v38 = vsel %vm1130_vm2, 1, %v3985_v1  ;;  %vm1595_vm1 = vcmp.eq.s32.totalorder %v2199_v40, 13  ;;  %vm1246_vm2 = vcmp.eq.s32.totalorder %v2191_v36, 10 }
 0x20a   :  { %v2732_v19 = vpop.permute.xlu1 %711  ;;  %v2734_v24 = vpop.permute.xlu0 %1068 }
 0x20b   :  { %4096 = vst [vmem:[#allocation100_spill] sm:$0xff] %v2732_v19  ;;  %4097 = vst [vmem:[#allocation101_spill] sm:$0xff] %v2734_v24  ;;  %1175 = vperm.xlu1 %1990, %v1144_v11   ;;  %1532 = vperm.xlu0 %1991, %v1495_v49   ;;  %v1497_v19 = vsel %vm1481_vm3, 1, %v3985_v1  ;;  %v1148_v24 = vsel %vm1132_vm4, 1, %v3985_v1  ;;  %vm1597_vm3 = vcmp.eq.s32.totalorder %v2215_v48, 13  ;;  %vm1701_vm4 = vcmp.eq.s32.totalorder %v2122_v2, 14 }
 0x20e   :  { %v2740_v16 = vpop.permute.xlu1 %717  ;;  %v2742_v3 = vpop.permute.xlu0 %1074 }
 0x20f   :  { %4098 = vst [vmem:[#allocation102_spill] sm:$0xff] %v2740_v16  ;;  %4099 = vst [vmem:[#allocation103_spill] sm:$0xff] %v2742_v3  ;;  %1181 = vperm.xlu1 %1990, %v1146_v38   ;;  %1538 = vperm.xlu0 %1991, %v1497_v19   ;;  %v1499_v16 = vsel %vm1483_vm5, 1, %v3985_v1  ;;  %v1150_v3 = vsel %vm1134_vm6, 1, %v3985_v1  ;;  %vm1703_vm5 = vcmp.eq.s32.totalorder %v2138_v10, 14  ;;  %vm1354_vm6 = vcmp.eq.s32.totalorder %v2129_v5, 11 }
 0x212   :  { %v2748_v11 = vpop.permute.xlu1 %723  ;;  %v2750_v49 = vpop.permute.xlu0 %1080 }
 0x213   :  { %4100 = vst [vmem:[#allocation104_spill] sm:$0xff] %v2748_v11  ;;  %4101 = vst [vmem:[#allocation105_spill] sm:$0xff] %v2750_v49  ;;  %1187 = vperm.xlu1 %1990, %v1148_v24   ;;  %1544 = vperm.xlu0 %1991, %v1499_v16   ;;  %v1601_v11 = vsel %vm1585_vm7, 1, %v3985_v1  ;;  %v1611_v49 = vsel %vm1595_vm1, 1, %v3985_v1  ;;  %vm1705_vm7 = vcmp.eq.s32.totalorder %v2156_v18, 14  ;;  %vm1817_vm1 = vcmp.eq.s32.totalorder %v2122_v2, 15 }
 0x216   :  { %v2756_v38 = vpop.permute.xlu1 %729  ;;  %v2758_v19 = vpop.permute.xlu0 %1154 }
 0x217   :  { %4102 = vst [vmem:[#allocation106_spill] sm:$0xff] %v2756_v38  ;;  %4103 = vst [vmem:[#allocation107_spill] sm:$0xff] %v2758_v19  ;;  %1193 = vperm.xlu1 %1990, %v1150_v3   ;;  %1618 = vperm.xlu0 %1991, %v1601_v11   ;;  %v1603_v38 = vsel %vm1587_vm9, 1, %v3985_v1  ;;  %v1254_v19 = vsel %vm1238_vm10, 1, %v3985_v1  ;;  %vm1599_vm9 = vcmp.eq.s32.totalorder %v2232_v56, 13  ;;  %vm1356_vm10 = vcmp.eq.s32.totalorder %v2147_v14, 11 }
 0x21a   :  { %v2764_v24 = vpop.permute.xlu1 %735  ;;  %v2766_v16 = vpop.permute.xlu0 %1160 }
 0x21b   :  { %4104 = vst [vmem:[#allocation108_spill] sm:$0xff] %v2764_v24  ;;  %4105 = vst [vmem:[#allocation109_spill] sm:$0xff] %v2766_v16  ;;  %1199 = vperm.xlu1 %1990, %v1152_v35   ;;  %1624 = vperm.xlu0 %1991, %v1603_v38   ;;  %v1605_v24 = vsel %vm1589_vm11, 1, %v3985_v1  ;;  %v173_v35 = vlaneseq  ;;  %vm1707_vm11 = vcmp.eq.s32.totalorder %v2171_v26, 14 }
 0x21e   :  { %v2772_v3 = vpop.permute.xlu1 %809  ;;  %v2774_v11 = vpop.permute.xlu0 %1166 }
 0x21f   :  { %4106 = vst [vmem:[#allocation110_spill] sm:$0xff] %v2772_v3  ;;  %4107 = vst [vmem:[#allocation111_spill] sm:$0xff] %v2774_v11  ;;  %1273 = vperm.xlu1 %1990, %v1254_v19   ;;  %1630 = vperm.xlu0 %1991, %v1605_v24   ;;  %v1607_v3 = vsel %vm1591_vm13, 1, %v3985_v1  ;;  %v2788_v19 = vshrl.u32 %v173_v35, 7  ;;  %v2800_v35 = vld [vmem:[#allocation5] sm:$0xff]  ;;  %vm1709_vm13 = vcmp.eq.s32.totalorder %v2185_v33, 14 }
 0x221   :  { %v4120_v25 = vsub.s32 4, %v2788_v19 }
 0x222   :  { %v2780_v38 = vpop.permute.xlu1 %815  ;;  %v2782_v16 = vpop.permute.xlu0 %1172 }
 0x223   :  { %4108 = vst [vmem:[#allocation112_spill] sm:$0xff] %v2780_v38  ;;  %4109 = vst [vmem:[#allocation113_spill] sm:$0xff] %v2782_v16  ;;  %1279 = vperm.xlu1 %1990, %v1256_v9   ;;  %1636 = vperm.xlu0 %1991, %v1607_v3   ;;  %v1258_v38 = vsel %vm1242_vm14, 1, %v3985_v1  ;;  %v1609_v16 = vsel %vm1593_vm15, 1, %v3985_v1  ;;  %v3987_v9 = vsub.s32 0, %v2788_v19  ;;  %v2849_v42 = vrot.slane %v2800_v35, %v4120_v25 }
 0x224   :  { %vm1250_vm14 = vcmp.eq.s32.totalorder %v2223_v52, 10  ;;  %vm1360_vm15 = vcmp.eq.s32.totalorder %v2177_v29, 11 }
 0x226   :  { %v2790_v24 = vpop.permute.xlu1 %821  ;;  %v2792_v11 = vpop.permute.xlu0 %1178 }
 0x227   :  { %4110 = vst [vmem:[#allocation114_spill] sm:$0xff] %v2790_v24  ;;  %4111 = vst [vmem:[#allocation115_spill] sm:$0xff] %v2792_v11  ;;  %1285 = vperm.xlu1 %1990, %v1258_v38   ;;  %1642 = vperm.xlu0 %1991, %v1609_v16   ;;  %v1260_v11 = vsel %vm1244_vm0, 1, %v3985_v1  ;;  %v4117_v38 = vmov 0   ;;  %vm1362_vm0 = vcmp.eq.s32.totalorder %v2191_v36, 11 }
 0x228   :  { %v1262_v3 = vsel %vm1246_vm2, 1, %v4117_v38  ;;  %v1613_v16 = vsel %vm1597_vm3, 1, %v4117_v38  ;;  %v2861_v39 = vsel %vm1705_vm7, 1, %v4117_v38  ;;  %v1264_v32 = vsel %vm1248_vm8, 1, %v4117_v38 }
 0x229   :  { %v1615_v53 = vsel %vm1599_vm9, 1, %v4117_v38  ;;  %v2872_v30 = vsel %vm1356_vm10, 1, %v4117_v38  ;;  %vm1711_vm2 = vcmp.eq.s32.totalorder %v2199_v40, 14  ;;  %vm1819_vm3 = vcmp.eq.s32.totalorder %v2138_v10, 15 }
 0x22a   :  { %v2802_v8 = vpop.permute.xlu1 %827  ;;  %v2804_v24 = vpop.permute.xlu0 %1184  ;;  %v1266_v36 = vsel %vm1250_vm14, 1, %v4117_v38  ;;  %v2899_v29 = vsel %vm1360_vm15, 1, %v4117_v38  ;;  %v2902_v0 = vsel %vm1362_vm0, 1, %v4117_v38  ;;  %v2905_v37 = vsel %vm1817_vm1, 1, %v4117_v38 }
 0x22b   :  { %4112 = vst [vmem:[#allocation116_spill] sm:$0xff] %v2802_v8  ;;  %4113 = vst [vmem:[#allocation117_spill] sm:$0xff] %v2804_v24  ;;  %1291 = vperm.xlu1 %1990, %v1260_v11   ;;  %1648 = vperm.xlu0 %1991, %v1611_v49   ;;  %v2816_v8 = vrot.slane %v2800_v35, %v3987_v9  ;;  %v4114_v24 = vsub.s32 1, %v2788_v19  ;;  %v4118_v9 = vsub.s32 2, %v2788_v19  ;;  %vm157_vm7 = vcmp.eq.s32.totalorder %v2286_v27, 1 }
 0x22c   :  { %vm1252_vm8 = vcmp.eq.s32.totalorder %v2278_v21, 10  ;;  %vm1823_vm9 = vcmp.eq.s32.totalorder %v2171_v26, 15  ;;  %vm1364_vm10 = vcmp.eq.s32.totalorder %v2208_v45, 11  ;;  %vm1713_vm14 = vcmp.eq.s32.totalorder %v2215_v48, 14 }
 0x22d   :  { %v2821_v1 = vrot.slane %v2800_v35, %v4114_v24  ;;  %v2836_v24 = vrot.slane %v2800_v35, %v4118_v9  ;;  %v1717_v9 = vsel %vm1701_vm4, 1, %v4117_v38  ;;  %vm1470_vm4 = vcmp.eq.s32.totalorder %v2129_v5, 12 }
 0x22e   :  { %v2825_v49 = vpop.permute.xlu1 %833  ;;  %v2827_v11 = vpop.permute.xlu0 %1190  ;;  %v177_v10 = vsel %vm157_vm7, %v2816_v8, 0.0  ;;  %vm389_vm15 = vcmp.eq.s32.totalorder %v2297_v34, 1  ;;  %vm159_vm0 = vcmp.eq.s32.totalorder %v2332_v58, 1  ;;  %vm171_vm1 = vcmp.eq.s32.totalorder %v2644_v6, 1 }
 0x22f   :  { %4115 = vst [vmem:[#allocation118_spill] sm:$0xff] %v2825_v49  ;;  %4116 = vst [vmem:[#allocation119_spill] sm:$0xff] %v2827_v11  ;;  %1297 = vperm.xlu1 %1990, %v1262_v3   ;;  %1654 = vperm.xlu0 %1991, %v1613_v16   ;;  %v4119_v49 = vsub.s32 3, %v2788_v19  ;;  %v1719_v3 = vsel %vm1703_vm5, 1, %v4117_v38  ;;  %v2858_v16 = vsel %vm1354_vm6, 1, %v4117_v38  ;;  %vm1821_vm5 = vcmp.eq.s32.totalorder %v2156_v18, 15 }
 0x230   :  { %vm1472_vm6 = vcmp.eq.s32.totalorder %v2147_v14, 12  ;;  %v2912_v18 = vsel %vm1711_vm2, 1, %v4117_v38  ;;  %v2920_v14 = vsel %vm1470_vm4, 1, %v4117_v38  ;;  %v2923_v5 = vsel %vm1821_vm5, 1, %v4117_v38 }
 0x231   :  { %v2844_v11 = vrot.slane %v2800_v35, %v4119_v49  ;;  %4124 = vst [vmem:[#allocation123_spill] sm:$0xff] %v2923_v5  ;;  %vm275_vm2 = vcmp.eq.s32.totalorder %v2341_v62, 1  ;;  %v2953_v27 = vsel %vm1364_vm10, 1, %v4117_v38  ;;  %v4127_v6 = vsub.s32 5, %v2788_v19 }
 0x232   :  { %v2865_v25 = vpop.permute.xlu1 %839  ;;  %v2867_v49 = vpop.permute.xlu0 %1196  ;;  %vm505_vm4 = vcmp.eq.s32.totalorder %v2304_v41, 1  ;;  %vm621_vm5 = vcmp.eq.s32.totalorder %v2311_v43, 1  ;;  %vm1715_vm7 = vcmp.eq.s32.totalorder %v2232_v56, 14  ;;  %vm287_vm10 = vcmp.eq.s32.totalorder %v2454_v4, 1 }
 0x233   :  { %4121 = vst [vmem:[#allocation120_spill] sm:$0xff] %v2865_v25  ;;  %4122 = vst [vmem:[#allocation121_spill] sm:$0xff] %v2867_v49  ;;  %1303 = vperm.xlu1 %1990, %v1264_v32   ;;  %1660 = vperm.xlu0 %1991, %v1615_v53   ;;  %v2880_v25 = vsel %vm1707_vm11, 1, %v4117_v38  ;;  %v2883_v49 = vsel %vm1358_vm12, 1, %v4117_v38  ;;  %v2888_v32 = vsel %vm1709_vm13, 1, %v4117_v38  ;;  %vm1474_vm11 = vcmp.eq.s32.totalorder %v2163_v22, 12 }
 0x234   :  { %vm1825_vm12 = vcmp.eq.s32.totalorder %v2185_v33, 15  ;;  %vm273_vm13 = vcmp.eq.s32.totalorder %v2288_v28, 1  ;;  %v2947_v28 = vsel %vm1823_vm9, 1, %v4117_v38  ;;  %v2958_v34 = vsel %vm1474_vm11, 1, %v4117_v38 }
 0x235   :  { %v2963_v58 = vsel %vm1825_vm12, 1, %v4117_v38  ;;  %v293_v26 = vsel %vm273_vm13, %v2821_v1, %v177_v10  ;;  %v2969_v62 = vrot.slane %v2800_v35, %v4127_v6  ;;  %v179_v33 = vsel %vm159_vm0, %v2816_v8, 0.0 }
 0x236   :  { %v2893_v2 = vpop.permute.xlu1 %845  ;;  %v2895_v53 = vpop.permute.xlu0 %1270  ;;  %v295_v6 = vsel %vm275_vm2, %v2821_v1, %v179_v33  ;;  %vm163_vm9 = vcmp.eq.s32.totalorder %v2444_v15, 1  ;;  %v4002_v41 = vsub.s32 6, %v2788_v19  ;;  %vm391_vm11 = vcmp.eq.s32.totalorder %v2319_v50, 1 }
 0x237   :  { %4123 = vst [vmem:[#allocation122_spill] sm:$0xff] %v2893_v2  ;;  %1309 = vperm.xlu1 %1990, %v1266_v36   ;;  %1734 = vperm.xlu0 %1991, %v1717_v9   ;;  %v2917_v2 = vsel %vm1819_vm3, 1, %v4117_v38  ;;  %v2926_v36 = vsel %vm1472_vm6, 1, %v4117_v38  ;;  %vm1366_vm3 = vcmp.eq.s32.totalorder %v2223_v52, 11  ;;  %vm161_vm6 = vcmp.eq.s32.totalorder %v2390_v44, 1 }
 0x238   :  { %4125 = vst [vmem:[#allocation124_spill] sm:$0xff] %v2926_v36  ;;  %v1268_v36 = vsel %vm1252_vm8, 1, %v4117_v38  ;;  %vm277_vm8 = vcmp.eq.s32.totalorder %v2397_v55, 1  ;;  %vm279_vm12 = vcmp.eq.s32.totalorder %v2452_v51, 1  ;;  %v181_v55 = vsel %vm161_vm6, %v2816_v8, 0.0 }
 0x239   :  { %v3007_v4 = vsel %vm1366_vm3, 1, %v4117_v38  ;;  %v297_v50 = vsel %vm277_vm8, %v2821_v1, %v181_v55  ;;  %v183_v51 = vsel %vm163_vm9, %v2816_v8, 0.0  ;;  %vm403_vm13 = vcmp.eq.s32.totalorder %v2462_v47, 1 }
 0x23a   :  { %v2935_v9 = vpop.permute.xlu1 %851  ;;  %v2937_v5 = vpop.permute.xlu0 %1276  ;;  %v3024_v33 = vrot.slane %v2800_v35, %v4002_v41  ;;  %vm395_vm0 = vcmp.eq.s32.totalorder %v2367_v17, 1  ;;  %vm519_vm2 = vcmp.eq.s32.totalorder %v2470_v60, 1  ;;  %vm165_vm3 = vcmp.eq.s32.totalorder %v2500_v20, 1  ;;  %v4128_v20 = vld [vmem:[#allocation45_spill] sm:$0xff] }
 0x23b   :  { %4126 = vst [vmem:[#allocation125_spill] sm:$0xff] %v2935_v9  ;;  %1315 = vperm.xlu1 %1990, %v1268_v36   ;;  %1740 = vperm.xlu0 %1991, %v1719_v3   ;;  %v2972_v3 = vsel %vm1713_vm14, 1, %v4117_v38  ;;  %v409_v36 = vsel %vm389_vm15, %v2836_v24, %v293_v26  ;;  %v191_v9 = vsel %vm171_vm1, %v2816_v8, 0.0  ;;  %vm507_vm14 = vcmp.eq.s32.totalorder %v2326_v54, 1 }
 0x23c   :  { %v525_v43 = vsel %vm505_vm4, %v2844_v11, %v409_v36  ;;  %v307_v44 = vsel %vm287_vm10, %v2821_v1, %v191_v9  ;;  %v3017_v9 = vsel %vm1715_vm7, 1, %v4117_v38  ;;  %v299_v36 = vsel %vm279_vm12, %v2821_v1, %v183_v51 }
 0x23d   :  { %v423_v47 = vsel %vm403_vm13, %v2836_v24, %v307_v44  ;;  %vm393_vm15 = vcmp.eq.s32.totalorder %v2343_v63, 1  ;;  %vm1368_vm1 = vcmp.eq.s32.totalorder %v2278_v21, 11  ;;  %v4001_v54 = vsub.s32 7, %v2788_v19 }
 0x23e   :  { %v2979_v22 = vpop.permute.xlu1 %925  ;;  %v2981_v10 = vpop.permute.xlu0 %1282  ;;  %vm623_vm4 = vcmp.eq.s32.totalorder %v2334_v59, 1  ;;  %v415_v63 = vsel %vm395_vm0, %v2836_v24, %v299_v36  ;;  %v539_v17 = vsel %vm519_vm2, %v2844_v11, %v423_v47  ;;  %vm509_vm6 = vcmp.eq.s32.totalorder %v2352_v7, 1 }
 0x23f   :  { %1389 = vperm.xlu1 %1990, %v2858_v16   ;;  %1746 = vperm.xlu0 %1991, %v2861_v39   ;;  %v641_v39 = vsel %vm621_vm5, %v2849_v42, %v525_v43  ;;  %v411_v16 = vsel %vm391_vm11, %v2836_v24, %v295_v6  ;;  %vm281_vm5 = vcmp.eq.s32.totalorder %v2508_v61, 1  ;;  %vm625_vm7 = vcmp.eq.s32.totalorder %v2360_v12, 1  ;;  %v4134_v12 = vld [vmem:[#allocation89_spill] sm:$0xff] }
 0x240   :  { %v3051_v59 = vsel %vm1368_vm1, 1, %v4117_v38  ;;  %vm511_vm8 = vcmp.eq.s32.totalorder %v2374_v23, 1  ;;  %vm635_vm9 = vcmp.eq.s32.totalorder %v2494_v13, 1  ;;  %v185_v61 = vsel %vm165_vm3, %v2816_v8, 0.0  ;;  %v3067_v23 = vld [vmem:[#allocation5 + $0x8] sm:$0xff] }
 0x241   :  { %v301_v7 = vsel %vm281_vm5, %v2821_v1, %v185_v61  ;;  %v3064_v44 = vrot.slane %v2800_v35, %v4001_v54  ;;  %vm627_vm10 = vcmp.eq.s32.totalorder %v2383_v31, 1  ;;  %vm397_vm11 = vcmp.eq.s32.totalorder %v2392_v46, 1  ;;  %v4129_v35 = vld [vmem:[#allocation28_spill] sm:$0xff]  ;;  %v4131_v31 = vld [vmem:[#allocation58_spill] sm:$0xff] }
 0x242   :  { %v3000_v26 = vpop.permute.xlu1 %931  ;;  %v3002_v15 = vpop.permute.xlu0 %1288  ;;  %vm513_vm12 = vcmp.eq.s32.totalorder %v2399_v57, 1  ;;  %vm737_vm13 = vcmp.eq.s32.totalorder %v4128_v20, 1  ;;  %vm751_vm0 = vcmp.eq.s32.totalorder %v4131_v31, 1  ;;  %v417_v46 = vsel %vm397_vm11, %v2836_v24, %v301_v7  ;;  %v4140_v20 = vld [vmem:[#allocation48_spill] sm:$0xff]  ;;  %v4148_v54 = vld [vmem:[#allocation34_spill] sm:$0xff] }
 0x243   :  { %1395 = vperm.xlu1 %1990, %v2872_v30   ;;  %1752 = vperm.xlu0 %1991, %v2880_v25   ;;  %v527_v30 = vsel %vm507_vm14, %v2844_v11, %v411_v16  ;;  %v413_v25 = vsel %vm393_vm15, %v2836_v24, %v297_v50  ;;  %v655_v16 = vsel %vm635_vm9, %v2849_v42, %v539_v17  ;;  %vm629_vm14 = vcmp.eq.s32.totalorder %v4129_v35, 1  ;;  %v4130_v50 = vld [vmem:[#allocation46_spill] sm:$0xff]  ;;  %v4156_v35 = vld [vmem:[#allocation93_spill] sm:$0xff] }
 0x244   :  { %v643_v60 = vsel %vm623_vm4, %v2849_v42, %v527_v30  ;;  %vm739_vm15 = vcmp.eq.s32.totalorder %v4130_v50, 1  ;;  %v757_v30 = vsel %vm737_vm13, %v2969_v62, %v641_v39  ;;  %vm983_vm2 = vcmp.eq.s32.totalorder %v4134_v12, 1  ;;  %v4139_v39 = vld [vmem:[#allocation105_spill] sm:$0xff]  ;;  %v4150_v12 = vld [vmem:[#allocation107_spill] sm:$0xff] }
 0x245   :  { %v759_v7 = vsel %vm739_vm15, %v2969_v62, %v643_v60  ;;  %vm1099_vm5 = vcmp.eq.s32.totalorder %v4139_v39, 1  ;;  %v533_v50 = vsel %vm513_vm12, %v2844_v11, %v417_v46  ;;  %v4142_v60 = vld [vmem:[#allocation30_spill] sm:$0xff]  ;;  %v4145_v46 = vld [vmem:[#allocation91_spill] sm:$0xff]  ;;  %vm285_vm12 = vcmp.eq.s32.totalorder %v4148_v54, 1 }
 0x246   :  { %v3035_v6 = vpop.permute.xlu1 %937  ;;  %v3037_v43 = vpop.permute.xlu0 %1294  ;;  %vm1085_vm11 = vcmp.eq.s32.totalorder %v4145_v46, 1  ;;  %vm1201_vm15 = vcmp.eq.s32.totalorder %v4150_v12, 1  ;;  %v4158_v46 = vld [vmem:[#allocation109_spill] sm:$0xff] }
 0x247   :  { %1401 = vperm.xlu1 %1990, %v2883_v49   ;;  %1758 = vperm.xlu0 %1991, %v2888_v32   ;;  %v529_v49 = vsel %vm509_vm6, %v2844_v11, %v413_v25  ;;  %v531_v32 = vsel %vm511_vm8, %v2844_v11, %v415_v63  ;;  %v4133_v25 = vld [vmem:[#allocation57_spill] sm:$0xff]  ;;  %v4135_v63 = vsub.s32 1, %v2788_v19  ;;  %vm741_vm6 = vcmp.eq.s32.totalorder %v4140_v20, 1 }
 0x248   :  { %v3084_v51 = vsel %vm625_vm7, %v2849_v42, %v529_v49  ;;  %v3089_v36 = vsel %vm627_vm10, %v2849_v42, %v531_v32  ;;  %vm167_vm1 = vcmp.eq.s32.totalorder %v4133_v25, 1  ;;  %v4137_v32 = vld [vmem:[#allocation60_spill] sm:$0xff]  ;;  %vm399_vm8 = vcmp.eq.s32.totalorder %v4142_v60, 1 }
 0x249   :  { %v3103_v17 = vrot.slane %v3067_v23, %v4135_v63  ;;  %vm853_vm3 = vcmp.eq.s32.totalorder %v4137_v32, 1  ;;  %v187_v63 = vsel %vm167_vm1, %v2816_v8, 0.0  ;;  %v4143_v32 = vld [vmem:[#allocation59_spill] sm:$0xff]  ;;  %vm1317_vm1 = vcmp.eq.s32.totalorder %v2895_v53, 1  ;;  %v4159_v53 = vld [vmem:[#allocation37_spill] sm:$0xff] }
 0x24a   :  { %v3069_v13 = vpop.permute.xlu1 %943  ;;  %v3071_v55 = vpop.permute.xlu0 %1300  ;;  %vm283_vm9 = vcmp.eq.s32.totalorder %v4143_v32, 1  ;;  %v873_v57 = vsel %vm853_vm3, %v3024_v33, %v757_v30 }
 0x24b   :  { %1407 = vperm.xlu1 %1990, %v2899_v29   ;;  %1764 = vperm.xlu0 %1991, %v2912_v18   ;;  %v771_v29 = vsel %vm751_vm0, %v2969_v62, %v655_v16  ;;  %v4132_v18 = vsub.s32 0, %v2788_v19  ;;  %v4138_v16 = vld [vmem:[#allocation74_spill] sm:$0xff] }
 0x24c   :  { %vm867_vm4 = vcmp.eq.s32.totalorder %v4138_v16, 1  ;;  %v4146_v16 = vsub.s32 2, %v2788_v19 }
 0x24d   :  { %v3095_v47 = vrot.slane %v3067_v23, %v4132_v18  ;;  %v887_v31 = vsel %vm867_vm4, %v3024_v33, %v771_v29  ;;  %v4141_v18 = vld [vmem:[#allocation121_spill] sm:$0xff] }
 0x24e   :  { %v3105_v61 = vpop.permute.xlu1 %949  ;;  %v3107_v49 = vpop.permute.xlu0 %1306  ;;  %vm1215_vm7 = vcmp.eq.s32.totalorder %v4141_v18, 1  ;;  %v3136_v39 = vrot.slane %v3067_v23, %v4146_v16  ;;  %v4151_v16 = vsub.s32 3, %v2788_v19 }
 0x24f   :  { %4136 = vst [vmem:[#allocation45_spill] sm:$0xff] %v3105_v61  ;;  %1413 = vperm.xlu1 %1990, %v2902_v0   ;;  %1770 = vperm.xlu0 %1991, %v2972_v3   ;;  %v4144_v0 = vld [vmem:[#allocation76_spill] sm:$0xff]  ;;  %v1003_v3 = vsel %vm983_vm2, %v3064_v44, %v887_v31 }
 0x250   :  { %vm969_vm10 = vcmp.eq.s32.totalorder %v4144_v0, 1  ;;  %v1119_v29 = vsel %vm1099_vm5, %v3095_v47, %v1003_v3  ;;  %v4149_v0 = vld [vmem:[#allocation62_spill] sm:$0xff]  ;;  %v3154_v41 = vrot.slane %v3067_v23, %v4151_v16  ;;  %v4155_v16 = vld [vmem:[#allocation69_spill] sm:$0xff]  ;;  %v4157_v61 = vld [vmem:[#allocation64_spill] sm:$0xff] }
 0x251   :  { %vm855_vm13 = vcmp.eq.s32.totalorder %v4149_v0, 1  ;;  %v1235_v30 = vsel %vm1215_vm7, %v3103_v17, %v1119_v29  ;;  %v989_v31 = vsel %vm969_vm10, %v3064_v44, %v873_v57  ;;  %v4153_v57 = vld [vmem:[#allocation78_spill] sm:$0xff]  ;;  %vm169_vm5 = vcmp.eq.s32.totalorder %v4155_v16, 1 }
 0x252   :  { %v3138_v25 = vpop.permute.xlu1 %955  ;;  %v1313_v18 = vpop.permute.xlu0 %1312  ;;  %vm971_vm3 = vcmp.eq.s32.totalorder %v4153_v57, 1  ;;  %v1105_v29 = vsel %vm1085_vm11, %v3095_v47, %v989_v31  ;;  %vm857_vm7 = vcmp.eq.s32.totalorder %v4157_v61, 1  ;;  %vm1319_vm11 = vcmp.eq.s32.totalorder %v2937_v5, 1 }
 0x253   :  { %4147 = vst [vmem:[#allocation28_spill] sm:$0xff] %v3138_v25  ;;  %vm1331_vm0 = vcmp.eq.s32.totalorder %v1313_v18, 1  ;;  %1419 = vperm.xlu1 %1990, %v2953_v27   ;;  %1776 = vperm.xlu0 %1991, %v3017_v9   ;;  %v4152_v25 = vld [vmem:[#allocation32_spill] sm:$0xff]  ;;  %v3160_v27 = vsel %vm629_vm14, %v2849_v42, %v533_v50  ;;  %v303_v9 = vsel %vm283_vm9, %v2821_v1, %v187_v63  ;;  %vm1087_vm14 = vcmp.eq.s32.totalorder %v4156_v35, 1  ;;  %v4165_v35 = vld [vmem:[#allocation111_spill] sm:$0xff] }
 0x254   :  { %v3149_v3 = vsel %vm1331_vm0, %v3136_v39, %v1235_v30  ;;  %vm515_vm2 = vcmp.eq.s32.totalorder %v4152_v25, 1  ;;  %v4154_v18 = vld [vmem:[#allocation36_spill] sm:$0xff]  ;;  %v875_v30 = vsel %vm855_vm13, %v3024_v33, %v759_v7  ;;  %v1221_v50 = vsel %vm1201_vm15, %v3103_v17, %v1105_v29  ;;  %v4160_v29 = vld [vmem:[#allocation41_spill] sm:$0xff] }
 0x255   :  { %vm401_vm4 = vcmp.eq.s32.totalorder %v4154_v18, 1  ;;  %vm1203_vm9 = vcmp.eq.s32.totalorder %v4158_v46, 1  ;;  %v1337_v0 = vsel %vm1317_vm1, %v3136_v39, %v1221_v50  ;;  %v761_v7 = vsel %vm741_vm6, %v2969_v62, %v3084_v51  ;;  %v4162_v51 = vld [vmem:[#allocation79_spill] sm:$0xff] }
 0x256   :  { %v3178_v63 = vpop.permute.xlu1 %961  ;;  %v1387_v32 = vpop.permute.xlu0 %1386  ;;  %v991_v12 = vsel %vm971_vm3, %v3064_v44, %v875_v30  ;;  %vm517_vm13 = vcmp.eq.s32.totalorder %v4159_v53, 1  ;;  %vm631_vm15 = vcmp.eq.s32.totalorder %v4160_v29, 1  ;;  %vm973_vm6 = vcmp.eq.s32.totalorder %v4162_v51, 1  ;;  %v4163_v50 = vld [vmem:[#allocation95_spill] sm:$0xff]  ;;  %v4164_v51 = vld [vmem:[#allocation66_spill] sm:$0xff] }
 0x257   :  { %vm1433_vm10 = vcmp.eq.s32.totalorder %v1387_v32, 1  ;;  %1425 = vperm.xlu1 %1990, %v3007_v4   ;;  %1850 = vperm.xlu0 %1991, %v2905_v37   ;;  %v4161_v4 = vld [vmem:[#allocation50_spill] sm:$0xff]  ;;  %v189_v37 = vsel %vm169_vm5, %v2816_v8, 0.0  ;;  %v1107_v20 = vsel %vm1087_vm14, %v3095_v47, %v991_v12  ;;  %v419_v57 = vsel %vm399_vm8, %v2836_v24, %v303_v9  ;;  %v4178_v29 = vld [vmem:[#allocation15_spill] sm:$0xff] }
 0x258   :  { %v3196_v31 = vsel %vm1433_vm10, %v3154_v41, %v1337_v0  ;;  %vm743_vm0 = vcmp.eq.s32.totalorder %v4161_v4, 1  ;;  %v877_v30 = vsel %vm857_vm7, %v3024_v33, %v761_v7  ;;  %vm1089_vm1 = vcmp.eq.s32.totalorder %v4163_v50, 1  ;;  %v4166_v7 = vld [vmem:[#allocation52_spill] sm:$0xff] }
 0x259   :  { %v1223_v16 = vsel %vm1203_vm9, %v3103_v17, %v1107_v20  ;;  %vm859_vm3 = vcmp.eq.s32.totalorder %v4164_v51, 1  ;;  %vm1205_vm5 = vcmp.eq.s32.totalorder %v4165_v35, 1  ;;  %v305_v61 = vsel %vm285_vm12, %v2821_v1, %v189_v37  ;;  %v4168_v37 = vld [vmem:[#allocation97_spill] sm:$0xff]  ;;  %v4173_v35 = vld [vmem:[#allocation43_spill] sm:$0xff] }
 0x25a   :  { %v3218_v32 = vpop.permute.xlu1 %967  ;;  %v1393_v0 = vpop.permute.xlu0 %1392  ;;  %v1339_v60 = vsel %vm1319_vm11, %v3136_v39, %v1223_v16  ;;  %v993_v9 = vsel %vm973_vm6, %v3064_v44, %v877_v30  ;;  %vm1321_vm14 = vcmp.eq.s32.totalorder %v2981_v10, 1  ;;  %v763_v5 = vsel %vm743_vm0, %v2969_v62, %v3089_v36  ;;  %v4169_v30 = vld [vmem:[#allocation14_spill] sm:$0xff]  ;;  %v4171_v16 = vld [vmem:[#allocation123_spill] sm:$0xff] }
 0x25b   :  { %vm1435_vm8 = vcmp.eq.s32.totalorder %v1393_v0, 1  ;;  %1431 = vperm.xlu1 %1990, %v3051_v59   ;;  %1856 = vperm.xlu0 %1991, %v2917_v2   ;;  %vm745_vm7 = vcmp.eq.s32.totalorder %v4166_v7, 1  ;;  %v4167_v59 = vld [vmem:[#allocation81_spill] sm:$0xff]  ;;  %v1109_v2 = vsel %vm1089_vm1, %v3095_v47, %v993_v9  ;;  %v535_v54 = vsel %vm515_vm2, %v2844_v11, %v419_v57  ;;  %v4172_v0 = vld [vmem:[#allocation68_spill] sm:$0xff]  ;;  %v4174_v10 = vld [vmem:[#allocation83_spill] sm:$0xff] }
 0x25c   :  { %v3233_v46 = vsel %vm1435_vm8, %v3154_v41, %v1339_v60  ;;  %vm975_vm9 = vcmp.eq.s32.totalorder %v4167_v59, 1  ;;  %v879_v12 = vsel %vm859_vm3, %v3024_v33, %v763_v5  ;;  %vm1091_vm12 = vcmp.eq.s32.totalorder %v4168_v37, 1  ;;  %v4170_v57 = vld [vmem:[#allocation113_spill] sm:$0xff]  ;;  %v4175_v9 = vld [vmem:[#allocation99_spill] sm:$0xff] }
 0x25d   :  { %v1225_v36 = vsel %vm1205_vm5, %v3103_v17, %v1109_v2  ;;  %vm1476_vm10 = vcmp.eq.s32.totalorder %v4169_v30, 12  ;;  %vm1827_vm11 = vcmp.eq.s32.totalorder %v2199_v40, 15  ;;  %v421_v25 = vsel %vm401_vm4, %v2836_v24, %v305_v61  ;;  %v4176_v2 = vld [vmem:[#allocation115_spill] sm:$0xff] }
 0x25e   :  { %v3252_v4 = vpop.permute.xlu1 %1041  ;;  %v1399_v20 = vpop.permute.xlu0 %1398  ;;  %vm1207_vm2 = vcmp.eq.s32.totalorder %v4170_v57, 1  ;;  %v1341_v50 = vsel %vm1321_vm14, %v3136_v39, %v1225_v36  ;;  %vm861_vm6 = vcmp.eq.s32.totalorder %v4172_v0, 1  ;;  %v995_v51 = vsel %vm975_vm9, %v3064_v44, %v879_v12  ;;  %v4177_v12 = vld [vmem:[#allocation124_spill] sm:$0xff] }
 0x25f   :  { %vm1437_vm0 = vcmp.eq.s32.totalorder %v1399_v20, 1  ;;  %1505 = vperm.xlu1 %1990, %v2920_v14   ;;  %1862 = vperm.xlu0 %1991, %v4171_v16   ;;  %vm1323_vm1 = vcmp.eq.s32.totalorder %v3002_v15, 1  ;;  %vm633_vm4 = vcmp.eq.s32.totalorder %v4173_v35, 1  ;;  %v765_v14 = vsel %vm745_vm7, %v2969_v62, %v3160_v27  ;;  %v4180_v20 = vld [vmem:[#allocation54_spill] sm:$0xff] }
 0x260   :  { %v3271_v18 = vsel %vm1437_vm0, %v3154_v41, %v1341_v50  ;;  %vm977_vm3 = vcmp.eq.s32.totalorder %v4174_v10, 1  ;;  %v1111_v60 = vsel %vm1091_vm12, %v3095_v47, %v995_v51  ;;  %v537_v15 = vsel %vm517_vm13, %v2844_v11, %v421_v25  ;;  %v4182_v50 = vld [vmem:[#allocation56_spill] sm:$0xff]  ;;  %v4184_v10 = vld [vmem:[#allocation117_spill] sm:$0xff] }
 0x261   :  { %v651_v61 = vsel %vm631_vm15, %v2849_v42, %v535_v54  ;;  %vm1093_vm5 = vcmp.eq.s32.totalorder %v4175_v9, 1  ;;  %v1227_v27 = vsel %vm1207_vm2, %v3103_v17, %v1111_v60  ;;  %v881_v59 = vsel %vm861_vm6, %v3024_v33, %v765_v14  ;;  %v4179_v54 = vld [vmem:[#allocation70_spill] sm:$0xff] }
 0x262   :  { %v3292_v5 = vpop.permute.xlu1 %1047  ;;  %v1405_v7 = vpop.permute.xlu0 %1404  ;;  %vm1209_vm8 = vcmp.eq.s32.totalorder %v4176_v2, 1  ;;  %v1343_v53 = vsel %vm1323_vm1, %v3136_v39, %v1227_v27  ;;  %vm1478_vm15 = vcmp.eq.s32.totalorder %v4178_v29, 12  ;;  %vm863_vm14 = vcmp.eq.s32.totalorder %v4179_v54, 1  ;;  %v4185_v27 = vld [vmem:[#allocation87_spill] sm:$0xff] }
 0x263   :  { %vm1439_vm13 = vcmp.eq.s32.totalorder %v1405_v7, 1  ;;  %1511 = vperm.xlu1 %1990, %v4177_v12   ;;  %1868 = vperm.xlu0 %1991, %v2947_v28   ;;  %v997_v37 = vsel %vm977_vm3, %v3064_v44, %v881_v59  ;;  %vm1325_vm7 = vcmp.eq.s32.totalorder %v3037_v43, 1  ;;  %vm747_vm9 = vcmp.eq.s32.totalorder %v4180_v20, 1  ;;  %v4181_v28 = vld [vmem:[#allocation85_spill] sm:$0xff]  ;;  %v4187_v2 = vld [vmem:[#allocation103_spill] sm:$0xff] }
 0x264   :  { %v3306_v36 = vsel %vm1439_vm13, %v3154_v41, %v1343_v53  ;;  %v653_v25 = vsel %vm633_vm4, %v2849_v42, %v537_v15  ;;  %vm979_vm12 = vcmp.eq.s32.totalorder %v4181_v28, 1  ;;  %v1113_v57 = vsel %vm1093_vm5, %v3095_v47, %v997_v37  ;;  %v4183_v43 = vld [vmem:[#allocation101_spill] sm:$0xff]  ;;  %v4188_v37 = vld [vmem:[#allocation119_spill] sm:$0xff] }
 0x265   :  { %vm749_vm2 = vcmp.eq.s32.totalorder %v4182_v50, 1  ;;  %v767_v16 = vsel %vm747_vm9, %v2969_v62, %v651_v61  ;;  %vm1095_vm0 = vcmp.eq.s32.totalorder %v4183_v43, 1  ;;  %v1229_v0 = vsel %vm1209_vm8, %v3103_v17, %v1113_v57 }
 0x266   :  { %v3322_v51 = vpop.permute.xlu1 %1053  ;;  %v1411_v35 = vpop.permute.xlu0 %1410  ;;  %v883_v14 = vsel %vm863_vm14, %v3024_v33, %v767_v16  ;;  %vm1211_vm6 = vcmp.eq.s32.totalorder %v4184_v10, 1  ;;  %v1345_v60 = vsel %vm1325_vm7, %v3136_v39, %v1229_v0  ;;  %v769_v15 = vsel %vm749_vm2, %v2969_v62, %v653_v25 }
 0x267   :  { %vm1441_vm1 = vcmp.eq.s32.totalorder %v1411_v35, 1  ;;  %1517 = vperm.xlu1 %1990, %v2958_v34   ;;  %1874 = vperm.xlu0 %1991, %v2963_v58   ;;  %v999_v61 = vsel %vm979_vm12, %v3064_v44, %v883_v14  ;;  %vm1327_vm4 = vcmp.eq.s32.totalorder %v3071_v55, 1  ;;  %vm981_vm3 = vcmp.eq.s32.totalorder %v4185_v27, 1  ;;  %v4186_v58 = vld [vmem:[#allocation72_spill] sm:$0xff] }
 0x268   :  { %v3333_v9 = vsel %vm1441_vm1, %v3154_v41, %v1345_v60  ;;  %v1115_v7 = vsel %vm1095_vm0, %v3095_v47, %v999_v61  ;;  %v1492_v59 = vsel %vm1476_vm10, 1, %v4117_v38  ;;  %v1843_v34 = vsel %vm1827_vm11, 1, %v4117_v38 }
 0x269   :  { %vm865_vm5 = vcmp.eq.s32.totalorder %v4186_v58, 1  ;;  %vm1097_vm8 = vcmp.eq.s32.totalorder %v4187_v2, 1  ;;  %v1231_v55 = vsel %vm1211_vm6, %v3103_v17, %v1115_v7  ;;  %vm1829_vm13 = vcmp.eq.s32.totalorder %v2215_v48, 15 }
 0x26a   :  { %v3346_v53 = vpop.permute.xlu1 %1059  ;;  %v1417_v12 = vpop.permute.xlu0 %1416  ;;  %v885_v54 = vsel %vm865_vm5, %v3024_v33, %v769_v15  ;;  %vm1213_vm14 = vcmp.eq.s32.totalorder %v4188_v37, 1  ;;  %v1347_v20 = vsel %vm1327_vm4, %v3136_v39, %v1231_v55  ;;  %vm1329_vm11 = vcmp.eq.s32.totalorder %v3107_v49, 1 }
 0x26b   :  { %vm1443_vm10 = vcmp.eq.s32.totalorder %v1417_v12, 1  ;;  %1523 = vperm.xlu1 %1990, %v1492_v59   ;;  %1880 = vperm.xlu0 %1991, %v1843_v34   ;;  %v1001_v40 = vsel %vm981_vm3, %v3064_v44, %v885_v54  ;;  %v1494_v16 = vsel %vm1478_vm15, 1, %v4117_v38  ;;  %v1845_v43 = vsel %vm1829_vm13, 1, %v4117_v38 }
 0x26c   :  { %v3357_v25 = vsel %vm1443_vm10, %v3154_v41, %v1347_v20  ;;  %v1117_v48 = vsel %vm1097_vm8, %v3095_v47, %v1001_v40  ;;  %vm1480_vm9 = vcmp.eq.s32.totalorder %v2208_v45, 12  ;;  %vm1831_vm12 = vcmp.eq.s32.totalorder %v2232_v56, 15 }
 0x26d   :  { %v1233_v28 = vsel %vm1213_vm14, %v3103_v17, %v1117_v48  ;;  %v1496_v10 = vsel %vm1480_vm9, 1, %v4117_v38  ;;  %v1847_v60 = vsel %vm1831_vm12, 1, %v4117_v38  ;;  %vm1482_vm2 = vcmp.eq.s32.totalorder %v2223_v52, 12 }
 0x26e   :  { %v3361_v57 = vpop.permute.xlu1 %1065  ;;  %v1423_v50 = vpop.permute.xlu0 %1422  ;;  %v1349_v0 = vsel %vm1329_vm11, %v3136_v39, %v1233_v28  ;;  %v4189_v61 = vsub.s32 4, %v2788_v19  ;;  %v1498_v59 = vsel %vm1482_vm2, 1, %v4117_v38  ;;  %vm1484_vm6 = vcmp.eq.s32.totalorder %v2278_v21, 12 }
 0x26f   :  { %vm1445_vm7 = vcmp.eq.s32.totalorder %v1423_v50, 1  ;;  %1529 = vperm.xlu1 %1990, %v1494_v16   ;;  %1886 = vperm.xlu0 %1991, %v1845_v43   ;;  %v1500_v2 = vsel %vm1484_vm6, 1, %v4117_v38  ;;  %vm1592_vm10 = vcmp.eq.s32.totalorder %v4169_v30, 13  ;;  %vm1596_vm12 = vcmp.eq.s32.totalorder %v2208_v45, 13 }
 0x270   :  { %v1465_v49 = vsel %vm1445_vm7, %v3154_v41, %v1349_v0  ;;  %v3381_v56 = vrot.slane %v3067_v23, %v4189_v61  ;;  %v4193_v23 = vld [vmem:[#allocation11_spill] sm:$0xff]  ;;  %vm1594_vm7 = vcmp.eq.s32.totalorder %v4178_v29, 13  ;;  %vm1598_vm2 = vcmp.eq.s32.totalorder %v2223_v52, 13 }
 0x271   :  { %vm1586_vm4 = vcmp.eq.s32.totalorder %v4193_v23, 13  ;;  %vm1702_vm6 = vcmp.eq.s32.totalorder %v4193_v23, 14 }
 0x272   :  { %v3371_v35 = vpop.permute.xlu1 %1071  ;;  %v1429_v14 = vpop.permute.xlu0 %1428  ;;  %4190 = vst [vmem:[#allocation46_spill] sm:$0xff] %v3381_v56  ;;  %v1602_v37 = vsel %vm1586_vm4, 1, %v4117_v38 }
 0x273   :  { %vm1447_vm15 = vcmp.eq.s32.totalorder %v1429_v14, 1  ;;  %1535 = vperm.xlu1 %1990, %v1496_v10   ;;  %1892 = vperm.xlu0 %1991, %v1847_v60   ;;  %v1608_v60 = vsel %vm1592_vm10, 1, %v4117_v38 }
 0x274   :  { %v1467_v15 = vsel %vm1447_vm15, %v3154_v41, %v3149_v3 }
 0x276   :  { %v3383_v27 = vpop.permute.xlu1 %1077  ;;  %v1503_v7 = vpop.permute.xlu0 %1502 }
 0x277   :  { %4191 = vst [vmem:[#allocation58_spill] sm:$0xff] %v3383_v27  ;;  %vm1549_vm0 = vcmp.eq.s32.totalorder %v1503_v7, 1  ;;  %1541 = vperm.xlu1 %1990, %v1498_v59   ;;  %v1610_v59 = vsel %vm1594_vm7, 1, %v4117_v38  ;;  %v4249_v27 = vld [vmem:[#allocation125_spill] sm:$0xff] }
 0x278   :  { %v3389_v34 = vsel %vm1549_vm0, %v3381_v56, %v3196_v31  ;;  %v4195_v31 = vld [vmem:[#allocation12_spill] sm:$0xff]  ;;  %vm1600_vm0 = vcmp.eq.s32.totalorder %v2278_v21, 13 }
 0x279   :  { %4192 = vst [vmem:[#allocation57_spill] sm:$0xff] %v3389_v34  ;;  %vm1588_vm5 = vcmp.eq.s32.totalorder %v4195_v31, 13 }
 0x27a   :  { %v3391_v58 = vpop.permute.xlu1 %1083  ;;  %v1509_v3 = vpop.permute.xlu0 %1508  ;;  %v1604_v28 = vsel %vm1588_vm5, 1, %v4117_v38  ;;  %vm1710_vm5 = vcmp.eq.s32.totalorder %v4178_v29, 14 }
 0x27b   :  { %vm1551_vm1 = vcmp.eq.s32.totalorder %v1509_v3, 1  ;;  %1547 = vperm.xlu1 %1990, %v1500_v2  }
 0x27c   :  { %v3397_v55 = vsel %vm1551_vm1, %v3381_v56, %v3233_v46  ;;  %v4197_v46 = vld [vmem:[#allocation13_spill] sm:$0xff]  ;;  %vm1704_vm1 = vcmp.eq.s32.totalorder %v4195_v31, 14 }
 0x27d   :  { %4194 = vst [vmem:[#allocation89_spill] sm:$0xff] %v3397_v55  ;;  %vm1590_vm13 = vcmp.eq.s32.totalorder %v4197_v46, 13  ;;  %vm1706_vm4 = vcmp.eq.s32.totalorder %v4197_v46, 14 }
 0x27e   :  { %v3399_v12 = vpop.permute.xlu1 %1157  ;;  %v1515_v54 = vpop.permute.xlu0 %1514  ;;  %v1606_v0 = vsel %vm1590_vm13, 1, %v4117_v38  ;;  %vm1820_vm13 = vcmp.eq.s32.totalorder %v4195_v31, 15 }
 0x27f   :  { %vm1553_vm3 = vcmp.eq.s32.totalorder %v1515_v54, 1  ;;  %1621 = vperm.xlu1 %1990, %v1602_v37   ;;  %v1612_v54 = vsel %vm1596_vm12, 1, %v4117_v38 }
 0x280   :  { %v3405_v20 = vsel %vm1553_vm3, %v3381_v56, %v3271_v18  ;;  %vm1708_vm3 = vcmp.eq.s32.totalorder %v4169_v30, 14 }
 0x281   :  { %4196 = vst [vmem:[#allocation60_spill] sm:$0xff] %v3405_v20  ;;  %v4219_v20 = vld [vmem:[#allocation25_spill] sm:$0xff] }
 0x282   :  { %v3407_v40 = vpop.permute.xlu1 %1163  ;;  %v1521_v48 = vpop.permute.xlu0 %1520 }
 0x283   :  { %vm1555_vm8 = vcmp.eq.s32.totalorder %v1521_v48, 1  ;;  %1627 = vperm.xlu1 %1990, %v1604_v28   ;;  %v1614_v28 = vsel %vm1598_vm2, 1, %v4117_v38  ;;  %vm1828_vm2 = vcmp.eq.s32.totalorder %v2208_v45, 15 }
 0x284   :  { %v3413_v50 = vsel %vm1555_vm8, %v3381_v56, %v3306_v36  ;;  %vm1818_vm8 = vcmp.eq.s32.totalorder %v4193_v23, 15 }
 0x285   :  { %4198 = vst [vmem:[#allocation74_spill] sm:$0xff] %v3413_v50 }
 0x286   :  { %v3415_v16 = vpop.permute.xlu1 %1169  ;;  %v1527_v43 = vpop.permute.xlu0 %1526 }
 0x287   :  { %vm1557_vm14 = vcmp.eq.s32.totalorder %v1527_v43, 1  ;;  %1633 = vperm.xlu1 %1990, %v1606_v0   ;;  %v1616_v0 = vsel %vm1600_vm0, 1, %v4117_v38 }
 0x288   :  { %v3421_v18 = vsel %vm1557_vm14, %v3381_v56, %v3333_v9  ;;  %vm1822_vm14 = vcmp.eq.s32.totalorder %v4197_v46, 15  ;;  %v3486_v46 = vsel %vm1820_vm13, 1, %v4117_v38  ;;  %vm508_vm13 = vcmp.eq.s32.totalorder %v4219_v20, 1 }
 0x289   :  { %4199 = vst [vmem:[#allocation105_spill] sm:$0xff] %v3421_v18  ;;  %v4214_v18 = vld [vmem:[#allocation23_spill] sm:$0xff] }
 0x28a   :  { %v3423_v14 = vpop.permute.xlu1 %1175  ;;  %v1533_v10 = vpop.permute.xlu0 %1532 }
 0x28b   :  { %vm1559_vm11 = vcmp.eq.s32.totalorder %v1533_v10, 1  ;;  %1639 = vperm.xlu1 %1990, %v1608_v60   ;;  %v1718_v60 = vsel %vm1702_vm6, 1, %v4117_v38  ;;  %vm1714_vm6 = vcmp.eq.s32.totalorder %v2223_v52, 14 }
 0x28c   :  { %v3429_v36 = vsel %vm1559_vm11, %v3381_v56, %v3357_v25  ;;  %vm1824_vm11 = vcmp.eq.s32.totalorder %v4169_v30, 15  ;;  %v3492_v30 = vsel %vm1822_vm14, 1, %v4117_v38 }
 0x28d   :  { %4200 = vst [vmem:[#allocation48_spill] sm:$0xff] %v3429_v36 }
 0x28e   :  { %v3431_v61 = vpop.permute.xlu1 %1181  ;;  %v1539_v7 = vpop.permute.xlu0 %1538 }
 0x28f   :  { %vm1561_vm9 = vcmp.eq.s32.totalorder %v1539_v7, 1  ;;  %1645 = vperm.xlu1 %1990, %v1610_v59   ;;  %v1720_v7 = vsel %vm1704_vm1, 1, %v4117_v38  ;;  %v1722_v59 = vsel %vm1706_vm4, 1, %v4117_v38 }
 0x290   :  { %v3436_v9 = vsel %vm1561_vm9, %v3381_v56, %v1465_v49  ;;  %vm1826_vm9 = vcmp.eq.s32.totalorder %v4178_v29, 15 }
 0x291   :  { %4201 = vst [vmem:[#allocation121_spill] sm:$0xff] %v3436_v9  ;;  %v3499_v9 = vsel %vm1824_vm11, 1, %v4117_v38  ;;  %v3505_v36 = vsel %vm1826_vm9, 1, %v4117_v38 }
 0x292   :  { %v3438_v3 = vpop.permute.xlu1 %1187  ;;  %v1545_v2 = vpop.permute.xlu0 %1544 }
 0x293   :  { %vm1563_vm15 = vcmp.eq.s32.totalorder %v1545_v2, 1  ;;  %1651 = vperm.xlu1 %1990, %v1612_v54   ;;  %v4207_v2 = vld [vmem:[#allocation17_spill] sm:$0xff]  ;;  %v1724_v54 = vsel %vm1708_vm3, 1, %v4117_v38  ;;  %vm276_vm3 = vcmp.eq.s32.totalorder %v4214_v18, 1  ;;  %v3525_v18 = vsel %vm1714_vm6, 1, %v4117_v38 }
 0x294   :  { %v3443_v25 = vsel %vm1563_vm15, %v3381_v56, %v1467_v15  ;;  %vm158_vm10 = vcmp.eq.s32.totalorder %v4207_v2, 1  ;;  %v4210_v2 = vld [vmem:[#allocation19_spill] sm:$0xff]  ;;  %vm1712_vm15 = vcmp.eq.s32.totalorder %v2208_v45, 14 }
 0x295   :  { %4202 = vst [vmem:[#allocation30_spill] sm:$0xff] %v3443_v25  ;;  %vm390_vm12 = vcmp.eq.s32.totalorder %v4210_v2, 1  ;;  %v4211_v25 = vld [vmem:[#allocation20_spill] sm:$0xff]  ;;  %v4212_v2 = vld [vmem:[#allocation21_spill] sm:$0xff]  ;;  %v3514_v56 = vsel %vm1712_vm15, 1, %v4117_v38 }
 0x296   :  { %v3445_v37 = vpop.permute.xlu1 %1193  ;;  %v3447_v48 = vpop.permute.xlu0 %1618  ;;  %vm506_vm0 = vcmp.eq.s32.totalorder %v4211_v25, 1  ;;  %vm622_vm1 = vcmp.eq.s32.totalorder %v4212_v2, 1 }
 0x297   :  { %4203 = vst [vmem:[#allocation59_spill] sm:$0xff] %v3445_v37  ;;  %4204 = vst [vmem:[#allocation76_spill] sm:$0xff] %v3447_v48  ;;  %1657 = vperm.xlu1 %1990, %v1614_v28   ;;  %v3474_v28 = vsel %vm1710_vm5, 1, %v4117_v38  ;;  %v4239_v48 = vld [vmem:[#allocation61_spill] sm:$0xff]  ;;  %v4240_v37 = vld [vmem:[#allocation84_spill] sm:$0xff] }
 0x29a   :  { %v3451_v49 = vpop.permute.xlu1 %1199  ;;  %v3453_v43 = vpop.permute.xlu0 %1624 }
 0x29b   :  { %4205 = vst [vmem:[#allocation91_spill] sm:$0xff] %v3453_v43  ;;  %1663 = vperm.xlu1 %1990, %v1616_v0   ;;  %v4208_v0 = vld [vmem:[#allocation18_spill] sm:$0xff] }
 0x29c   :  { %vm274_vm7 = vcmp.eq.s32.totalorder %v4208_v0, 1  ;;  %v178_v0 = vsel %vm158_vm10, %v2816_v8, 0.0  ;;  %v4224_v43 = vld [vmem:[#allocation38_spill] sm:$0xff] }
 0x29d   :  { %v294_v29 = vsel %vm274_vm7, %v2821_v1, %v178_v0  ;;  %v3517_v0 = vsel %vm1828_vm2, 1, %v4117_v38  ;;  %vm1716_vm7 = vcmp.eq.s32.totalorder %v2278_v21, 14  ;;  %v4228_v21 = vld [vmem:[#allocation47_spill] sm:$0xff] }
 0x29e   :  { %v3459_v15 = vpop.permute.xlu1 %1273  ;;  %v3461_v10 = vpop.permute.xlu0 %1630  ;;  %v410_v45 = vsel %vm390_vm12, %v2836_v24, %v294_v29  ;;  %4216 = vst [vmem:[#allocation32_spill] sm:$0xff] %v3517_v0  ;;  %vm164_vm12 = vcmp.eq.s32.totalorder %v4224_v43, 1  ;;  %v3555_v43 = vsel %vm1716_vm7, 1, %v4117_v38  ;;  %vm404_vm7 = vcmp.eq.s32.totalorder %v4240_v37, 1 }
 0x29f   :  { %4206 = vst [vmem:[#allocation34_spill] sm:$0xff] %v3461_v10  ;;  %1737 = vperm.xlu1 %1990, %v1718_v60   ;;  %v3483_v60 = vsel %vm1818_vm8, 1, %v4117_v38  ;;  %v526_v2 = vsel %vm506_vm0, %v2844_v11, %v410_v45  ;;  %v4220_v10 = vld [vmem:[#allocation29_spill] sm:$0xff]  ;;  %vm166_vm0 = vcmp.eq.s32.totalorder %v4228_v21, 1 }
 0x2a0   :  { %v3528_v29 = vsel %vm622_vm1, %v2849_v42, %v526_v2  ;;  %vm278_vm14 = vcmp.eq.s32.totalorder %v4220_v10, 1  ;;  %v4223_v2 = vld [vmem:[#allocation33_spill] sm:$0xff]  ;;  %v186_v0 = vsel %vm166_vm0, %v2816_v8, 0.0 }
 0x2a1   :  { %vm510_vm9 = vcmp.eq.s32.totalorder %v4223_v2, 1 }
 0x2a2   :  { %v3478_v23 = vpop.permute.xlu1 %1279  ;;  %v3480_v31 = vpop.permute.xlu0 %1636 }
 0x2a3   :  { %4209 = vst [vmem:[#allocation62_spill] sm:$0xff] %v3480_v31  ;;  %1743 = vperm.xlu1 %1990, %v1720_v7   ;;  %v4213_v7 = vld [vmem:[#allocation22_spill] sm:$0xff]  ;;  %v4218_v31 = vld [vmem:[#allocation27_spill] sm:$0xff] }
 0x2a4   :  { %vm160_vm4 = vcmp.eq.s32.totalorder %v4213_v7, 1  ;;  %v4217_v7 = vld [vmem:[#allocation24_spill] sm:$0xff]  ;;  %vm162_vm8 = vcmp.eq.s32.totalorder %v4218_v31, 1  ;;  %v4222_v31 = vld [vmem:[#allocation31_spill] sm:$0xff] }
 0x2a5   :  { %vm392_vm5 = vcmp.eq.s32.totalorder %v4217_v7, 1  ;;  %v4221_v7 = vld [vmem:[#allocation26_spill] sm:$0xff]  ;;  %vm394_vm11 = vcmp.eq.s32.totalorder %v4222_v31, 1  ;;  %v182_v55 = vsel %vm162_vm8, %v2816_v8, 0.0  ;;  %v4227_v31 = vld [vmem:[#allocation39_spill] sm:$0xff] }
 0x2a6   :  { %v3509_v50 = vpop.permute.xlu1 %1285  ;;  %v3511_v25 = vpop.permute.xlu0 %1642  ;;  %vm624_vm10 = vcmp.eq.s32.totalorder %v4221_v7, 1  ;;  %v4226_v7 = vld [vmem:[#allocation35_spill] sm:$0xff]  ;;  %vm280_vm2 = vcmp.eq.s32.totalorder %v4227_v31, 1  ;;  %v4231_v31 = vld [vmem:[#allocation42_spill] sm:$0xff] }
 0x2a7   :  { %4215 = vst [vmem:[#allocation107_spill] sm:$0xff] %v3511_v25  ;;  %1749 = vperm.xlu1 %1990, %v1722_v59   ;;  %v180_v25 = vsel %vm160_vm4, %v2816_v8, 0.0  ;;  %vm626_vm15 = vcmp.eq.s32.totalorder %v4226_v7, 1  ;;  %v4230_v7 = vld [vmem:[#allocation49_spill] sm:$0xff]  ;;  %vm512_vm4 = vcmp.eq.s32.totalorder %v4231_v31, 1  ;;  %v4237_v31 = vld [vmem:[#allocation55_spill] sm:$0xff] }
 0x2a8   :  { %v296_v45 = vsel %vm276_vm3, %v2821_v1, %v180_v25  ;;  %v298_v25 = vsel %vm278_vm14, %v2821_v1, %v182_v55  ;;  %v4229_v55 = vld [vmem:[#allocation40_spill] sm:$0xff]  ;;  %vm282_vm1 = vcmp.eq.s32.totalorder %v4230_v7, 1  ;;  %vm630_vm14 = vcmp.eq.s32.totalorder %v4237_v31, 1 }
 0x2a9   :  { %v412_v59 = vsel %vm392_vm5, %v2836_v24, %v296_v45  ;;  %v414_v2 = vsel %vm394_vm11, %v2836_v24, %v298_v25  ;;  %vm396_vm6 = vcmp.eq.s32.totalorder %v4229_v55, 1  ;;  %v4232_v25 = vld [vmem:[#allocation51_spill] sm:$0xff]  ;;  %v4235_v55 = vld [vmem:[#allocation53_spill] sm:$0xff]  ;;  %v4236_v7 = vld [vmem:[#allocation80_spill] sm:$0xff]  ;;  %vm168_vm11 = vcmp.eq.s32.totalorder %v4239_v48, 1 }
 0x2aa   :  { %v3541_v34 = vpop.permute.xlu1 %1291  ;;  %v3543_v20 = vpop.permute.xlu0 %1648  ;;  %v528_v10 = vsel %vm508_vm13, %v2844_v11, %v412_v59  ;;  %v184_v59 = vsel %vm164_vm12, %v2816_v8, 0.0  ;;  %vm398_vm3 = vcmp.eq.s32.totalorder %v4232_v25, 1  ;;  %vm514_vm8 = vcmp.eq.s32.totalorder %v4235_v55, 1  ;;  %v4238_v25 = vld [vmem:[#allocation82_spill] sm:$0xff]  ;;  %v4244_v48 = vld [vmem:[#allocation92_spill] sm:$0xff] }
 0x2ab   :  { %4225 = vst [vmem:[#allocation78_spill] sm:$0xff] %v3543_v20  ;;  %1755 = vperm.xlu1 %1990, %v1724_v54   ;;  %v3550_v45 = vsel %vm624_vm10, %v2849_v42, %v528_v10  ;;  %v530_v20 = vsel %vm510_vm9, %v2844_v11, %v414_v2  ;;  %v300_v10 = vsel %vm280_vm2, %v2821_v1, %v184_v59  ;;  %v4234_v2 = vld [vmem:[#allocation44_spill] sm:$0xff]  ;;  %vm172_vm13 = vcmp.eq.s32.totalorder %v4236_v7, 1 }
 0x2ac   :  { %v3562_v54 = vsel %vm626_vm15, %v2849_v42, %v530_v20  ;;  %vm628_vm5 = vcmp.eq.s32.totalorder %v4234_v2, 1  ;;  %v416_v20 = vsel %vm396_vm6, %v2836_v24, %v300_v10  ;;  %v302_v59 = vsel %vm282_vm1, %v2821_v1, %v186_v0  ;;  %v4241_v0 = vld [vmem:[#allocation86_spill] sm:$0xff] }
 0x2ad   :  { %vm288_vm10 = vcmp.eq.s32.totalorder %v4238_v25, 1  ;;  %v418_v2 = vsel %vm398_vm3, %v2836_v24, %v302_v59  ;;  %v192_v10 = vsel %vm172_vm13, %v2816_v8, 0.0  ;;  %vm520_vm9 = vcmp.eq.s32.totalorder %v4241_v0, 1  ;;  %v4243_v59 = vld [vmem:[#allocation63_spill] sm:$0xff]  ;;  %v4245_v25 = vld [vmem:[#allocation65_spill] sm:$0xff]  ;;  %v4246_v0 = vld [vmem:[#allocation108_spill] sm:$0xff] }
 0x2ae   :  { %v3567_v21 = vpop.permute.xlu1 %1297  ;;  %v3569_v38 = vpop.permute.xlu0 %1654  ;;  %vm284_vm12 = vcmp.eq.s32.totalorder %v4243_v59, 1  ;;  %v308_v37 = vsel %vm288_vm10, %v2821_v1, %v192_v10  ;;  %vm636_vm15 = vcmp.eq.s32.totalorder %v4244_v48, 1  ;;  %vm400_vm2 = vcmp.eq.s32.totalorder %v4245_v25, 1  ;;  %v4250_v48 = vld [vmem:[#allocation94_spill] sm:$0xff] }
 0x2af   :  { %4233 = vst [vmem:[#allocation36_spill] sm:$0xff] %v3569_v38  ;;  %1761 = vperm.xlu1 %1990, %v3474_v28   ;;  %v532_v38 = vsel %vm512_vm4, %v2844_v11, %v416_v20  ;;  %v534_v28 = vsel %vm514_vm8, %v2844_v11, %v418_v2  ;;  %v424_v2 = vsel %vm404_vm7, %v2836_v24, %v308_v37  ;;  %vm752_vm0 = vcmp.eq.s32.totalorder %v4246_v0, 1 }
 0x2b0   :  { %v3585_v55 = vsel %vm628_vm5, %v2849_v42, %v532_v38  ;;  %v3595_v20 = vsel %vm630_vm14, %v2849_v42, %v534_v28  ;;  %v188_v38 = vsel %vm168_vm11, %v2816_v8, 0.0  ;;  %v4248_v28 = vld [vmem:[#allocation71_spill] sm:$0xff]  ;;  %v540_v59 = vsel %vm520_vm9, %v2844_v11, %v424_v2  ;;  %v4252_v2 = vld [vmem:[#allocation73_spill] sm:$0xff] }
 0x2b1   :  { %vm170_vm1 = vcmp.eq.s32.totalorder %v4248_v28, 1  ;;  %vm868_vm4 = vcmp.eq.s32.totalorder %v4249_v27, 1  ;;  %v304_v10 = vsel %vm284_vm12, %v2821_v1, %v188_v38  ;;  %vm738_vm3 = vcmp.eq.s32.totalorder %v4250_v48, 1  ;;  %v4251_v28 = vld [vmem:[#allocation110_spill] sm:$0xff] }
 0x2b2   :  { %v3590_v7 = vpop.permute.xlu1 %1303  ;;  %v3592_v31 = vpop.permute.xlu0 %1660  ;;  %vm984_vm5 = vcmp.eq.s32.totalorder %v3218_v32, 1  ;;  %vm854_vm8 = vcmp.eq.s32.totalorder %v4251_v28, 1  ;;  %vm1100_vm13 = vcmp.eq.s32.totalorder %v3391_v58, 1  ;;  %v190_v38 = vsel %vm170_vm1, %v2816_v8, 0.0  ;;  %v4255_v28 = vld [vmem:[#allocation75_spill] sm:$0xff] }
 0x2b3   :  { %4242 = vst [vmem:[#allocation69_spill] sm:$0xff] %v3592_v31  ;;  %1767 = vperm.xlu1 %1990, %v3514_v56   ;;  %v4247_v31 = vld [vmem:[#allocation67_spill] sm:$0xff]  ;;  %v656_v56 = vsel %vm636_vm15, %v2849_v42, %v540_v59  ;;  %vm1216_vm14 = vcmp.eq.s32.totalorder %v3451_v49, 1  ;;  %vm286_vm10 = vcmp.eq.s32.totalorder %v4252_v2, 1  ;;  %v758_v59 = vsel %vm738_vm3, %v2969_v62, %v3528_v29  ;;  %v4254_v49 = vld [vmem:[#allocation112_spill] sm:$0xff] }
 0x2b4   :  { %vm516_vm6 = vcmp.eq.s32.totalorder %v4247_v31, 1  ;;  %v420_v31 = vsel %vm400_vm2, %v2836_v24, %v304_v10  ;;  %v772_v0 = vsel %vm752_vm0, %v2969_v62, %v656_v56  ;;  %vm970_vm11 = vcmp.eq.s32.totalorder %v2979_v22, 1  ;;  %v4253_v10 = vld [vmem:[#allocation96_spill] sm:$0xff] }
 0x2b5   :  { %v3623_v27 = vsel %vm516_vm6, %v2844_v11, %v420_v31  ;;  %v888_v32 = vsel %vm868_vm4, %v3024_v33, %v772_v0  ;;  %vm740_vm7 = vcmp.eq.s32.totalorder %v4253_v10, 1  ;;  %vm1086_vm9 = vcmp.eq.s32.totalorder %v3252_v4, 1  ;;  %v4258_v10 = vld [vmem:[#allocation77_spill] sm:$0xff] }
 0x2b6   :  { %v3613_v25 = vpop.permute.xlu1 %1309  ;;  %v3615_v37 = vpop.permute.xlu0 %1734  ;;  %v1004_v58 = vsel %vm984_vm5, %v3064_v44, %v888_v32  ;;  %vm856_vm12 = vcmp.eq.s32.totalorder %v4254_v49, 1  ;;  %vm1202_vm15 = vcmp.eq.s32.totalorder %v3399_v12, 1  ;;  %v306_v22 = vsel %vm286_vm10, %v2821_v1, %v190_v38  ;;  %v4260_v49 = vld [vmem:[#allocation116_spill] sm:$0xff] }
 0x2b7   :  { %1773 = vperm.xlu1 %1990, %v3525_v18   ;;  %v874_v18 = vsel %vm854_vm8, %v3024_v33, %v758_v59  ;;  %v1120_v8 = vsel %vm1100_vm13, %v3095_v47, %v1004_v58  ;;  %vm1318_vm0 = vcmp.eq.s32.totalorder %v3459_v15, 1  ;;  %vm402_vm6 = vcmp.eq.s32.totalorder %v4255_v28, 1  ;;  %v4257_v59 = vld [vmem:[#allocation114_spill] sm:$0xff] }
 0x2b8   :  { %v1236_v29 = vsel %vm1216_vm14, %v3103_v17, %v1120_v8  ;;  %v990_v31 = vsel %vm970_vm11, %v3064_v44, %v874_v18  ;;  %v760_v12 = vsel %vm740_vm7, %v2969_v62, %v3550_v45  ;;  %vm972_vm1 = vcmp.eq.s32.totalorder %v3000_v26, 1 }
 0x2b9   :  { %v1106_v1 = vsel %vm1086_vm9, %v3095_v47, %v990_v31  ;;  %v876_v15 = vsel %vm856_vm12, %v3024_v33, %v760_v12  ;;  %vm1088_vm3 = vcmp.eq.s32.totalorder %v3292_v5, 1  ;;  %vm858_vm5 = vcmp.eq.s32.totalorder %v4257_v59, 1 }
 0x2ba   :  { %v1316_v56 = vpop.permute.xlu1 %1315  ;;  %v3637_v48 = vpop.permute.xlu0 %1740  ;;  %v1222_v38 = vsel %vm1202_vm15, %v3103_v17, %v1106_v1  ;;  %vm1204_vm8 = vcmp.eq.s32.totalorder %v3407_v40, 1  ;;  %v422_v4 = vsel %vm402_vm6, %v2836_v24, %v306_v22  ;;  %v992_v45 = vsel %vm972_vm1, %v3064_v44, %v876_v15  ;;  %v4261_v22 = vld [vmem:[#allocation88_spill] sm:$0xff]  ;;  %v4263_v1 = vld [vmem:[#allocation118_spill] sm:$0xff] }
 0x2bb   :  { %vm1332_vm2 = vcmp.eq.s32.totalorder %v1316_v56, 1  ;;  %1779 = vperm.xlu1 %1990, %v3555_v43   ;;  %v4256_v43 = vld [vmem:[#allocation98_spill] sm:$0xff]  ;;  %v1338_v26 = vsel %vm1318_vm0, %v3136_v39, %v1222_v38  ;;  %vm1320_vm14 = vcmp.eq.s32.totalorder %v3478_v23, 1  ;;  %vm518_vm10 = vcmp.eq.s32.totalorder %v4258_v10, 1  ;;  %v4265_v38 = vld [vmem:[#allocation45_spill] sm:$0xff] }
 0x2bc   :  { %v3647_v0 = vsel %vm1332_vm2, %v3136_v39, %v1236_v29  ;;  %vm742_vm4 = vcmp.eq.s32.totalorder %v4256_v43, 1  ;;  %vm974_vm11 = vcmp.eq.s32.totalorder %v3035_v6, 1  ;;  %v1108_v24 = vsel %vm1088_vm3, %v3095_v47, %v992_v45  ;;  %v4264_v15 = vld [vmem:[#allocation90_spill] sm:$0xff] }
 0x2bd   :  { %v762_v40 = vsel %vm742_vm4, %v2969_v62, %v3562_v54  ;;  %vm1090_vm9 = vcmp.eq.s32.totalorder %v3322_v51, 1  ;;  %v1224_v18 = vsel %vm1204_vm8, %v3103_v17, %v1108_v24  ;;  %vm860_vm12 = vcmp.eq.s32.totalorder %v4260_v49, 1  ;;  %v4268_v24 = vld [vmem:[#allocation106_spill] sm:$0xff] }
 0x2be   :  { %v1390_v32 = vpop.permute.xlu1 %1389  ;;  %v3662_v2 = vpop.permute.xlu0 %1746  ;;  %v878_v23 = vsel %vm858_vm5, %v3024_v33, %v762_v40  ;;  %vm1206_vm15 = vcmp.eq.s32.totalorder %v3415_v16, 1  ;;  %v1340_v6 = vsel %vm1320_vm14, %v3136_v39, %v1224_v18  ;;  %v538_v5 = vsel %vm518_vm10, %v2844_v11, %v422_v4  ;;  %v4267_v4 = vld [vmem:[#allocation120_spill] sm:$0xff] }
 0x2bf   :  { %vm1434_vm13 = vcmp.eq.s32.totalorder %v1390_v32, 1  ;;  %1853 = vperm.xlu1 %1990, %v3483_v60   ;;  %v4259_v60 = vld [vmem:[#allocation100_spill] sm:$0xff]  ;;  %v994_v54 = vsel %vm974_vm11, %v3064_v44, %v878_v23  ;;  %vm1322_vm0 = vcmp.eq.s32.totalorder %v3509_v50, 1  ;;  %vm632_vm6 = vcmp.eq.s32.totalorder %v4261_v22, 1 }
 0x2c0   :  { %v3672_v58 = vsel %vm1434_vm13, %v3154_v41, %v1338_v26  ;;  %vm744_vm7 = vcmp.eq.s32.totalorder %v4259_v60, 1  ;;  %vm976_vm1 = vcmp.eq.s32.totalorder %v3069_v13, 1  ;;  %v1110_v11 = vsel %vm1090_vm9, %v3095_v47, %v994_v54  ;;  %v4269_v60 = vld [vmem:[#allocation28_spill] sm:$0xff] }
 0x2c1   :  { %v764_v16 = vsel %vm744_vm7, %v2969_v62, %v3585_v55  ;;  %vm1092_vm3 = vcmp.eq.s32.totalorder %v3346_v53, 1  ;;  %v1226_v31 = vsel %vm1206_vm15, %v3103_v17, %v1110_v11  ;;  %vm862_vm5 = vcmp.eq.s32.totalorder %v4263_v1, 1 }
 0x2c2   :  { %v1396_v8 = vpop.permute.xlu1 %1395  ;;  %v3687_v56 = vpop.permute.xlu0 %1752  ;;  %v880_v50 = vsel %vm860_vm12, %v3024_v33, %v764_v16  ;;  %vm1208_vm8 = vcmp.eq.s32.totalorder %v3423_v14, 1  ;;  %v1342_v13 = vsel %vm1322_vm0, %v3136_v39, %v1226_v31  ;;  %v652_v51 = vsel %vm632_vm6, %v2849_v42, %v3623_v27  ;;  %v4266_v27 = vld [vmem:[#allocation104_spill] sm:$0xff] }
 0x2c3   :  { %vm1436_vm2 = vcmp.eq.s32.totalorder %v1396_v8, 1  ;;  %1859 = vperm.xlu1 %1990, %v3486_v46   ;;  %v4262_v46 = vld [vmem:[#allocation102_spill] sm:$0xff]  ;;  %v996_v55 = vsel %vm976_vm1, %v3064_v44, %v880_v50  ;;  %vm1324_vm14 = vcmp.eq.s32.totalorder %v3541_v34, 1  ;;  %vm634_vm10 = vcmp.eq.s32.totalorder %v4264_v15, 1  ;;  %v4275_v50 = vld [vmem:[#allocation76_spill] sm:$0xff] }
 0x2c4   :  { %v3697_v29 = vsel %vm1436_vm2, %v3154_v41, %v1340_v6  ;;  %vm746_vm4 = vcmp.eq.s32.totalorder %v4262_v46, 1  ;;  %vm978_vm11 = vcmp.eq.s32.totalorder %v4265_v38, 1  ;;  %vm748_vm7 = vcmp.eq.s32.totalorder %v4266_v27, 1  ;;  %v4274_v46 = vld [vmem:[#allocation59_spill] sm:$0xff]  ;;  %v4279_v38 = vld [vmem:[#allocation57_spill] sm:$0xff] }
 0x2c5   :  { %v766_v14 = vsel %vm746_vm4, %v2969_v62, %v3595_v20  ;;  %vm1094_vm9 = vcmp.eq.s32.totalorder %v3361_v57, 1  ;;  %vm864_vm12 = vcmp.eq.s32.totalorder %v4267_v4, 1  ;;  %vm1210_vm15 = vcmp.eq.s32.totalorder %v3431_v61, 1 }
 0x2c6   :  { %v1402_v28 = vpop.permute.xlu1 %1401  ;;  %v3712_v12 = vpop.permute.xlu0 %1758  ;;  %v882_v34 = vsel %vm862_vm5, %v3024_v33, %v766_v14  ;;  %v654_v53 = vsel %vm634_vm10, %v2849_v42, %v538_v5  ;;  %vm1326_vm0 = vcmp.eq.s32.totalorder %v3567_v21, 1  ;;  %v768_v40 = vsel %vm748_vm7, %v2969_v62, %v652_v51  ;;  %v4270_v42 = vld [vmem:[#allocation122_spill] sm:$0xff] }
 0x2c7   :  { %vm1438_vm13 = vcmp.eq.s32.totalorder %v1402_v28, 1  ;;  %1865 = vperm.xlu1 %1990, %v3492_v30   ;;  %v1112_v30 = vsel %vm1092_vm3, %v3095_v47, %v996_v55  ;;  %v998_v45 = vsel %vm978_vm11, %v3064_v44, %v882_v34  ;;  %vm750_vm6 = vcmp.eq.s32.totalorder %v4268_v24, 1  ;;  %v1992_v5 = vld [vmem:[#allocation5 + $0x8] sm:$0xff]  ;;  %v4276_v28 = vld [vmem:[#allocation32_spill] sm:$0xff] }
 0x2c8   :  { %v3723_v43 = vsel %vm1438_vm13, %v3154_v41, %v1342_v13  ;;  %v1228_v32 = vsel %vm1208_vm8, %v3103_v17, %v1112_v30  ;;  %vm980_vm1 = vcmp.eq.s32.totalorder %v4269_v60, 1  ;;  %v1114_v61 = vsel %vm1094_vm9, %v3095_v47, %v998_v45  ;;  %v4280_v30 = vld [vmem:[#allocation91_spill] sm:$0xff]  ;;  %v4281_v34 = vld [vmem:[#allocation16_spill] sm:$0xff]  ;;  %v4283_v45 = vld [vmem:[#allocation34_spill] sm:$0xff] }
 0x2c9   :  { %v1344_v20 = vsel %vm1324_vm14, %v3136_v39, %v1228_v32  ;;  %vm866_vm4 = vcmp.eq.s32.totalorder %v4270_v42, 1  ;;  %vm1096_vm3 = vcmp.eq.s32.totalorder %v3371_v35, 1  ;;  %v1230_v21 = vsel %vm1210_vm15, %v3103_v17, %v1114_v61  ;;  %v4284_v61 = vld [vmem:[#allocation60_spill] sm:$0xff] }
 0x2ca   :  { %v1408_v59 = vpop.permute.xlu1 %1407  ;;  %v3738_v26 = vpop.permute.xlu0 %1764  ;;  %vm982_vm5 = vcmp.eq.s32.totalorder %v3178_v63, 1  ;;  %vm1212_vm8 = vcmp.eq.s32.totalorder %v3438_v3, 1  ;;  %v1346_v8 = vsel %vm1326_vm0, %v3136_v39, %v1230_v21  ;;  %v770_v57 = vsel %vm750_vm6, %v2969_v62, %v654_v53 }
 0x2cb   :  { %vm1440_vm2 = vcmp.eq.s32.totalorder %v1408_v59, 1  ;;  %1871 = vperm.xlu1 %1990, %v3499_v9   ;;  %v884_v9 = vsel %vm864_vm12, %v3024_v33, %v768_v40  ;;  %vm1328_vm14 = vcmp.eq.s32.totalorder %v3590_v7, 1  ;;  %v886_v6 = vsel %vm866_vm4, %v3024_v33, %v770_v57  ;;  %v4282_v59 = vld [vmem:[#allocation89_spill] sm:$0xff] }
 0x2cc   :  { %v3748_v10 = vsel %vm1440_vm2, %v3154_v41, %v1344_v20  ;;  %v1000_v49 = vsel %vm980_vm1, %v3064_v44, %v884_v9  ;;  %v4271_v3 = vsub.s32 5, %v2788_v19  ;;  %vm1830_vm10 = vcmp.eq.s32.totalorder %v2223_v52, 15 }
 0x2cd   :  { %v1116_v63 = vsel %vm1096_vm3, %v3095_v47, %v1000_v49  ;;  %v1002_v62 = vsel %vm982_vm5, %v3064_v44, %v886_v6  ;;  %v4273_v22 = vsub.s32 6, %v2788_v19  ;;  %vm1214_vm7 = vcmp.eq.s32.totalorder %v4274_v46, 1  ;;  %v4287_v49 = vld [vmem:[#allocation74_spill] sm:$0xff] }
 0x2ce   :  { %v1414_v23 = vpop.permute.xlu1 %1413  ;;  %v3760_v18 = vpop.permute.xlu0 %1770  ;;  %v3776_v54 = vrot.slane %v1992_v5, %v4271_v3  ;;  %v1232_v7 = vsel %vm1212_vm8, %v3103_v17, %v1116_v63  ;;  %vm1665_vm9 = vcmp.eq.s32.totalorder %v4275_v50, 1  ;;  %vm1330_vm15 = vcmp.eq.s32.totalorder %v3613_v25, 1  ;;  %v4288_v3 = vld [vmem:[#allocation107_spill] sm:$0xff]  ;;  %v4290_v50 = vld [vmem:[#allocation78_spill] sm:$0xff] }
 0x2cf   :  { %vm1442_vm13 = vcmp.eq.s32.totalorder %v1414_v23, 1  ;;  %1877 = vperm.xlu1 %1990, %v3505_v36   ;;  %v4272_v36 = vld [vmem:[#allocation58_spill] sm:$0xff]  ;;  %v3784_v16 = vrot.slane %v1992_v5, %v4273_v22  ;;  %v1348_v31 = vsel %vm1328_vm14, %v3136_v39, %v1232_v7  ;;  %vm1781_vm2 = vcmp.eq.s32.totalorder %v3615_v37, 1  ;;  %v4289_v7 = vld [vmem:[#allocation105_spill] sm:$0xff] }
 0x2d0   :  { %v3770_v35 = vsel %vm1442_vm13, %v3154_v41, %v1346_v8  ;;  %vm1098_vm11 = vcmp.eq.s32.totalorder %v4272_v36, 1  ;;  %v4277_v1 = vsub.s32 7, %v2788_v19  ;;  %v4278_v55 = vmov 0   ;;  %v4285_v23 = vld [vmem:[#allocation62_spill] sm:$0xff] }
 0x2d1   :  { %v1118_v51 = vsel %vm1098_vm11, %v3095_v47, %v1002_v62  ;;  %v1846_v15 = vsel %vm1830_vm10, 1, %v4278_v55  ;;  %v1685_v25 = vsel %vm1665_vm9, %v3776_v54, %v4279_v38  ;;  %vm1667_vm0 = vcmp.eq.s32.totalorder %v4280_v30, 1  ;;  %v4293_v30 = vld [vmem:[#allocation121_spill] sm:$0xff] }
 0x2d2   :  { %v1420_v33 = vpop.permute.xlu1 %1419  ;;  %v3786_v11 = vpop.permute.xlu0 %1776  ;;  %v3799_v13 = vrot.slane %v1992_v5, %v4277_v1  ;;  %v1234_v14 = vsel %vm1214_vm7, %v3103_v17, %v1118_v51  ;;  %vm1832_vm6 = vcmp.eq.s32.totalorder %v4281_v34, 15  ;;  %v1801_v32 = vsel %vm1781_vm2, %v3784_v16, %v1685_v25  ;;  %v4291_v1 = vld [vmem:[#allocation48_spill] sm:$0xff] }
 0x2d3   :  { %vm1444_vm12 = vcmp.eq.s32.totalorder %v1420_v33, 1  ;;  %1883 = vperm.xlu1 %1990, %v4276_v28   ;;  %v1350_v19 = vsel %vm1330_vm15, %v3136_v39, %v1234_v14  ;;  %vm1783_vm3 = vcmp.eq.s32.totalorder %v3637_v48, 1  ;;  %v1687_v4 = vsel %vm1667_vm0, %v3776_v54, %v4282_v59  ;;  %v4292_v14 = vld [vmem:[#allocation36_spill] sm:$0xff] }
 0x2d4   :  { %v3795_v44 = vsel %vm1444_vm12, %v3154_v41, %v1348_v31  ;;  %v1848_v39 = vsel %vm1832_vm6, 1, %v4278_v55  ;;  %vm1669_vm5 = vcmp.eq.s32.totalorder %v4283_v45, 1  ;;  %v1803_v40 = vsel %vm1783_vm3, %v3784_v16, %v1687_v4 }
 0x2d5   :  { %vm1785_vm14 = vcmp.eq.s32.totalorder %v3662_v2, 1  ;;  %v1689_v9 = vsel %vm1669_vm5, %v3776_v54, %v4284_v61  ;;  %vm1671_vm10 = vcmp.eq.s32.totalorder %v4285_v23, 1  ;;  %vm1787_vm9 = vcmp.eq.s32.totalorder %v3687_v56, 1 }
 0x2d6   :  { %v1426_v37 = vpop.permute.xlu1 %1425  ;;  %v1851_v27 = vpop.permute.xlu0 %1850  ;;  %v1805_v8 = vsel %vm1785_vm14, %v3784_v16, %v1689_v9  ;;  %v1691_v6 = vsel %vm1671_vm10, %v3776_v54, %v4287_v49  ;;  %vm1673_vm12 = vcmp.eq.s32.totalorder %v4288_v3, 1  ;;  %vm1789_vm0 = vcmp.eq.s32.totalorder %v3712_v12, 1 }
 0x2d7   :  { %vm1446_vm1 = vcmp.eq.s32.totalorder %v1426_v37, 1  ;;  %vm1897_vm4 = vcmp.eq.s32.totalorder %v1851_v27, 1  ;;  %1889 = vperm.xlu1 %1990, %v1846_v15   ;;  %v1807_v62 = vsel %vm1787_vm9, %v3784_v16, %v1691_v6  ;;  %v1693_v22 = vsel %vm1673_vm12, %v3776_v54, %v4289_v7 }
 0x2d8   :  { %v3814_v52 = vsel %vm1446_vm1, %v3154_v41, %v1350_v19  ;;  %v1917_v47 = vsel %vm1897_vm4, %v3799_v13, %v1801_v32  ;;  %vm1675_vm6 = vcmp.eq.s32.totalorder %v4290_v50, 1  ;;  %v1809_v31 = vsel %vm1789_vm0, %v3784_v16, %v1693_v22  ;;  %v4294_v19 = vld [vmem:[#allocation69_spill] sm:$0xff] }
 0x2d9   :  { %v1933_v17 = vmul.f32 11.313708, %v1917_v47  ;;  %vm1791_vm3 = vcmp.eq.s32.totalorder %v3738_v26, 1  ;;  %v1695_v51 = vsel %vm1675_vm6, %v3776_v54, %v4291_v1  ;;  %vm1677_vm5 = vcmp.eq.s32.totalorder %v4292_v14, 1 }
 0x2da   :  { %v1432_v20 = vpop.permute.xlu1 %1431  ;;  %v1857_v53 = vpop.permute.xlu0 %1856  ;;  %v1811_v38 = vsel %vm1791_vm3, %v3784_v16, %v1695_v51  ;;  %vm1793_vm14 = vcmp.eq.s32.totalorder %v3760_v18, 1  ;;  %v1697_v37 = vsel %vm1677_vm5, %v3776_v54, %v4293_v30  ;;  %vm1679_vm10 = vcmp.eq.s32.totalorder %v4294_v19, 1 }
 0x2db   :  { %1949 = vst [vmem:[#allocation7] sm:$0xff] %v1933_v17  ;;  %vm1448_vm8 = vcmp.eq.s32.totalorder %v1432_v20, 1  ;;  %vm1899_vm13 = vcmp.eq.s32.totalorder %v1857_v53, 1  ;;  %1895 = vperm.xlu1 %1990, %v1848_v39   ;;  %v1813_v32 = vsel %vm1793_vm14, %v3784_v16, %v1697_v37  ;;  %vm1795_vm9 = vcmp.eq.s32.totalorder %v3786_v11, 1  ;;  %v4295_v17 = vld [vmem:[#allocation30_spill] sm:$0xff] }
 0x2dc   :  { %v3825_v48 = vsel %vm1448_vm8, %v3154_v41, %v3647_v0  ;;  %v1919_v24 = vsel %vm1899_vm13, %v3799_v13, %v1803_v40  ;;  %v4286_v41 = vld [vmem:[#allocation46_spill] sm:$0xff]  ;;  %v1699_v59 = vsel %vm1679_vm10, %v3776_v54, %v4295_v17 }
 0x2dd   :  { %v1935_v60 = vmul.f32 11.313708, %v1919_v24  ;;  %v1815_v53 = vsel %vm1795_vm9, %v3784_v16, %v1699_v59 }
 0x2de   :  { %v1506_v42 = vpop.permute.xlu1 %1505  ;;  %v1863_v21 = vpop.permute.xlu0 %1862 }
 0x2df   :  { %1951 = vst [vmem:[#allocation7 + $0x10] sm:$0xff] %v1935_v60  ;;  %vm1550_vm11 = vcmp.eq.s32.totalorder %v1506_v42, 1  ;;  %vm1901_vm7 = vcmp.eq.s32.totalorder %v1863_v21, 1 }
 0x2e0   :  { %v3835_v0 = vsel %vm1550_vm11, %v4286_v41, %v3672_v58  ;;  %v1921_v2 = vsel %vm1901_vm7, %v3799_v13, %v1805_v8 }
 0x2e1   :  { %v1937_v57 = vmul.f32 11.313708, %v1921_v2 }
 0x2e2   :  { %v1512_v63 = vpop.permute.xlu1 %1511  ;;  %v1869_v5 = vpop.permute.xlu0 %1868 }
 0x2e3   :  { %1953 = vst [vmem:[#allocation7 + $0x20] sm:$0xff] %v1937_v57  ;;  %vm1552_vm15 = vcmp.eq.s32.totalorder %v1512_v63, 1  ;;  %vm1903_vm2 = vcmp.eq.s32.totalorder %v1869_v5, 1 }
 0x2e4   :  { %v3845_v58 = vsel %vm1552_vm15, %v4286_v41, %v3697_v29  ;;  %v1923_v56 = vsel %vm1903_vm2, %v3799_v13, %v1807_v62 }
 0x2e5   :  { %v1939_v36 = vmul.f32 11.313708, %v1923_v56 }
 0x2e6   :  { %v1518_v33 = vpop.permute.xlu1 %1517  ;;  %v1875_v46 = vpop.permute.xlu0 %1874 }
 0x2e7   :  { %1955 = vst [vmem:[#allocation7 + $0x30] sm:$0xff] %v1939_v36  ;;  %vm1554_vm1 = vcmp.eq.s32.totalorder %v1518_v33, 1  ;;  %vm1905_vm4 = vcmp.eq.s32.totalorder %v1875_v46, 1 }
 0x2e8   :  { %v3855_v29 = vsel %vm1554_vm1, %v4286_v41, %v3723_v43  ;;  %v1925_v12 = vsel %vm1905_vm4, %v3799_v13, %v1809_v31 }
 0x2e9   :  { %v1941_v28 = vmul.f32 11.313708, %v1925_v12 }
 0x2ea   :  { %v1524_v55 = vpop.permute.xlu1 %1523  ;;  %v1881_v15 = vpop.permute.xlu0 %1880 }
 0x2eb   :  { %1957 = vst [vmem:[#allocation7 + $0x40] sm:$0xff] %v1941_v28  ;;  %vm1556_vm8 = vcmp.eq.s32.totalorder %v1524_v55, 1  ;;  %vm1907_vm13 = vcmp.eq.s32.totalorder %v1881_v15, 1 }
 0x2ec   :  { %v3865_v43 = vsel %vm1556_vm8, %v4286_v41, %v3748_v10  ;;  %v1927_v26 = vsel %vm1907_vm13, %v3799_v13, %v1811_v38 }
 0x2ed   :  { %v1943_v25 = vmul.f32 11.313708, %v1927_v26 }
 0x2ee   :  { %v1530_v27 = vpop.permute.xlu1 %1529  ;;  %v1887_v34 = vpop.permute.xlu0 %1886 }
 0x2ef   :  { %1959 = vst [vmem:[#allocation7 + $0x50] sm:$0xff] %v1943_v25  ;;  %vm1558_vm11 = vcmp.eq.s32.totalorder %v1530_v27, 1  ;;  %vm1909_vm7 = vcmp.eq.s32.totalorder %v1887_v34, 1 }
 0x2f0   :  { %v3875_v10 = vsel %vm1558_vm11, %v4286_v41, %v3770_v35  ;;  %v1929_v18 = vsel %vm1909_vm7, %v3799_v13, %v1813_v32 }
 0x2f1   :  { %v1945_v47 = vmul.f32 11.313708, %v1929_v18 }
 0x2f2   :  { %v1536_v4 = vpop.permute.xlu1 %1535  ;;  %v1893_v20 = vpop.permute.xlu0 %1892 }
 0x2f3   :  { %1961 = vst [vmem:[#allocation7 + $0x60] sm:$0xff] %v1945_v47  ;;  %vm1560_vm12 = vcmp.eq.s32.totalorder %v1536_v4, 1  ;;  %vm1911_vm15 = vcmp.eq.s32.totalorder %v1893_v20, 1 }
 0x2f4   :  { %v3883_v11 = vsel %vm1560_vm12, %v4286_v41, %v3795_v44  ;;  %v1931_v35 = vsel %vm1911_vm15, %v3799_v13, %v1815_v53 }
 0x2f5   :  { %v1947_v39 = vmul.f32 11.313708, %v1931_v35 }
 0x2f6   :  { %v1542_v45 = vpop.permute.xlu1 %1541 }
 0x2f7   :  { %1963 = vst [vmem:[#allocation7 + $0x70] sm:$0xff] %v1947_v39  ;;  %vm1562_vm2 = vcmp.eq.s32.totalorder %v1542_v45, 1 }
 0x2f8   :  { %v3888_v40 = vsel %vm1562_vm2, %v4286_v41, %v3814_v52 }
 0x2fa   :  { %v1548_v24 = vpop.permute.xlu1 %1547 }
 0x2fb   :  { %vm1564_vm0 = vcmp.eq.s32.totalorder %v1548_v24, 1 }
 0x2fc   :  { %v3892_v60 = vsel %vm1564_vm0, %v4286_v41, %v3825_v48 }
 0x2fe   :  { %v1622_v61 = vpop.permute.xlu1 %1621 }
 0x2ff   :  { %vm1666_vm6 = vcmp.eq.s32.totalorder %v1622_v61, 1 }
 0x300   :  { %v1686_v48 = vsel %vm1666_vm6, %v3776_v54, %v3835_v0 }
 0x302   :  { %v1628_v9 = vpop.permute.xlu1 %1627 }
 0x303   :  { %vm1668_vm4 = vcmp.eq.s32.totalorder %v1628_v9, 1 }
 0x304   :  { %v1688_v22 = vsel %vm1668_vm4, %v3776_v54, %v3845_v58 }
 0x306   :  { %v1634_v44 = vpop.permute.xlu1 %1633 }
 0x307   :  { %vm1670_vm8 = vcmp.eq.s32.totalorder %v1634_v44, 1 }
 0x308   :  { %v1690_v31 = vsel %vm1670_vm8, %v3776_v54, %v3855_v29 }
 0x30a   :  { %v1640_v42 = vpop.permute.xlu1 %1639 }
 0x30b   :  { %vm1672_vm10 = vcmp.eq.s32.totalorder %v1640_v42, 1 }
 0x30c   :  { %v1692_v51 = vsel %vm1672_vm10, %v3776_v54, %v3865_v43 }
 0x30e   :  { %v1646_v21 = vpop.permute.xlu1 %1645 }
 0x30f   :  { %vm1674_vm9 = vcmp.eq.s32.totalorder %v1646_v21, 1 }
 0x310   :  { %v1694_v38 = vsel %vm1674_vm9, %v3776_v54, %v3875_v10 }
 0x312   :  { %v1652_v23 = vpop.permute.xlu1 %1651 }
 0x313   :  { %vm1676_vm2 = vcmp.eq.s32.totalorder %v1652_v23, 1 }
 0x314   :  { %v1696_v37 = vsel %vm1676_vm2, %v3776_v54, %v3883_v11 }
 0x316   :  { %v3894_v8 = vpop.permute.xlu1 %1657 }
 0x31a   :  { %v3896_v2 = vpop.permute.xlu1 %1663 }
 0x31e   :  { %v1738_v57 = vpop.permute.xlu1 %1737 }
 0x31f   :  { %vm1782_vm1 = vcmp.eq.s32.totalorder %v1738_v57, 1 }
 0x320   :  { %v1802_v56 = vsel %vm1782_vm1, %v3784_v16, %v1686_v48  ;;  %vm1678_vm1 = vcmp.eq.s32.totalorder %v3894_v8, 1 }
 0x321   :  { %v1698_v10 = vsel %vm1678_vm1, %v3776_v54, %v3888_v40 }
 0x322   :  { %v1744_v49 = vpop.permute.xlu1 %1743 }
 0x323   :  { %vm1784_vm5 = vcmp.eq.s32.totalorder %v1744_v49, 1 }
 0x324   :  { %v1804_v46 = vsel %vm1784_vm5, %v3784_v16, %v1688_v22  ;;  %vm1680_vm5 = vcmp.eq.s32.totalorder %v3896_v2, 1 }
 0x325   :  { %v1700_v4 = vsel %vm1680_vm5, %v3776_v54, %v3892_v60 }
 0x326   :  { %v1750_v52 = vpop.permute.xlu1 %1749 }
 0x327   :  { %vm1786_vm14 = vcmp.eq.s32.totalorder %v1750_v52, 1 }
 0x328   :  { %v1806_v28 = vsel %vm1786_vm14, %v3784_v16, %v1690_v31 }
 0x32a   :  { %v1756_v6 = vpop.permute.xlu1 %1755 }
 0x32b   :  { %vm1788_vm7 = vcmp.eq.s32.totalorder %v1756_v6, 1 }
 0x32c   :  { %v1808_v15 = vsel %vm1788_vm7, %v3784_v16, %v1692_v51 }
 0x32e   :  { %v1762_v63 = vpop.permute.xlu1 %1761 }
 0x32f   :  { %vm1790_vm15 = vcmp.eq.s32.totalorder %v1762_v63, 1 }
 0x330   :  { %v1810_v25 = vsel %vm1790_vm15, %v3784_v16, %v1694_v38 }
 0x332   :  { %v1768_v5 = vpop.permute.xlu1 %1767 }
 0x333   :  { %vm1792_vm6 = vcmp.eq.s32.totalorder %v1768_v5, 1 }
 0x334   :  { %v1812_v34 = vsel %vm1792_vm6, %v3784_v16, %v1696_v37 }
 0x336   :  { %v1774_v3 = vpop.permute.xlu1 %1773 }
 0x33a   :  { %v3898_v62 = vpop.permute.xlu1 %1779 }
 0x33e   :  { %v1854_v41 = vpop.permute.xlu1 %1853 }
 0x33f   :  { %vm1898_vm3 = vcmp.eq.s32.totalorder %v1854_v41, 1 }
 0x340   :  { %v1918_v36 = vsel %vm1898_vm3, %v3799_v13, %v1802_v56  ;;  %vm1794_vm3 = vcmp.eq.s32.totalorder %v1774_v3, 1 }
 0x341   :  { %v1934_v7 = vmul.f32 11.313708, %v1918_v36  ;;  %v1814_v47 = vsel %vm1794_vm3, %v3784_v16, %v1698_v10 }
 0x342   :  { %v1860_v33 = vpop.permute.xlu1 %1859 }
 0x343   :  { %1950 = vst [vmem:[#allocation7 + $0x8] sm:$0xff] %v1934_v7  ;;  %vm1900_vm13 = vcmp.eq.s32.totalorder %v1860_v33, 1 }
 0x344   :  { %v1920_v0 = vsel %vm1900_vm13, %v3799_v13, %v1804_v46  ;;  %vm1796_vm13 = vcmp.eq.s32.totalorder %v3898_v62, 1 }
 0x345   :  { %v1936_v50 = vmul.f32 11.313708, %v1920_v0  ;;  %v1816_v53 = vsel %vm1796_vm13, %v3784_v16, %v1700_v4 }
 0x346   :  { %v1866_v12 = vpop.permute.xlu1 %1865 }
 0x347   :  { %1952 = vst [vmem:[#allocation7 + $0x18] sm:$0xff] %v1936_v50  ;;  %vm1902_vm11 = vcmp.eq.s32.totalorder %v1866_v12, 1 }
 0x348   :  { %v1922_v58 = vsel %vm1902_vm11, %v3799_v13, %v1806_v28 }
 0x349   :  { %v1938_v1 = vmul.f32 11.313708, %v1922_v58 }
 0x34a   :  { %v1872_v55 = vpop.permute.xlu1 %1871 }
 0x34b   :  { %1954 = vst [vmem:[#allocation7 + $0x28] sm:$0xff] %v1938_v1  ;;  %vm1904_vm12 = vcmp.eq.s32.totalorder %v1872_v55, 1 }
 0x34c   :  { %v1924_v29 = vsel %vm1904_vm12, %v3799_v13, %v1808_v15 }
 0x34d   :  { %v1940_v14 = vmul.f32 11.313708, %v1924_v29 }
 0x34e   :  { %v1878_v26 = vpop.permute.xlu1 %1877 }
 0x34f   :  { %1956 = vst [vmem:[#allocation7 + $0x38] sm:$0xff] %v1940_v14  ;;  %vm1906_vm0 = vcmp.eq.s32.totalorder %v1878_v26, 1 }
 0x350   :  { %v1926_v43 = vsel %vm1906_vm0, %v3799_v13, %v1810_v25 }
 0x351   :  { %v1942_v30 = vmul.f32 11.313708, %v1926_v43 }
 0x352   :  { %v1884_v27 = vpop.permute.xlu1 %1883 }
 0x353   :  { %1958 = vst [vmem:[#allocation7 + $0x48] sm:$0xff] %v1942_v30  ;;  %vm1908_vm4 = vcmp.eq.s32.totalorder %v1884_v27, 1 }
 0x354   :  { %v1928_v19 = vsel %vm1908_vm4, %v3799_v13, %v1812_v34 }
 0x355   :  { %v1944_v32 = vmul.f32 11.313708, %v1928_v19 }
 0x356   :  { %v1890_v18 = vpop.permute.xlu1 %1889 }
 0x357   :  { %1960 = vst [vmem:[#allocation7 + $0x58] sm:$0xff] %v1944_v32  ;;  %vm1910_vm8 = vcmp.eq.s32.totalorder %v1890_v18, 1 }
 0x358   :  { %v1930_v17 = vsel %vm1910_vm8, %v3799_v13, %v1814_v47 }
 0x359   :  { %v1946_v59 = vmul.f32 11.313708, %v1930_v17 }
 0x35a   :  { %v1896_v20 = vpop.permute.xlu1 %1895 }
 0x35b   :  { %1962 = vst [vmem:[#allocation7 + $0x68] sm:$0xff] %v1946_v59  ;;  %vm1912_vm14 = vcmp.eq.s32.totalorder %v1896_v20, 1 }
 0x35c   :  { %v1932_v11 = vsel %vm1912_vm14, %v3799_v13, %v1816_v53 }
 0x35d   :  { %v1948_v35 = vmul.f32 11.313708, %v1932_v11 }
 0x35f   :  { %1964 = vst [vmem:[#allocation7 + $0x78] sm:$0xff] %v1948_v35 }
 0x360   :  { %2048 = shalt.err (!%p2045_p6)
}
 0x361   :  { %s2049_s11 = scalar_lea.hbm %s3952_s2, 2048 }
 0x362   :  { %p2050_p7 = scmp.ne.s32.totalorder %s3952_s2, %s2049_s11  ;;  %p2053_p8 = scmp.lt.u32.totalorder %s2049_s11, %s3952_s2 }
 0x364   :  { %p2055_p9 = pnand %p2053_p8, %p2050_p7 }
 0x366   :  { %2058 = shalt.err (!%p2055_p9)
}
 0x367   :  { %1976 = dma.vmem_to_hbm [thread:$0]  %s1971_s7, 2048, %s3952_s2, [#allocation4], %s2067_s0, %s2067_s0, %s2068_s4  }
 0x368   :  { %2063 = dma.done.wait [#allocation4], 2048  }
 0x369   :  { %2064 = vsyncadd [#allocation4], 4294965248 }
 0x36a   :  { %1980 = vsyncpa [#allocation3], 1 }
 0x36b   :  { %1981 = vsyncpa [#allocation6], 1 }
 0x36c   :  { %1982 = vsyncpa [#allocation4], 1 }

</bundles_post_ra>
